<compile_context>
chip_gen: v7x
topology: tpu7x:2x2x1
jax: 0.10.0
libtpu: 0.0.40
codegen_flags: <defaults>
</compile_context>

<pallas_src>
import functools

import jax
import jax.numpy as jnp
from jax.experimental import pallas as pl
from jax.experimental.pallas import tpu as pltpu


def _siren_kernel(x_ref, w1_ref, b1_ref, wh_ref, bh_ref, wf_ref, bf_ref, o_ref,
                  *, hidden_layers, apply_final_sine):
    # x: (in_features, tm)  -- tm on the lane axis.
    x = x_ref[...]

    # First SineLayer: sin(W1' @ x + b1')   (omega_0 already folded in).
    h = jnp.dot(w1_ref[...], x, preferred_element_type=jnp.float32)
    h = jnp.sin(h + b1_ref[...])                      # b1: (hidden, 1)

    # Hidden SineLayers (static unrolled; hidden_layers is small).
    for l in range(hidden_layers):
        h = jnp.dot(wh_ref[l], h, preferred_element_type=jnp.float32)
        h = jnp.sin(h + bh_ref[l])                    # bh[l]: (hidden, 1)

    # Final layer (omega folded in iff it is a SineLayer).
    out = jnp.dot(wf_ref[...], h, preferred_element_type=jnp.float32)
    out = out + bf_ref[...]                           # bf: (out_features, 1)
    if apply_final_sine:
        out = jnp.sin(out)
    o_ref[...] = out.astype(o_ref.dtype)              # (out_features, tm), lane-dense


def siren_forward(coords, params, *, hidden_layers, first_omega_0=30.0,
                  hidden_omega_0=30.0, outermost_linear=False, tm=1024):
    """coords: (N, in_features) float32.  Returns (N, out_features) float32."""
    w1, b1, wh, bh, wf, bf = params
    N, in_features = coords.shape
    hidden = w1.shape[0]
    out_features = wf.shape[0]
    f32 = jnp.float32

    # ---- host-side weight prep: fold omega, reshape biases to 2-D ----------
    w1s = (first_omega_0 * w1).astype(f32)                       # (hidden, in)
    b1s = (first_omega_0 * b1).reshape(hidden, 1).astype(f32)    # (hidden, 1)
    if hidden_layers > 0:
        whs = (hidden_omega_0 * wh).astype(f32)                  # (L, hid, hid)
        bhs = (hidden_omega_0 * bh).reshape(hidden_layers, hidden, 1).astype(f32)
    else:
        # Guard the empty case with a 1-deep dummy block (never read in kernel).
        whs = jnp.zeros((1, hidden, hidden), f32)
        bhs = jnp.zeros((1, hidden, 1), f32)
    if outermost_linear:
        wfs = wf.astype(f32)
        bfs = bf.reshape(out_features, 1).astype(f32)
    else:
        wfs = (hidden_omega_0 * wf).astype(f32)
        bfs = (hidden_omega_0 * bf).reshape(out_features, 1).astype(f32)

    # ---- feature-major coords, padded so N is a multiple of tm -------------
    tm = min(tm, max(128, pl.next_power_of_2(N)))
    n_pad = pl.cdiv(N, tm) * tm
    x_fm = coords.astype(f32).T                                  # (in, N)
    if n_pad != N:
        x_fm = jnp.pad(x_fm, ((0, 0), (0, n_pad - N)))

    kernel = functools.partial(
        _siren_kernel,
        hidden_layers=hidden_layers,
        apply_final_sine=not outermost_linear,
    )

    # Small weights/biases: full (untiled) VMEM blocks, replicated over grid.
    full = lambda a: pl.BlockSpec(a.shape, lambda i, _nd=a.ndim: (0,) * _nd)

    out_fm = pl.pallas_call(
        kernel,
        out_shape=jax.ShapeDtypeStruct((out_features, n_pad), f32),
        grid_spec=pltpu.PrefetchScalarGridSpec(
            num_scalar_prefetch=0,
            grid=(n_pad // tm,),
            in_specs=[
                pl.BlockSpec((in_features, tm), lambda i: (0, i)),  # coords tile
                full(w1s),    # (hidden, in_features)
                full(b1s),    # (hidden, 1)
                full(whs),    # (L or 1, hidden, hidden)
                full(bhs),    # (L or 1, hidden, 1)
                full(wfs),    # (out_features, hidden)
                full(bfs),    # (out_features, 1)
            ],
            out_specs=pl.BlockSpec((out_features, tm), lambda i: (0, i)),
        ),
        compiler_params=pltpu.CompilerParams(
            dimension_semantics=("parallel",)),
    )(x_fm, w1s, b1s, whs, bhs, wfs, bfs)

    return out_fm.T[:N]                                          # (N, out_features)


def init_siren_params(key, in_features, hidden_features, hidden_layers,
                      out_features, first_omega_0=30.0, hidden_omega_0=30.0,
                      outermost_linear=False):
    """Deterministic init matching the PyTorch module's init semantics."""
    ks = jax.random.split(key, 2 * (hidden_layers + 2))
    kit = iter(ks)

    def uniform(k, shape, bound):
        return jax.random.uniform(k, shape, jnp.float32, -bound, bound)

    # First SineLayer: W ~ U(-1/in, 1/in); bias uses nn.Linear default.
    w1 = uniform(next(kit), (hidden_features, in_features), 1.0 / in_features)
    b1 = uniform(next(kit), (hidden_features,), 1.0 / jnp.sqrt(in_features))

    # Hidden SineLayers: W ~ U(-sqrt(6/in)/omega, sqrt(6/in)/omega).
    hb = float(jnp.sqrt(6.0 / hidden_features) / hidden_omega_0)
    bb = float(1.0 / jnp.sqrt(hidden_features))
    whs, bhs = [], []
    for _ in range(hidden_layers):
        whs.append(uniform(next(kit), (hidden_features, hidden_features), hb))
        bhs.append(uniform(next(kit), (hidden_features,), bb))
    wh = (jnp.stack(whs) if hidden_layers > 0
          else jnp.zeros((0, hidden_features, hidden_features), jnp.float32))
    bh = (jnp.stack(bhs) if hidden_layers > 0
          else jnp.zeros((0, hidden_features), jnp.float32))

    # Final layer (same weight init range whether SineLayer or outermost linear).
    wf = uniform(next(kit), (out_features, hidden_features), hb)
    bf = uniform(next(kit), (out_features,), bb)
    return w1, b1, wh, bh, wf, bf


def siren_reference(coords, params, *, hidden_layers, first_omega_0=30.0,
                    hidden_omega_0=30.0, outermost_linear=False):
    """Plain-JAX reference for correctness check (matches torch semantics)."""
    w1, b1, wh, bh, wf, bf = params
    h = jnp.sin(first_omega_0 * (coords @ w1.T + b1))
    for l in range(hidden_layers):
        h = jnp.sin(hidden_omega_0 * (h @ wh[l].T + bh[l]))
    out = h @ wf.T + bf
    if not outermost_linear:
        out = jnp.sin(hidden_omega_0 * out)
    return out


if __name__ == "__main__":
    # Small SIREN: 3-D coords -> 32 hidden, 2 hidden layers -> 1 output.
    in_features, hidden_features, hidden_layers, out_features = 3, 32, 2, 1
    first_omega_0, hidden_omega_0 = 30.0, 30.0
    outermost_linear = False   # default of the PyTorch module

    key = jax.random.PRNGKey(0)
    kp, kx = jax.random.split(key)
    params = init_siren_params(kp, in_features, hidden_features, hidden_layers,
                               out_features, first_omega_0, hidden_omega_0,
                               outermost_linear)

    N = 512  # number of query coordinates (flattened batch * points)
    coords = jax.random.uniform(kx, (N, in_features), jnp.float32, -1.0, 1.0)

    out = siren_forward(coords, params,
                        hidden_layers=hidden_layers,
                        first_omega_0=first_omega_0,
                        hidden_omega_0=hidden_omega_0,
                        outermost_linear=outermost_linear,
                        tm=256)  # grid of 2 so both v7x TensorCores get work
    out = jax.block_until_ready(out)

    ref = siren_reference(coords, params,
                          hidden_layers=hidden_layers,
                          first_omega_0=first_omega_0,
                          hidden_omega_0=hidden_omega_0,
                          outermost_linear=outermost_linear)
    assert out.shape == (N, out_features)
    assert jnp.allclose(out, ref, atol=1e-4, rtol=1e-4)
    print("KERNEL_OK")
</pallas_src>

<mosaic_0001>
module attributes {stable_mosaic.version = 11 : i64} {
  func.func @_siren_kernel(%arg0: i32, %arg1: memref<3x256xf32, #tpu.memory_space<vmem>>, %arg2: memref<32x3xf32, #tpu.memory_space<vmem>>, %arg3: memref<32x1xf32, #tpu.memory_space<vmem>>, %arg4: memref<2x32x32xf32, #tpu.memory_space<vmem>>, %arg5: memref<2x32x1xf32, #tpu.memory_space<vmem>>, %arg6: memref<1x32xf32, #tpu.memory_space<vmem>>, %arg7: memref<1x1xf32, #tpu.memory_space<vmem>>, %arg8: memref<1x256xf32, #tpu.memory_space<vmem>>) attributes {dimension_semantics = [#tpu.dimension_semantics<parallel>], iteration_bounds = array<i64: 2>, scalar_prefetch = 0 : i64, scratch_operands = 0 : i64, tpu.core_type = #tpu.core_type<tc>, window_params = [{transform_indices = @transform_0, window_bounds = array<i64: 3, 256>}, {pipeline_mode = #tpu.pipeline_mode<synchronous>, transform_indices = @transform_1, window_bounds = array<i64: 32, 3>}, {pipeline_mode = #tpu.pipeline_mode<synchronous>, transform_indices = @transform_2, window_bounds = array<i64: 32, 1>}, {pipeline_mode = #tpu.pipeline_mode<synchronous>, transform_indices = @transform_3, window_bounds = array<i64: 2, 32, 32>}, {pipeline_mode = #tpu.pipeline_mode<synchronous>, transform_indices = @transform_4, window_bounds = array<i64: 2, 32, 1>}, {pipeline_mode = #tpu.pipeline_mode<synchronous>, transform_indices = @transform_5, window_bounds = array<i64: 1, 32>}, {pipeline_mode = #tpu.pipeline_mode<synchronous>, transform_indices = @transform_6, window_bounds = array<i64: 1, 1>}, {transform_indices = @transform_7, window_bounds = array<i64: 1, 256>}]} {
    %c0 = arith.constant 0 : index
    %c0_0 = arith.constant 0 : index
    %0 = vector.load %arg1[%c0, %c0_0] : memref<3x256xf32, #tpu.memory_space<vmem>>, vector<3x256xf32>
    %c0_1 = arith.constant 0 : index
    %c0_2 = arith.constant 0 : index
    %1 = vector.load %arg2[%c0_1, %c0_2] : memref<32x3xf32, #tpu.memory_space<vmem>>, vector<32x3xf32>
    %cst = arith.constant dense<0.000000e+00> : vector<32x256xf32>
    %2 = tpu.matmul %1, %0, %cst {dimension_numbers = #tpu.dot_dimension_numbers<[1], [0], [0], [1], [0, 0, 1, 1], [], []>} : vector<32x3xf32>, vector<3x256xf32>, vector<32x256xf32> -> vector<32x256xf32>
    %c0_3 = arith.constant 0 : index
    %c0_4 = arith.constant 0 : index
    %3 = vector.load %arg3[%c0_3, %c0_4] : memref<32x1xf32, #tpu.memory_space<vmem>>, vector<32x1xf32>
    %4 = vector.broadcast %3 : vector<32x1xf32> to vector<32x256xf32>
    %5 = arith.addf %2, %4 : vector<32x256xf32>
    %6 = math.sin %5 : vector<32x256xf32>
    %c0_5 = arith.constant 0 : index
    %c0_6 = arith.constant 0 : index
    %c0_7 = arith.constant 0 : index
    %7 = vector.load %arg4[%c0_5, %c0_6, %c0_7] : memref<2x32x32xf32, #tpu.memory_space<vmem>>, vector<1x32x32xf32>
    %8 = vector.shape_cast %7 : vector<1x32x32xf32> to vector<32x32xf32>
    %cst_8 = arith.constant dense<0.000000e+00> : vector<32x256xf32>
    %9 = tpu.matmul %8, %6, %cst_8 {dimension_numbers = #tpu.dot_dimension_numbers<[1], [0], [0], [1], [0, 0, 1, 1], [], []>} : vector<32x32xf32>, vector<32x256xf32>, vector<32x256xf32> -> vector<32x256xf32>
    %c0_9 = arith.constant 0 : index
    %c0_10 = arith.constant 0 : index
    %c0_11 = arith.constant 0 : index
    %10 = vector.load %arg5[%c0_9, %c0_10, %c0_11] : memref<2x32x1xf32, #tpu.memory_space<vmem>>, vector<1x32x1xf32>
    %11 = vector.shape_cast %10 : vector<1x32x1xf32> to vector<32x1xf32>
    %12 = vector.broadcast %11 : vector<32x1xf32> to vector<32x256xf32>
    %13 = arith.addf %9, %12 : vector<32x256xf32>
    %14 = math.sin %13 : vector<32x256xf32>
    %c1 = arith.constant 1 : index
    %c0_12 = arith.constant 0 : index
    %c0_13 = arith.constant 0 : index
    %15 = vector.load %arg4[%c1, %c0_12, %c0_13] : memref<2x32x32xf32, #tpu.memory_space<vmem>>, vector<1x32x32xf32>
    %16 = vector.shape_cast %15 : vector<1x32x32xf32> to vector<32x32xf32>
    %cst_14 = arith.constant dense<0.000000e+00> : vector<32x256xf32>
    %17 = tpu.matmul %16, %14, %cst_14 {dimension_numbers = #tpu.dot_dimension_numbers<[1], [0], [0], [1], [0, 0, 1, 1], [], []>} : vector<32x32xf32>, vector<32x256xf32>, vector<32x256xf32> -> vector<32x256xf32>
    %c1_15 = arith.constant 1 : index
    %c0_16 = arith.constant 0 : index
    %c0_17 = arith.constant 0 : index
    %18 = vector.load %arg5[%c1_15, %c0_16, %c0_17] : memref<2x32x1xf32, #tpu.memory_space<vmem>>, vector<1x32x1xf32>
    %19 = vector.shape_cast %18 : vector<1x32x1xf32> to vector<32x1xf32>
    %20 = vector.broadcast %19 : vector<32x1xf32> to vector<32x256xf32>
    %21 = arith.addf %17, %20 : vector<32x256xf32>
    %22 = math.sin %21 : vector<32x256xf32>
    %c0_18 = arith.constant 0 : index
    %c0_19 = arith.constant 0 : index
    %23 = vector.load %arg6[%c0_18, %c0_19] : memref<1x32xf32, #tpu.memory_space<vmem>>, vector<1x32xf32>
    %cst_20 = arith.constant dense<0.000000e+00> : vector<1x256xf32>
    %24 = tpu.matmul %23, %22, %cst_20 {dimension_numbers = #tpu.dot_dimension_numbers<[1], [0], [0], [1], [0, 0, 1, 1], [], []>} : vector<1x32xf32>, vector<32x256xf32>, vector<1x256xf32> -> vector<1x256xf32>
    %c0_21 = arith.constant 0 : index
    %c0_22 = arith.constant 0 : index
    %25 = vector.load %arg7[%c0_21, %c0_22] : memref<1x1xf32, #tpu.memory_space<vmem>>, vector<1x1xf32>
    %26 = vector.broadcast %25 : vector<1x1xf32> to vector<1x256xf32>
    %27 = arith.addf %24, %26 : vector<1x256xf32>
    %28 = math.sin %27 : vector<1x256xf32>
    %c0_23 = arith.constant 0 : index
    %c0_24 = arith.constant 0 : index
    %29 = vector.load %arg8[%c0_23, %c0_24] : memref<1x256xf32, #tpu.memory_space<vmem>>, vector<1x256xf32>
    tpu.vector_store %arg8[%c0_23, %c0_24], %28 {strides = array<i32>} : memref<1x256xf32, #tpu.memory_space<vmem>>, vector<1x256xf32>,
    return
  }
  func.func @transform_0(%arg0: i32) -> (i32, i32) {
    %c0_i32 = arith.constant 0 : i32
    %c0_i32_0 = arith.constant 0 : i32
    return %c0_i32, %arg0 : i32, i32
  }
  func.func @transform_1(%arg0: i32) -> (i32, i32) {
    %c0_i32 = arith.constant 0 : i32
    %c0_i32_0 = arith.constant 0 : i32
    %c0_i32_1 = arith.constant 0 : i32
    return %c0_i32, %c0_i32_0 : i32, i32
  }
  func.func @transform_2(%arg0: i32) -> (i32, i32) {
    %c0_i32 = arith.constant 0 : i32
    %c0_i32_0 = arith.constant 0 : i32
    %c0_i32_1 = arith.constant 0 : i32
    return %c0_i32, %c0_i32_0 : i32, i32
  }
  func.func @transform_3(%arg0: i32) -> (i32, i32, i32) {
    %c0_i32 = arith.constant 0 : i32
    %c0_i32_0 = arith.constant 0 : i32
    %c0_i32_1 = arith.constant 0 : i32
    %c0_i32_2 = arith.constant 0 : i32
    return %c0_i32, %c0_i32_0, %c0_i32_1 : i32, i32, i32
  }
  func.func @transform_4(%arg0: i32) -> (i32, i32, i32) {
    %c0_i32 = arith.constant 0 : i32
    %c0_i32_0 = arith.constant 0 : i32
    %c0_i32_1 = arith.constant 0 : i32
    %c0_i32_2 = arith.constant 0 : i32
    return %c0_i32, %c0_i32_0, %c0_i32_1 : i32, i32, i32
  }
  func.func @transform_5(%arg0: i32) -> (i32, i32) {
    %c0_i32 = arith.constant 0 : i32
    %c0_i32_0 = arith.constant 0 : i32
    %c0_i32_1 = arith.constant 0 : i32
    return %c0_i32, %c0_i32_0 : i32, i32
  }
  func.func @transform_6(%arg0: i32) -> (i32, i32) {
    %c0_i32 = arith.constant 0 : i32
    %c0_i32_0 = arith.constant 0 : i32
    %c0_i32_1 = arith.constant 0 : i32
    return %c0_i32, %c0_i32_0 : i32, i32
  }
  func.func @transform_7(%arg0: i32) -> (i32, i32) {
    %c0_i32 = arith.constant 0 : i32
    %c0_i32_0 = arith.constant 0 : i32
    return %c0_i32, %arg0 : i32, i32
  }
}

</mosaic_0001>

<bundles_post_ra>
// kernel: tpu_custom_call.1
= control target key start
LH: loop header
LB: loop body
LE: loop exit
PB: predicated region body
PF: predicated region fallthrough
CT: control target
= control target key end

     0   :  { %s6350_s0 = inlined_call_operand.vmem [shape: f32[3,512], index: 0, kind: input, shape index: {}]   ;;  %s6351_s1 = inlined_call_operand.vmem [shape: f32[32,3], index: 1, kind: input, shape index: {}]   ;;  %s6352_s2 = inlined_call_operand.vmem [shape: f32[32,1], index: 2, kind: input, shape index: {}]   ;;  %s6353_s3 = inlined_call_operand.vmem [shape: f32[2,32,32], index: 3, kind: input, shape index: {}]   ;;  %s6354_s4 = inlined_call_operand.vmem [shape: f32[2,32,1], index: 4, kind: input, shape index: {}]   ;;  %s6355_s5 = inlined_call_operand.vmem [shape: f32[1,32], index: 5, kind: input, shape index: {}]   ;;  %s6356_s6 = inlined_call_operand.<no memory space> [shape: f32[1,1], index: 6, kind: input, shape index: {}]   ;;  %s6357_s7 = inlined_call_operand.hbm [shape: f32[1,512], index: 7, kind: output, shape index: {}]  }
   0x1   :  { %v12_v0 = vstv %s6356_s6 }
   0x2   :  { %13 = vst [vmem:[#allocation2] sm:$0x1] %v12_v0 }
   0x3   :  { %14 = vsyncpa [#allocation4], 0 }
   0x4   :  { %16 = vsyncpa [#allocation4 + $0x1], 0  ;;  %s4109_s26 = smov 0   ;;  %s4111_s27 = smov 0  }
   0x5   :  { %s4113_s28 = smov 0   ;;  %s4115_s29 = smov 0  }
   0x6 LB: > { %s4130_s6 = sadd.s32 4294967295, %s4054_s29   ;;  %s3567_s30 = sadd.s32 4294967294, %s4054_s29   ;;  %s4054_s29 = sphi %s4115_s29, %s6486_s29   ;;  %s4050_s28 = sphi %s4113_s28, %s6485_s28   ;;  %s4046_s27 = sphi %s4111_s27, %s6484_s27   ;;  %s4042_s26 = sphi %s4109_s26, %s6483_s26  }
   0x7   : > { %s4134_s8 = sadd.s32 1, %s4054_s29   ;;  %s181_s9 = sadd.s32 1, %s4050_s28 }
   0x8   : > { %s178_s10 = ssub.s32 %s4054_s29, %s4134_s8  ;;  %p191_p0 = scmp.ne.s32.totalorder %s4050_s28, %s4046_s27 }
   0x9   : > { %p179_p1 = scmp.eq.s32.totalorder %s178_s10, 0  ;;  %p192_p2 = scmp.eq.s32.totalorder %s4130_s6, 1 }
   0xa   : > { %p197_p3 = scmp.ne.s32.totalorder %s4046_s27, %s4042_s26  ;;  %p198_p4 = scmp.eq.s32.totalorder %s3567_s30, 1 }
   0xb   : > { %s4145_s11 = scalar_select %p179_p1, %s4050_s28, %s181_s9  }
   0xc   : > { %p4147_p5 = por %p192_p2, %p191_p0  ;;  %p4151_p6 = por %p198_p4, %p197_p3 }
   0xd   : > { %p3570_p7 = scmp.ge.s32.totalorder %s4054_s29, 1  ;;  %p243_p8 = scmp.lt.s32.totalorder %s4054_s29, 3 }
   0xf   : > { %p244_p9 = pnand %p3570_p7, %p243_p8 }
  0x10   : > { %s3572_s14 = sshll.u32 (!%p244_p9), %s4130_s6, 1  ;;  %v6358_v1 = vmov (!%p244_p9), 0.0   ;;  %v287_v2 = vld [vmem:[%s6352_s2] sm:$0xff] (!%p244_p9)  ;;  %v4057_v3 = vmov (!%p244_p9), 0   ;;  %v289_v4 = vld [vmem:[%s6352_s2 + $0x10] sm:$0xff] (!%p244_p9)  ;;  %v288_v5 = vld [vmem:[%s6352_s2 + $0x8] sm:$0xff] (!%p244_p9) }
  0x11   : > { %247 = sbr.rel (%p244_p9) target bundleno = 1657 (0x679), region = 48  ;;  %p276_p10 = scmp.lt.s32.totalorder (!%p244_p9), %s3572_s14, 3  ;;  %395 = vmatprep.mubr.f32.mxu0 (!%p244_p9), %v6358_v1  ;;  %407 = vmatprep.mubr.f32.mxu1 (!%p244_p9), %v6358_v1  ;;  %v290_v6 = vld [vmem:[%s6352_s2 + $0x18] sm:$0xff] (!%p244_p9)  ;;  %vm326_vm0 = vcmask (!%p244_p9), 1042432   ;;  %v283_v9 = vld [vmem:[%s6351_s1] sm:$0xff] (!%p244_p9)  ;;  %vm313_vm1 = vcmask (!%p244_p9), 23552  }
  0x12   : > { %3885 = vset.pattern.permute.xlu0 (!%p244_p9), %v4057_v3  ;;  %3886 = vset.pattern.permute.xlu1 (!%p244_p9), %v4057_v3  ;;  %v285_v10 = vld [vmem:[%s6351_s1 + $0x10] sm:$0xff] (!%p244_p9)  ;;  %v1256_v11 = vld [vmem:[%s6354_s4] sm:$0xff] (!%p244_p9)  ;;  %v1257_v12 = vld [vmem:[%s6354_s4 + $0x8] sm:$0xff] (!%p244_p9)  ;;  %v6380_v60 = vmov (!%p244_p9), 683565275   ;;  %s272_s24 = sand.u32 (!%p244_p9), 1, %s4046_s27  }
  0x13   : > { %293 = vperm.xlu0 (!%p244_p9), %3885, %v287_v2   ;;  %303 = vperm.xlu1 (!%p244_p9), %3886, %v289_v4   ;;  %v284_v13 = vld [vmem:[%s6351_s1 + $0x8] sm:$0xff] (!%p244_p9)  ;;  %v286_v14 = vld [vmem:[%s6351_s1 + $0x18] sm:$0xff] (!%p244_p9)  ;;  %v1258_v15 = vld [vmem:[%s6354_s4 + $0x10] sm:$0xff] (!%p244_p9)  ;;  %v6378_v0 = vmov (!%p244_p9), 2475754826   ;;  %s3571_s25 = sshll.u32 (!%p244_p9), %s272_s24, 1 }
  0x14   : > { %v1259_v16 = vld [vmem:[%s6354_s4 + $0x18] sm:$0xff] (!%p244_p9)  ;;  %v3652_v17 = vld [vmem:[%s6354_s4 + $0x20] sm:$0xff] (!%p244_p9)  ;;  %v3653_v18 = vld [vmem:[%s6354_s4 + $0x28] sm:$0xff] (!%p244_p9)  ;;  %v6372_v3 = vmov (!%p244_p9), 2131351028   ;;  %s274_s9 = scalar_lea.vmem (!%p244_p9), [#allocation3], %s3571_s25 }
  0x15   : > { %v3654_v19 = vld [vmem:[%s6354_s4 + $0x30] sm:$0xff] (!%p244_p9)  ;;  %v3655_v20 = vld [vmem:[%s6354_s4 + $0x38] sm:$0xff] (!%p244_p9)  ;;  %v3178_v21 = vld [vmem:[#allocation2] sm:$0x1] (!%p244_p9)  ;;  %s3508_s10 = sshll.u32 (!%p244_p9), %s274_s9, 4  ;;  %s3494_s17 = scalar_lea.sflag (!%p244_p9), [#allocation4], %s272_s24  ;;  %s6310_s10 = int_to_ptr.vmem [resolvable:$true] %s3508_s10 }
  0x16   : > { %s3992_s18 = scalar_lea.vmem (!%p244_p9), %s6310_s10, 32 }
  0x17   : > { %298 = vperm.xlu0 (!%p244_p9), %3885, %v288_v5   ;;  %308 = vperm.xlu1 (!%p244_p9), %3886, %v290_v6   ;;  %v6370_v5 = vmov (!%p244_p9), 2102212464   ;;  %p3993_p11 = scmp.ne.s32.totalorder (!%p244_p9), %s6310_s10, %s3992_s18 }
  0x18   : > { %s6488_s14 = smov (!%p276_p10, %s3572_s14), 3 }
  0x19   : > { %s3573_s23 = sshll.u32 %s6488_s14, 2  ;;  %p3994_p12 = pnand %p3993_p11, %p4147_p5 }
  0x1a   : > { %s279_s30 = scalar_lea.vmem %s6350_s0, %s3573_s23 }
  0x1b   : > { %v282_v7 = vld [vmem:[%s279_s30] sm:$0x77]  ;;  %1262 = vperm.xlu0 %3885, %v1256_v11   ;;  %1267 = vperm.xlu1 %3886, %v1257_v12   ;;  %s3706_s30 = sshll.u32 %s4130_s6, 5  ;;  %p3995_p13 = pneg %p3994_p12 }
  0x1c   : > { %v312_v8 = vcombine.high %v282_v7, %v282_v7  ;;  %s6308_s14 = scalar_lea.hbm %s6357_s7, %s3706_s30  ;;  %s4065_s6 = smov [#allocation3]  }
  0x1d   : > { %s3996_s19 = sshll.u32 %s4065_s6, 4  ;;  %s3997_s19 = int_to_ptr.vmem [resolvable:$false] %s3996_s19 }
  0x1e   : > { %3574 = vmatprep.subr.msk.mxu0 %vm326_vm0, %v312_v8  ;;  %3731 = vmatprep.subr.msk.mxu1 %vm326_vm0, %v312_v8  ;;  %s3998_s20 = scalar_lea.vmem %s3997_s19, 64  ;;  %p3999_p0 = scmp.lt.s32.totalorder %s6310_s10, %s3997_s19 }
  0x1f   : > { %3575 = vmatpush1.msk.msra.mxu0 %vm326_vm0, %v282_v7  ;;  %3732 = vmatpush1.msk.msra.mxu1 %vm326_vm0, %v282_v7  ;;  %v6368_v7 = vmov 920167782   ;;  %p4000_p1 = scmp.lt.s32.totalorder %s3998_s20, %s3992_s18 }
  0x20   : > { %3576 = vmatmul.mubr.msk.f32.vlgmr.msra.gmra.mrb[0].mxu0 %vm313_vm1, %v283_v9  ;;  %3578 = vmatmul.mubr.msk.f32.vlgmr.msra.gmra.mrb[0].mxu1 %vm313_vm1, %v285_v10 }
  0x21   : > { %401 = vmatprep.mubr.f32.mxu0 %v6358_v1  ;;  %413 = vmatprep.mubr.f32.mxu1 %v6358_v1  ;;  %p4001_p2 = por %p4000_p1, %p3999_p0 }
  0x22   : > { %1272 = vperm.xlu0 %3885, %v1258_v15   ;;  %1277 = vperm.xlu1 %3886, %v1259_v16  }
  0x23   : > { %p4002_p3 = pnand %p4001_p2, %p3995_p13 }
  0x24   : > { %3577 = vmatmul.mubr.msk.f32.gmra.mrb[2].mxu0 %vm313_vm1, %v284_v13  ;;  %3579 = vmatmul.mubr.msk.f32.gmra.mrb[2].mxu1 %vm313_vm1, %v286_v14  ;;  %v6365_v14 = vmov 1326507024  }
  0x25   : > { %1357 = vmatprep.mubr.f32.mxu1 %v6358_v1  ;;  %2320 = vmatprep.mubr.f32.mxu0 %v6358_v1 }
  0x26   : > { %2226 = vperm.xlu0 %3885, %v3652_v17   ;;  %2231 = vperm.xlu1 %3886, %v3653_v18  }
  0x2a   : > { %2236 = vperm.xlu0 %3885, %v3654_v19   ;;  %2241 = vperm.xlu1 %3886, %v3655_v20  }
  0x2e   : > { %3181 = vperm.xlu0 %3885, %v3178_v21  }
  0x92   : > { %v294_v22 = vpop.permute.xlu0 %293  ;;  %v304_v23 = vpop.permute.xlu1 %303 }
  0xf3   : > { %v397_v24 = vpop.f32.mrb[0].mxu0  ;;  %v409_v25 = vpop.f32.mrb[0].mxu1 }
  0xf4   : > { %v4219_v26 = vadd.f32 %v397_v24, %v294_v22  ;;  %v4221_v27 = vadd.f32 %v409_v25, %v304_v23  ;;  %v399_v28 = vpop.f32.mrb[1].mxu0  ;;  %v411_v29 = vpop.f32.mrb[1].mxu1 }
  0xf5   : > { %v4223_v30 = vadd.f32 %v399_v28, %v294_v22  ;;  %v4249_v58 = vadd.f32 %v411_v29, %v304_v23 }
  0xf6   : > { %v420_v31 = vand.u32 2147483647, %v4219_v26  ;;  %v423_v32 = vand.u32 2139095040, %v4219_v26  ;;  %v839_v33 = vand.u32 2139095040, %v4221_v27  ;;  %v6362_v38 = vand.u32 2147483647, %v4221_v27 }
  0xf7   : > { %v4228_v34 = vpop.f32.mrb[2].mxu0  ;;  %v527_v36 = vand.u32 2139095040, %v4223_v30  ;;  %v4234_v42 = vpop.f32.mrb[2].mxu1 }
  0xf8   : > { %v424_v35 = vshrl.u32 %v423_v32, 23  ;;  %v427_v37 = vand.u32 8388607, %v420_v31  ;;  %v840_v39 = vshrl.u32 %v839_v33, 23  ;;  %v4236_v46 = vpop.f32.mrb[3].mxu0  ;;  %v4238_v47 = vpop.f32.mrb[3].mxu1 }
  0xf9   : > { %v528_v41 = vshrl.u32 %v527_v36, 23  ;;  %v4242_v49 = vand.u32 8388607, %v6362_v38 }
  0xfa   : > { %v3580_v40 = vadd.s32 4294967169, %v424_v35  ;;  %v3596_v43 = vadd.s32 4294967169, %v840_v39  ;;  %v428_v48 = vor.u32 8388608, %v427_v37 }
  0xfb   : > { %v3584_v45 = vadd.s32 4294967169, %v528_v41  ;;  %v844_v57 = vor.u32 8388608, %v4242_v49 }
  0xfc   : > { %v430_v44 = vadd.s32 1, %v3580_v40  ;;  %v846_v50 = vadd.s32 1, %v3596_v43  ;;  %v4246_v56 = vshll.u32 %v428_v48, 8 }
  0xfd   : > { %v4244_v55 = vadd.s32 1, %v3584_v45 }
  0xfe   : > { %vm431_vm2 = vcmp.gt.s32.totalorder %v430_v44, 0  ;;  %vm847_vm3 = vcmp.gt.s32.totalorder %v846_v50, 0 }
  0xff   : > { %v432_v51 = vsel %vm431_vm2, %v430_v44, 0  ;;  %v848_v54 = vsel %vm847_vm3, %v846_v50, 0  ;;  %vm535_vm5 = vcmp.gt.s32.totalorder %v4244_v55, 0 }
 0x100   : > { %v433_v52 = vshrl.u32 %v432_v51, 5  ;;  %v434_v53 = vand.u32 31, %v432_v51  ;;  %v4252_v62 = vshrl.u32 %v848_v54, 5  ;;  %v850_v63 = vand.u32 31, %v848_v54 }
 0x102   : > { %v435_v59 = vsub.s32 32, %v434_v53  ;;  %v437_v61 = vshll.u32 %v6380_v60, %v434_v53  ;;  %v440_v2 = vshll.u32 %v6378_v0, %v434_v53  ;;  %v443_v4 = vshll.u32 %v6372_v3, %v434_v53 }
 0x103   : > { %v446_v6 = vshll.u32 %v6370_v5, %v434_v53  ;;  %v449_v8 = vshll.u32 %v6368_v7, %v434_v53  ;;  %vm452_vm4 = vcmp.lt.s32.totalorder %v433_v52, 1  ;;  %vm454_vm6 = vcmp.lt.s32.totalorder %v433_v52, 3 }
 0x104   : > { %v438_v9 = vshrl.u32 %v6378_v0, %v435_v59  ;;  %v441_v10 = vshrl.u32 %v6372_v3, %v435_v59  ;;  %v444_v11 = vshrl.u32 %v6370_v5, %v435_v59  ;;  %v436_v12 = vshrl.u32 %v6380_v60, %v435_v59 }
 0x105   : > { %v447_v13 = vshrl.u32 %v6368_v7, %v435_v59  ;;  %v450_v15 = vshrl.u32 %v6365_v14, %v435_v59  ;;  %v851_v19 = vsub.s32 32, %v850_v63  ;;  %vm455_vm7 = vcmp.lt.s32.totalorder %v433_v52, 4 }
 0x106   : > { %v439_v16 = vor.u32 %v438_v9, %v437_v61  ;;  %v442_v17 = vor.u32 %v441_v10, %v440_v2  ;;  %v445_v18 = vor.u32 %v444_v11, %v443_v4  ;;  %v853_v22 = vshll.u32 %v6380_v60, %v850_v63 }
 0x107   : > { %v448_v20 = vor.u32 %v447_v13, %v446_v6  ;;  %v451_v21 = vor.u32 %v450_v15, %v449_v8  ;;  %v856_v35 = vshll.u32 %v6378_v0, %v850_v63  ;;  %vm453_vm8 = vcmp.lt.s32.totalorder %v433_v52, 2 }
 0x108   : > { %v456_v23 = vsel %vm452_vm4, %v436_v12, %v439_v16  ;;  %v457_v24 = vsel %vm455_vm7, %v445_v18, 2102212464  ;;  %v460_v25 = vsel %vm452_vm4, %v439_v16, %v442_v17  ;;  %v464_v28 = vsel %vm452_vm4, %v442_v17, %v445_v18 }
 0x109   : > { %v458_v29 = vsel %vm454_vm6, %v442_v17, %v457_v24  ;;  %v461_v32 = vsel %vm455_vm7, %v448_v20, 920167782  ;;  %v465_v33 = vsel %vm455_vm7, %v451_v21, 1326507024  ;;  %v854_v39 = vshrl.u32 %v6378_v0, %v851_v19 }
 0x10a   : > { %v462_v36 = vsel %vm454_vm6, %v445_v18, %v461_v32  ;;  %v466_v37 = vsel %vm454_vm6, %v448_v20, %v465_v33  ;;  %v459_v40 = vsel %vm453_vm8, %v456_v23, %v458_v29  ;;  %v857_v44 = vshrl.u32 %v6372_v3, %v851_v19 }
 0x10b   : > { %v463_v41 = vsel %vm453_vm8, %v460_v25, %v462_v36  ;;  %v467_v43 = vsel %vm453_vm8, %v464_v28, %v466_v37  ;;  %v855_v53 = vor.u32 %v854_v39, %v853_v22  ;;  %v859_v52 = vshll.u32 %v6372_v3, %v850_v63 }
 0x10c   : > { %v4276_v45 = vmul.u32.u64.low %v4246_v56, %v467_v43  ;;  %v4277_v48 = vmul.u32.u64.high %v4246_v56, %v467_v43, %v4276_v45  ;;  %v4280_v50 = vmul.u32.u64.low %v4246_v56, %v463_v41  ;;  %v4281_v51 = vmul.u32.u64.high %v4246_v56, %v463_v41, %v4280_v50 }
 0x10d   : > { %v858_v54 = vor.u32 %v857_v44, %v856_v35  ;;  %v860_v59 = vshrl.u32 %v6370_v5, %v851_v19  ;;  %v862_v61 = vshll.u32 %v6370_v5, %v850_v63  ;;  %v863_v2 = vshrl.u32 %v6368_v7, %v851_v19 }
 0x10e   : > { %v865_v4 = vshll.u32 %v6368_v7, %v850_v63  ;;  %v866_v6 = vshrl.u32 %v6365_v14, %v851_v19  ;;  %v852_v8 = vshrl.u32 %v6380_v60, %v851_v19  ;;  %v4293_v10 = vshll.u32 %v844_v57, 8 }
 0x10f   : > { %v861_v9 = vor.u32 %v860_v59, %v859_v52  ;;  %v536_v11 = vsel %vm535_vm5, %v4244_v55, 0  ;;  %vm477_vm9 = vc.u32 %v4277_v48, %v4280_v50  ;;  %v478_v12 = vadd.s32 1, %v4281_v51 }
 0x110   : > { %v864_v13 = vor.u32 %v863_v2, %v862_v61  ;;  %vm868_vm10 = vcmp.lt.s32.totalorder %v4252_v62, 1  ;;  %v475_v63 = vmul.u32 %v4246_v56, %v459_v40  ;;  %v867_v15 = vor.u32 %v866_v6, %v865_v4 }
 0x111   : > { %vm871_vm11 = vcmp.lt.s32.totalorder %v4252_v62, 4  ;;  %v876_v49 = vsel %vm868_vm10, %v855_v53, %v858_v54  ;;  %v479_v57 = vsel %vm477_vm9, %v478_v12, %v4281_v51  ;;  %vm870_vm12 = vcmp.lt.s32.totalorder %v4252_v62, 3 }
 0x112   : > { %v877_v55 = vsel %vm871_vm11, %v864_v13, 920167782  ;;  %v880_v16 = vsel %vm868_vm10, %v858_v54, %v861_v9  ;;  %v480_v17 = vadd.s32 %v479_v57, %v475_v63  ;;  %vm869_vm13 = vcmp.lt.s32.totalorder %v4252_v62, 2 }
 0x113   : > { %v878_v56 = vsel %vm870_vm12, %v861_v9, %v877_v55  ;;  %v881_v18 = vsel %vm871_vm11, %v867_v15, 1326507024  ;;  %v873_v19 = vsel %vm871_vm11, %v861_v9, 2102212464  ;;  %v6367_v22 = vand.u32 2147483647, %v4223_v30 }
 0x114   : > { %v879_v20 = vsel %vm869_vm13, %v876_v49, %v878_v56  ;;  %v882_v21 = vsel %vm870_vm12, %v864_v13, %v881_v18  ;;  %v481_v23 = vadd.s32 536870912, %v480_v17  ;;  %v538_v33 = vand.u32 31, %v536_v11 }
 0x115   : > { %v883_v24 = vsel %vm869_vm13, %v880_v16, %v882_v21  ;;  %v4321_v25 = vmul.u32.u64.low %v4293_v10, %v879_v20  ;;  %v4322_v28 = vmul.u32.u64.high %v4293_v10, %v879_v20, %v4321_v25  ;;  %v943_v35 = vand.u32 2139095040, %v4249_v58 }
 0x116   : > { %v4326_v29 = vmul.u32.u64.low %v4293_v10, %v883_v24  ;;  %v4327_v32 = vmul.u32.u64.high %v4293_v10, %v883_v24, %v4326_v29  ;;  %v872_v36 = vsel %vm868_vm10, %v852_v8, %v855_v53  ;;  %v874_v37 = vsel %vm870_vm12, %v858_v54, %v873_v19 }
 0x117   : > { %v539_v39 = vsub.s32 32, %v538_v33  ;;  %v4334_v40 = vshrl.u32 %v481_v23, 30  ;;  %v875_v41 = vsel %vm869_vm13, %v872_v36, %v874_v37  ;;  %v531_v43 = vand.u32 8388607, %v6367_v22 }
 0x118   : > { %v944_v44 = vshrl.u32 %v943_v35, 23  ;;  %v894_v45 = vadd.s32 1, %v4322_v28  ;;  %v537_v51 = vshrl.u32 %v536_v11, 5  ;;  %vm893_vm14 = vc.u32 %v4327_v32, %v4321_v25 }
 0x119   : > { %v542_v52 = vshrl.u32 %v6378_v0, %v539_v39  ;;  %v545_v53 = vshrl.u32 %v6372_v3, %v539_v39  ;;  %v544_v54 = vshll.u32 %v6378_v0, %v538_v33  ;;  %v547_v59 = vshll.u32 %v6372_v3, %v538_v33 }
 0x11a   : > { %v548_v62 = vshrl.u32 %v6370_v5, %v539_v39  ;;  %v483_v61 = vshll.u32 %v4334_v40, 30  ;;  %v541_v2 = vshll.u32 %v6380_v60, %v538_v33  ;;  %v550_v4 = vshll.u32 %v6370_v5, %v538_v33 }
 0x11b   : > { %v551_v6 = vshrl.u32 %v6368_v7, %v539_v39  ;;  %v546_v8 = vor.u32 %v545_v53, %v544_v54  ;;  %v553_v11 = vshll.u32 %v6368_v7, %v538_v33  ;;  %v554_v12 = vshrl.u32 %v6365_v14, %v539_v39 }
 0x11c   : > { %v549_v9 = vor.u32 %v548_v62, %v547_v59  ;;  %v895_v13 = vsel %vm893_vm14, %v894_v45, %v4322_v28  ;;  %v543_v63 = vor.u32 %v542_v52, %v541_v2  ;;  %v891_v49 = vmul.u32 %v4293_v10, %v875_v41 }
 0x11d   : > { %v552_v15 = vor.u32 %v551_v6, %v550_v4  ;;  %v555_v57 = vor.u32 %v554_v12, %v553_v11  ;;  %vm559_vm15 = vcmp.lt.s32.totalorder %v537_v51, 4  ;;  %v532_v55 = vor.u32 8388608, %v531_v43 }
 0x11e   : > { %vm556_vm0 = vcmp.lt.s32.totalorder %v537_v51, 1  ;;  %v3600_v56 = vadd.s32 4294967169, %v944_v44  ;;  %v4356_v18 = vsub.s32 %v480_v17, %v483_v61  ;;  %v896_v19 = vadd.s32 %v895_v13, %v891_v49 }
 0x11f   : > { %v565_v16 = vsel %vm559_vm15, %v552_v15, 920167782  ;;  %vm558_vm1 = vcmp.lt.s32.totalorder %v537_v51, 3  ;;  %v568_v20 = vsel %vm556_vm0, %v546_v8, %v549_v9  ;;  %v564_v21 = vsel %vm556_vm0, %v543_v63, %v546_v8 }
 0x120   : > { %v566_v23 = vsel %vm558_vm1, %v549_v9, %v565_v16  ;;  %v569_v24 = vsel %vm559_vm15, %v555_v57, 1326507024  ;;  %vm557_vm2 = vcmp.lt.s32.totalorder %v537_v51, 2  ;;  %v540_v28 = vshrl.u32 %v6380_v60, %v539_v39 }
 0x121   : > { %v570_v10 = vsel %vm558_vm1, %v552_v15, %v569_v24  ;;  %v561_v29 = vsel %vm559_vm15, %v549_v9, 2102212464  ;;  %v950_v35 = vadd.s32 1, %v3600_v56  ;;  %v486_v17 = vsub.s32 0, %v4356_v18 }
 0x122   : > { %v571_v33 = vsel %vm557_vm2, %v568_v20, %v570_v10  ;;  %v897_v36 = vadd.s32 536870912, %v896_v19  ;;  %v567_v37 = vsel %vm557_vm2, %v564_v21, %v566_v23  ;;  %v572_v41 = vshll.u32 %v532_v55, 8 }
 0x123   : > { %v560_v43 = vsel %vm556_vm0, %v540_v28, %v543_v63  ;;  %vm951_vm3 = vcmp.gt.s32.totalorder %v950_v35, 0  ;;  %v562_v44 = vsel %vm558_vm1, %v546_v8, %v561_v29  ;;  %v3581_v59 = vmin.u32 %v486_v17, %v4356_v18 }
 0x124   : > { %v4368_v45 = vmul.u32.u64.low %v572_v41, %v571_v33  ;;  %v4369_v52 = vmul.u32.u64.high %v572_v41, %v571_v33, %v4368_v45  ;;  %v952_v53 = vsel %vm951_vm3, %v950_v35, 0  ;;  %v4376_v62 = vshrl.u32 %v897_v36, 30 }
 0x125   : > { %v4371_v39 = vmul.u32.u64.low %v572_v41, %v567_v37  ;;  %v4372_v54 = vmul.u32.u64.high %v572_v41, %v567_v37, %v4371_v39  ;;  %v954_v61 = vand.u32 31, %v952_v53  ;;  %v563_v2 = vsel %vm557_vm2, %v560_v43, %v562_v44  ;;  %v4401_v43 = vpop.permute.xlu0 %298 }
 0x126   : > { %v6360_v4 = vand.u32 2147483647, %v4249_v58  ;;  %v488_v9 = vclz %v3581_v59  ;;  %v899_v11 = vshll.u32 %v4376_v62, 30  ;;  %v579_v12 = vmul.u32 %v572_v41, %v563_v2 }
 0x127   : > { %vm581_vm4 = vc.u32 %v4369_v52, %v4371_v39  ;;  %v955_v6 = vsub.s32 32, %v954_v61  ;;  %v582_v8 = vadd.s32 1, %v4372_v54  ;;  %v957_v51 = vshll.u32 %v6380_v60, %v954_v61 }
 0x128   : > { %v947_v63 = vand.u32 8388607, %v6360_v4  ;;  %v960_v57 = vshll.u32 %v6378_v0, %v954_v61  ;;  %v963_v16 = vshll.u32 %v6372_v3, %v954_v61  ;;  %v3582_v56 = vadd.s32 4294967294, %v488_v9 }
 0x129   : > { %v583_v13 = vsel %vm581_vm4, %v582_v8, %v4372_v54  ;;  %v958_v49 = vshrl.u32 %v6378_v0, %v955_v6  ;;  %v961_v55 = vshrl.u32 %v6372_v3, %v955_v6  ;;  %v4392_v20 = vsub.s32 %v896_v19, %v899_v11 }
 0x12a   : > { %v584_v15 = vadd.s32 %v583_v13, %v579_v12  ;;  %v964_v23 = vshrl.u32 %v6370_v5, %v955_v6  ;;  %v948_v24 = vor.u32 8388608, %v947_v63  ;;  %v966_v10 = vshll.u32 %v6370_v5, %v954_v61 }
 0x12b   : > { %v967_v28 = vshrl.u32 %v6368_v7, %v955_v6  ;;  %v969_v29 = vshll.u32 %v6368_v7, %v954_v61  ;;  %v953_v35 = vshrl.u32 %v952_v53, 5  ;;  %v959_v17 = vor.u32 %v958_v49, %v957_v51 }
 0x12c   : > { %v585_v21 = vadd.s32 536870912, %v584_v15  ;;  %v962_v36 = vor.u32 %v961_v55, %v960_v57  ;;  %v965_v37 = vor.u32 %v964_v23, %v963_v16  ;;  %v970_v19 = vshrl.u32 %v6365_v14, %v955_v6 }
 0x12d   : > { %v968_v41 = vor.u32 %v967_v28, %v966_v10  ;;  %v902_v44 = vsub.s32 0, %v4392_v20  ;;  %vm3583_vm5 = vcmp.lt.s32.totalorder %v3582_v56, 0  ;;  %v988_v59 = vshll.u32 %v948_v24, 8 }
 0x12e   : > { %v4398_v33 = vshrl.u32 %v585_v21, 30  ;;  %v971_v54 = vor.u32 %v970_v19, %v969_v29  ;;  %v4407_v61 = vadd.f32 %v4228_v34, %v4401_v43  ;;  %v956_v2 = vshrl.u32 %v6380_v60, %v955_v6 }
 0x12f   : > { %vm972_vm6 = vcmp.lt.s32.totalorder %v953_v35, 1  ;;  %vm975_vm7 = vcmp.lt.s32.totalorder %v953_v35, 4  ;;  %vm974_vm8 = vcmp.lt.s32.totalorder %v953_v35, 3  ;;  %v3597_v12 = vmin.u32 %v902_v44, %v4392_v20 }
 0x130   : > { %v587_v45 = vshll.u32 %v4398_v33, 30  ;;  %v977_v8 = vsel %vm975_vm7, %v965_v37, 2102212464  ;;  %v980_v9 = vsel %vm972_vm6, %v959_v17, %v962_v36  ;;  %v981_v11 = vsel %vm975_vm7, %v968_v41, 920167782 }
 0x131   : > { %vm973_vm9 = vcmp.lt.s32.totalorder %v953_v35, 2  ;;  %v982_v63 = vsel %vm974_vm8, %v965_v37, %v981_v11  ;;  %v984_v49 = vsel %vm972_vm6, %v962_v36, %v965_v37  ;;  %v985_v34 = vsel %vm975_vm7, %v971_v54, 1326507024 }
 0x132   : > { %v4409_v53 = vsub.s32 %v584_v15, %v587_v45  ;;  %v983_v51 = vsel %vm973_vm9, %v980_v9, %v982_v63  ;;  %v631_v15 = vand.u32 2139095040, %v4407_v61  ;;  %v491_v57 = vsel %vm3583_vm5, 0, %v3582_v56 }
 0x133   : > { %v976_v6 = vsel %vm972_vm6, %v956_v2, %v959_v17  ;;  %v978_v55 = vsel %vm974_vm8, %v962_v36, %v977_v8  ;;  %v986_v16 = vsel %vm974_vm8, %v968_v41, %v985_v34  ;;  %v904_v28 = vclz %v3597_v12  ;;  %v4428_v12 = vpop.permute.xlu1 %308 }
 0x134   : > { %v590_v13 = vsub.s32 0, %v4409_v53  ;;  %v987_v23 = vsel %vm973_vm9, %v984_v49, %v986_v16  ;;  %v4417_v24 = vmul.u32.u64.low %v988_v59, %v983_v51  ;;  %v4418_v10 = vmul.u32.u64.high %v988_v59, %v983_v51, %v4417_v24 }
 0x135   : > { %v4421_v29 = vmul.u32.u64.low %v988_v59, %v987_v23  ;;  %v4422_v35 = vmul.u32.u64.high %v988_v59, %v987_v23, %v4421_v29  ;;  %v979_v37 = vsel %vm973_vm9, %v976_v6, %v978_v55  ;;  %v632_v19 = vshrl.u32 %v631_v15, 23 }
 0x136   : > { %v3585_v21 = vmin.u32 %v590_v13, %v4409_v53  ;;  %v496_v44 = vsub.s32 4294967266, %v491_v57  ;;  %v998_v56 = vadd.s32 1, %v4418_v10  ;;  %v3598_v36 = vadd.s32 4294967294, %v904_v28 }
 0x137   : > { %v3588_v17 = vadd.s32 4294967169, %v632_v19  ;;  %v995_v41 = vmul.u32 %v988_v59, %v979_v37  ;;  %vm997_vm10 = vc.u32 %v4422_v35, %v4417_v24  ;;  %v492_v8 = vsub.s32 32, %v491_v57 }
 0x138   : > { %v592_v45 = vclz %v3585_v21  ;;  %v999_v54 = vsel %vm997_vm10, %v998_v56, %v4418_v10  ;;  %v497_v9 = vadd.s32 127, %v496_v44  ;;  %v476_v13 = vadd.s32 %v4280_v50, %v4277_v48 }
 0x139   : > { %v638_v2 = vadd.s32 1, %v3588_v17  ;;  %v1000_v11 = vadd.s32 %v999_v54, %v995_v41  ;;  %v6361_v51 = vand.u32 2147483647, %v4407_v61  ;;  %vm3599_vm12 = vcmp.lt.s32.totalorder %v3598_v36, 0 }
 0x13a   : > { %v3586_v63 = vadd.s32 4294967294, %v592_v45  ;;  %v4435_v34 = vadd.f32 %v4234_v42, %v4428_v12  ;;  %v493_v6 = vshll.u32 %v4356_v18, %v491_v57  ;;  %v494_v55 = vshrl.u32 %v476_v13, %v492_v8 }
 0x13b   : > { %vm639_vm11 = vcmp.gt.s32.totalorder %v638_v2, 0  ;;  %v1001_v59 = vadd.s32 536870912, %v1000_v11  ;;  %v498_v16 = vshll.u32 %v497_v9, 23  ;;  %v4440_v23 = vsel %vm3599_vm12, 0, %v3598_v36 }
 0x13c   : > { %v640_v49 = vsel %vm639_vm11, %v638_v2, 0  ;;  %vm3587_vm13 = vcmp.lt.s32.totalorder %v3586_v63, 0  ;;  %v635_v48 = vand.u32 8388607, %v6361_v51  ;;  %v1047_v29 = vand.u32 2139095040, %v4435_v34 }
 0x13d   : > { %v642_v15 = vand.u32 31, %v640_v49  ;;  %v4438_v21 = vshrl.u32 %v1001_v59, 30  ;;  %v641_v44 = vshrl.u32 %v640_v49, 5  ;;  %v495_v8 = vor.u32 %v494_v55, %v493_v6 }
 0x13e   : > { %v499_v9 = vor.u32 4788187, %v498_v16  ;;  %v506_v13 = vsub.s32 4, %v4334_v40  ;;  %vm422_vm14 = vcmp.lt.s32.totalorder %v4219_v26, 0  ;;  %v912_v49 = vsub.s32 4294967266, %v4440_v23 }
 0x13f   : > { %v643_v50 = vsub.s32 32, %v642_v15  ;;  %v645_v10 = vshll.u32 %v6380_v60, %v642_v15  ;;  %v648_v28 = vshll.u32 %v6378_v0, %v642_v15  ;;  %v651_v42 = vshll.u32 %v6372_v3, %v642_v15 }
 0x140   : > { %v1003_v18 = vshll.u32 %v4438_v21, 30  ;;  %v654_v45 = vshll.u32 %v6370_v5, %v642_v15  ;;  %v657_v17 = vshll.u32 %v6368_v7, %v642_v15  ;;  %v636_v4 = vor.u32 8388608, %v635_v48 }
 0x141   : > { %v646_v57 = vshrl.u32 %v6378_v0, %v643_v50  ;;  %v649_v37 = vshrl.u32 %v6372_v3, %v643_v50  ;;  %v652_v19 = vshrl.u32 %v6370_v5, %v643_v50  ;;  %v655_v56 = vshrl.u32 %v6368_v7, %v643_v50 }
 0x142   : > { %v658_v2 = vshrl.u32 %v6365_v14, %v643_v50  ;;  %v4459_v1 = vsub.s32 %v1000_v11, %v1003_v18  ;;  %v4462_v15 = vsel %vm3587_vm13, 0, %v3586_v63  ;;  %vm660_vm15 = vcmp.lt.s32.totalorder %v641_v44, 1 }
 0x143   : > { %v647_v36 = vor.u32 %v646_v57, %v645_v10  ;;  %v650_v41 = vor.u32 %v649_v37, %v648_v28  ;;  %v653_v54 = vor.u32 %v652_v19, %v651_v42  ;;  %v656_v59 = vor.u32 %v655_v56, %v654_v45 }
 0x144   : > { %v659_v51 = vor.u32 %v658_v2, %v657_v17  ;;  %vm663_vm0 = vcmp.lt.s32.totalorder %v641_v44, 4  ;;  %v1048_v10 = vshrl.u32 %v1047_v29, 23  ;;  %vm662_vm1 = vcmp.lt.s32.totalorder %v641_v44, 3 }
 0x145   : > { %v665_v6 = vsel %vm663_vm0, %v653_v54, 2102212464  ;;  %v668_v55 = vsel %vm660_vm15, %v647_v36, %v650_v41  ;;  %v669_v16 = vsel %vm663_vm0, %v656_v59, 920167782  ;;  %v644_v28 = vshrl.u32 %v6380_v60, %v643_v50 }
 0x146   : > { %vm661_vm2 = vcmp.lt.s32.totalorder %v641_v44, 2  ;;  %v670_v42 = vsel %vm662_vm1, %v653_v54, %v669_v16  ;;  %v672_v57 = vsel %vm660_vm15, %v650_v41, %v653_v54  ;;  %v1006_v11 = vsub.s32 0, %v4459_v1 }
 0x147   : > { %v671_v48 = vsel %vm661_vm2, %v668_v55, %v670_v42  ;;  %v673_v18 = vsel %vm663_vm0, %v659_v51, 1326507024  ;;  %v676_v37 = vshll.u32 %v636_v4, 8  ;;  %v664_v63 = vsel %vm660_vm15, %v644_v28, %v647_v36 }
 0x148   : > { %v666_v19 = vsel %vm662_vm1, %v650_v41, %v665_v6  ;;  %v674_v45 = vsel %vm662_vm1, %v656_v59, %v673_v18  ;;  %v3604_v56 = vadd.s32 4294967169, %v1048_v10  ;;  %v908_v29 = vsub.s32 32, %v4440_v23 }
 0x149   : > { %v675_v17 = vsel %vm661_vm2, %v672_v57, %v674_v45  ;;  %v4469_v2 = vmul.u32.u64.low %v676_v37, %v671_v48  ;;  %v4470_v38 = vmul.u32.u64.high %v676_v37, %v671_v48, %v4469_v2  ;;  %v892_v50 = vadd.s32 %v4321_v25, %v4327_v32 }
 0x14a   : > { %v913_v54 = vadd.s32 127, %v912_v49  ;;  %v4475_v16 = vmul.u32.u64.low %v676_v37, %v675_v17  ;;  %v4476_v55 = vmul.u32.u64.high %v676_v37, %v675_v17, %v4475_v16  ;;  %v600_v4 = vsub.s32 4294967266, %v4462_v15 }
 0x14b   : > { %v3601_v51 = vmin.u32 %v1006_v11, %v4459_v1  ;;  %v667_v36 = vsel %vm661_vm2, %v664_v63, %v666_v19  ;;  %v1054_v41 = vadd.s32 1, %v3604_v56  ;;  %v502_v59 = vcvt.s32.f32 %v495_v8 }
 0x14c   : > { %v4484_v10 = vsel %vm422_vm14, %v506_v13, %v4334_v40  ;;  %v4488_v25 = vadd.f32 %v4236_v46, %v4401_v43  ;;  %v500_v32 = vand.u32 2147483647, %v499_v9  ;;  %v910_v49 = vshrl.u32 %v892_v50, %v908_v29 }
 0x14d   : > { %v686_v6 = vadd.s32 1, %v4470_v38  ;;  %vm1055_vm3 = vcmp.gt.s32.totalorder %v1054_v41, 0  ;;  %v914_v28 = vshll.u32 %v913_v54, 23  ;;  %v683_v42 = vmul.u32 %v676_v37, %v667_v36 }
 0x14e   : > { %vm685_vm4 = vc.u32 %v4476_v55, %v4469_v2  ;;  %v6363_v44 = vand.u32 2147483647, %v4435_v34  ;;  %v601_v8 = vadd.s32 127, %v600_v4  ;;  %v1008_v57 = vclz %v3601_v51 }
 0x14f   : > { %v687_v40 = vsel %vm685_vm4, %v686_v6, %v4470_v38  ;;  %v1056_v13 = vsel %vm1055_vm3, %v1054_v41, 0  ;;  %vm4497_vm5 = vcmp.le.f32.partialorder %v420_v31, 0.7853982  ;;  %v909_v43 = vshll.u32 %v4392_v20, %v4440_v23 }
 0x150   : > { %v688_v9 = vadd.s32 %v687_v40, %v683_v42  ;;  %v735_v11 = vand.u32 2139095040, %v4488_v25  ;;  %v4504_v48 = vmul.f32 %v502_v59, %v500_v32  ;;  %v580_v38 = vadd.s32 %v4371_v39, %v4369_v52 }
 0x151   : > { %v1058_v37 = vand.u32 31, %v1056_v13  ;;  %v4511_v31 = vor.u32 %v910_v49, %v909_v43  ;;  %v4513_v63 = vor.u32 4788187, %v914_v28  ;;  %v596_v19 = vsub.s32 32, %v4462_v15 }
 0x152   : > { %v689_v20 = vadd.s32 536870912, %v688_v9  ;;  %v602_v23 = vshll.u32 %v601_v8, 23  ;;  %v3602_v45 = vadd.s32 4294967294, %v1008_v57  ;;  %v1051_v56 = vand.u32 8388607, %v6363_v44 }
 0x153   : > { %v1059_v29 = vsub.s32 32, %v1058_v37  ;;  %v1061_v50 = vshll.u32 %v6380_v60, %v1058_v37  ;;  %v1064_v52 = vshll.u32 %v6378_v0, %v1058_v37  ;;  %v736_v39 = vshrl.u32 %v735_v11, 23 }
 0x154   : > { %v4518_v17 = vshrl.u32 %v689_v20, 30  ;;  %v1067_v4 = vshll.u32 %v6372_v3, %v1058_v37  ;;  %v1057_v41 = vshrl.u32 %v1056_v13, 5  ;;  %v1070_v59 = vshll.u32 %v6370_v5, %v1058_v37 }
 0x155   : > { %v1062_v54 = vshrl.u32 %v6378_v0, %v1059_v29  ;;  %v1065_v16 = vshrl.u32 %v6372_v3, %v1059_v29  ;;  %v1068_v51 = vshrl.u32 %v6370_v5, %v1059_v29  ;;  %v1071_v32 = vshrl.u32 %v6368_v7, %v1059_v29 }
 0x156   : > { %v691_v36 = vshll.u32 %v4518_v17, 30  ;;  %v1074_v42 = vshrl.u32 %v6365_v14, %v1059_v29  ;;  %v1052_v57 = vor.u32 8388608, %v1051_v56  ;;  %v1073_v43 = vshll.u32 %v6368_v7, %v1058_v37 }
 0x157   : > { %v1063_v49 = vor.u32 %v1062_v54, %v1061_v50  ;;  %v1066_v6 = vor.u32 %v1065_v16, %v1064_v52  ;;  %v1069_v28 = vor.u32 %v1068_v51, %v1067_v4  ;;  %v1072_v40 = vor.u32 %v1071_v32, %v1070_v59 }
 0x158   : > { %v4530_v8 = vsub.s32 %v688_v9, %v691_v36  ;;  %v597_v11 = vshll.u32 %v4409_v53, %v4462_v15  ;;  %v598_v20 = vshrl.u32 %v580_v38, %v596_v19  ;;  %v603_v13 = vor.u32 4788187, %v602_v23 }
 0x159   : > { %vm3603_vm6 = vcmp.lt.s32.totalorder %v3602_v45, 0  ;;  %v1075_v18 = vor.u32 %v1074_v42, %v1073_v43  ;;  %vm1076_vm7 = vcmp.lt.s32.totalorder %v1057_v41, 1  ;;  %vm1079_vm8 = vcmp.lt.s32.totalorder %v1057_v41, 4 }
 0x15a   : > { %v694_v44 = vsub.s32 0, %v4530_v8  ;;  %v1060_v50 = vshrl.u32 %v6380_v60, %v1059_v29  ;;  %v1081_v9 = vsel %vm1079_vm8, %v1069_v28, 2102212464  ;;  %v1084_v52 = vsel %vm1076_vm7, %v1063_v49, %v1066_v6 }
 0x15b   : > { %v3592_v56 = vadd.s32 4294967169, %v736_v39  ;;  %vm1078_vm9 = vcmp.lt.s32.totalorder %v1057_v41, 3  ;;  %v1085_v37 = vsel %vm1079_vm8, %v1072_v40, 920167782  ;;  %v1092_v53 = vshll.u32 %v1052_v57, 8 }
 0x15c   : > { %v3589_v54 = vmin.u32 %v694_v44, %v4530_v8  ;;  %vm1077_vm10 = vcmp.lt.s32.totalorder %v1057_v41, 2  ;;  %v1080_v15 = vsel %vm1076_vm7, %v1060_v50, %v1063_v49  ;;  %v1086_v38 = vsel %vm1078_vm9, %v1069_v28, %v1085_v37 }
 0x15d   : > { %v1088_v19 = vsel %vm1076_vm7, %v1066_v6, %v1069_v28  ;;  %v1082_v16 = vsel %vm1078_vm9, %v1066_v6, %v1081_v9  ;;  %v1087_v4 = vsel %vm1077_vm10, %v1084_v52, %v1086_v38  ;;  %v1089_v29 = vsel %vm1079_vm8, %v1075_v18, 1326507024 }
 0x15e   : > { %v696_v23 = vclz %v3589_v54  ;;  %v1090_v51 = vsel %vm1078_vm9, %v1072_v40, %v1089_v29  ;;  %v4542_v36 = vmul.u32.u64.low %v1092_v53, %v1087_v4  ;;  %v4543_v59 = vmul.u32.u64.high %v1092_v53, %v1087_v4, %v4542_v36 }
 0x15f   : > { %v742_v44 = vadd.s32 1, %v3592_v56  ;;  %v599_v39 = vor.u32 %v598_v20, %v597_v11  ;;  %v4547_v32 = vsel %vm3603_vm6, 0, %v3602_v45  ;;  %v1091_v49 = vsel %vm1077_vm10, %v1088_v19, %v1090_v51 }
 0x160   : > { %v6364_v28 = vand.u32 2147483647, %v4488_v25  ;;  %v4552_v42 = vmul.u32.u64.low %v1092_v53, %v1091_v49  ;;  %v4553_v57 = vmul.u32.u64.high %v1092_v53, %v1091_v49, %v4552_v42  ;;  %v604_v18 = vand.u32 2147483647, %v603_v13 }
 0x161   : > { %vm743_vm11 = vcmp.gt.s32.totalorder %v742_v44, 0  ;;  %v3590_v40 = vadd.s32 4294967294, %v696_v23  ;;  %v1083_v43 = vsel %vm1077_vm10, %v1080_v15, %v1082_v16  ;;  %v918_v11 = vcvt.s32.f32 %v4511_v31 }
 0x162   : > { %v744_v50 = vsel %vm743_vm11, %v742_v44, 0  ;;  %v1016_v45 = vsub.s32 4294967266, %v4547_v32  ;;  %v1102_v20 = vadd.s32 1, %v4543_v59  ;;  %v916_v52 = vand.u32 2147483647, %v4513_v63 }
 0x163   : > { %v746_v9 = vand.u32 31, %v744_v50  ;;  %v606_v56 = vcvt.s32.f32 %v599_v39  ;;  %v739_v54 = vand.u32 8388607, %v6364_v28  ;;  %v4564_v13 = vadd.f32 %v4238_v47, %v4428_v12 }
 0x164   : > { %v4568_v41 = vadd.s32 %v4417_v24, %v4422_v35  ;;  %v1099_v37 = vmul.u32 %v1092_v53, %v1083_v43  ;;  %vm1101_vm12 = vc.u32 %v4553_v57, %v4542_v36  ;;  %v1012_v19 = vsub.s32 32, %v4547_v32 }
 0x165   : > { %v747_v15 = vsub.s32 32, %v746_v9  ;;  %v4572_v38 = vmul.f32 %v606_v56, %v604_v18  ;;  %vm3591_vm13 = vcmp.lt.s32.totalorder %v3590_v40, 0  ;;  %v1103_v23 = vsel %vm1101_vm12, %v1102_v20, %v4543_v59 }
 0x166   : > { %v4576_v16 = vadd.s32 127, %v1016_v45  ;;  %v1104_v47 = vadd.s32 %v1103_v23, %v1099_v37  ;;  %v740_v35 = vor.u32 8388608, %v739_v54  ;;  %v749_v53 = vshll.u32 %v6380_v60, %v746_v9 }
 0x167   : > { %v750_v12 = vshrl.u32 %v6378_v0, %v747_v15  ;;  %v753_v24 = vshrl.u32 %v6372_v3, %v747_v15  ;;  %v752_v4 = vshll.u32 %v6378_v0, %v746_v9  ;;  %v756_v29 = vshrl.u32 %v6370_v5, %v747_v15 }
 0x168   : > { %v699_v51 = vsel %vm3591_vm13, 0, %v3590_v40  ;;  %v1105_v44 = vadd.s32 536870912, %v1104_v47  ;;  %v745_v39 = vshrl.u32 %v744_v50, 5  ;;  %v755_v49 = vshll.u32 %v6372_v3, %v746_v9 }
 0x169   : > { %v751_v59 = vor.u32 %v750_v12, %v749_v53  ;;  %v754_v42 = vor.u32 %v753_v24, %v752_v4  ;;  %v758_v18 = vshll.u32 %v6370_v5, %v746_v9  ;;  %v759_v43 = vshrl.u32 %v6368_v7, %v747_v15 }
 0x16a   : > { %v684_v45 = vadd.s32 %v4469_v2, %v4476_v55  ;;  %v4588_v20 = vshrl.u32 %v1105_v44, 30  ;;  %v762_v56 = vshrl.u32 %v6365_v14, %v747_v15  ;;  %v1151_v54 = vand.u32 2139095040, %v4564_v13 }
 0x16b   : > { %v704_v40 = vsub.s32 4294967266, %v699_v51  ;;  %v757_v37 = vor.u32 %v756_v29, %v755_v49  ;;  %v760_v50 = vor.u32 %v759_v43, %v758_v18  ;;  %v761_v23 = vshll.u32 %v6368_v7, %v746_v9 }
 0x16c   : > { %v1018_v12 = vshll.u32 %v4576_v16, 23  ;;  %v1107_v24 = vshll.u32 %v4588_v20, 30  ;;  %vm764_vm15 = vcmp.lt.s32.totalorder %v745_v39, 1  ;;  %v780_v53 = vshll.u32 %v740_v35, 8 }
 0x16d   : > { %v700_v4 = vsub.s32 32, %v699_v51  ;;  %v763_v28 = vor.u32 %v762_v56, %v761_v23  ;;  %vm767_vm0 = vcmp.lt.s32.totalorder %v745_v39, 4  ;;  %v772_v2 = vsel %vm764_vm15, %v751_v59, %v754_v42 }
 0x16e   : > { %v4596_v55 = vsub.s32 %v1104_v47, %v1107_v24  ;;  %vm766_vm1 = vcmp.lt.s32.totalorder %v745_v39, 3  ;;  %v773_v44 = vsel %vm767_vm0, %v760_v50, 920167782  ;;  %v1152_v6 = vshrl.u32 %v1151_v54, 23 }
 0x16f   : > { %v705_v29 = vadd.s32 127, %v704_v40  ;;  %vm765_vm2 = vcmp.lt.s32.totalorder %v745_v39, 2  ;;  %v769_v49 = vsel %vm767_vm0, %v757_v37, 2102212464  ;;  %v774_v9 = vsel %vm766_vm1, %v757_v37, %v773_v44 }
 0x170   : > { %v1110_v16 = vsub.s32 0, %v4596_v55  ;;  %v748_v18 = vshrl.u32 %v6380_v60, %v747_v15  ;;  %v775_v35 = vsel %vm765_vm2, %v772_v2, %v774_v9  ;;  %v776_v43 = vsel %vm764_vm15, %v754_v42, %v757_v37 }
 0x171   : > { %vm526_vm3 = vcmp.lt.s32.totalorder %v4223_v30, 0  ;;  %v777_v47 = vsel %vm767_vm0, %v763_v28, 1326507024  ;;  %v4604_v56 = vmul.u32.u64.low %v780_v53, %v775_v35  ;;  %v4605_v23 = vmul.u32.u64.high %v780_v53, %v775_v35, %v4604_v56 }
 0x172   : > { %v1148_v54 = vand.u32 2147483647, %v4564_v13  ;;  %v3605_v40 = vmin.u32 %v1110_v16, %v4596_v55  ;;  %v768_v24 = vsel %vm764_vm15, %v748_v18, %v751_v59  ;;  %v770_v44 = vsel %vm766_vm1, %v754_v42, %v769_v49 }
 0x173   : > { %v778_v15 = vsel %vm766_vm1, %v760_v50, %v777_v47  ;;  %v702_v2 = vshrl.u32 %v684_v45, %v700_v4  ;;  %v706_v9 = vshll.u32 %v705_v29, 23  ;;  %v3608_v14 = vadd.s32 4294967169, %v1152_v6 }
 0x174   : > { %v779_v37 = vsel %vm765_vm2, %v776_v43, %v778_v15  ;;  %v608_v28 = vxor.u32 2147483648, %v4572_v38  ;;  %v1112_v35 = vclz %v3605_v40  ;;  %v701_v5 = vshll.u32 %v4530_v8, %v699_v51 }
 0x175   : > { %v4615_v22 = vmul.u32.u64.low %v780_v53, %v779_v37  ;;  %v4616_v7 = vmul.u32.u64.high %v780_v53, %v779_v37, %v4615_v22  ;;  %v771_v16 = vsel %vm765_vm2, %v768_v24, %v770_v44  ;;  %v790_v59 = vadd.s32 1, %v4605_v23 }
 0x176   : > { %v1158_v42 = vadd.s32 1, %v3608_v14  ;;  %v1013_v45 = vshll.u32 %v4459_v1, %v4547_v32  ;;  %v1014_v6 = vshrl.u32 %v4568_v41, %v1012_v19  ;;  %v4626_v50 = vor.u32 4788187, %v1018_v12 }
 0x177   : > { %v3606_v4 = vadd.s32 4294967294, %v1112_v35  ;;  %v703_v29 = vor.u32 %v702_v2, %v701_v5  ;;  %v707_v49 = vor.u32 4788187, %v706_v9  ;;  %v1155_v22 = vand.u32 8388607, %v1148_v54 }
 0x178   : > { %vm1159_vm4 = vcmp.gt.s32.totalorder %v1158_v42, 0  ;;  %v787_v8 = vmul.u32 %v780_v53, %v771_v16  ;;  %vm789_vm7 = vc.u32 %v4616_v7, %v4604_v56  ;;  %v4636_v1 = vmul.f32 %v918_v11, %v916_v52 }
 0x179   : > { %vm3607_vm6 = vcmp.lt.s32.totalorder %v3606_v4, 0  ;;  %v1160_v14 = vsel %vm1159_vm4, %v1158_v42, 0  ;;  %v791_v5 = vsel %vm789_vm7, %v790_v59, %v4605_v23  ;;  %v609_v19 = vsel %vm526_vm3, %v608_v28, %v4572_v38 }
 0x17a   : > { %v4638_v32 = vsel %vm3607_vm6, 0, %v3606_v4  ;;  %v1162_v41 = vand.u32 31, %v1160_v14  ;;  %v4644_v51 = vor.u32 %v1014_v6, %v1013_v45  ;;  %v1020_v39 = vand.u32 2147483647, %v4626_v50 }
 0x17b   : > { %v792_v12 = vadd.s32 %v791_v5, %v787_v8  ;;  %v708_v53 = vand.u32 2147483647, %v707_v49  ;;  %v710_v63 = vcvt.s32.f32 %v703_v29  ;;  %v1156_v18 = vor.u32 8388608, %v1155_v22 }
 0x17c   : > { %v1163_v31 = vsub.s32 32, %v1162_v41  ;;  %v1120_v11 = vsub.s32 4294967266, %v4638_v32  ;;  %v1165_v43 = vshll.u32 %v6380_v60, %v1162_v41  ;;  %v1168_v47 = vshll.u32 %v6378_v0, %v1162_v41 }
 0x17d   : > { %v793_v52 = vadd.s32 536870912, %v792_v12  ;;  %v1171_v40 = vshll.u32 %v6372_v3, %v1162_v41  ;;  %v6393_v24 = vmov 2102212464   ;;  %v1161_v2 = vshrl.u32 %v1160_v14, 5 }
 0x17e   : > { %v1166_v23 = vshrl.u32 %v6378_v0, %v1163_v31  ;;  %v1169_v38 = vshrl.u32 %v6372_v3, %v1163_v31  ;;  %v1172_v44 = vshrl.u32 %v6393_v24, %v1163_v31  ;;  %v1174_v9 = vshll.u32 %v6393_v24, %v1162_v41 }
 0x17f   : > { %v4654_v15 = vshrl.u32 %v793_v52, 30  ;;  %v6394_v37 = vmov 920167782   ;;  %v6395_v35 = vand.u32 2147483647, %v4223_v30  ;;  %v1100_v59 = vadd.s32 %v4542_v36, %v4553_v57 }
 0x180   : > { %v1175_v28 = vshrl.u32 %v6394_v37, %v1163_v31  ;;  %v1167_v42 = vor.u32 %v1166_v23, %v1165_v43  ;;  %v1170_v45 = vor.u32 %v1169_v38, %v1168_v47  ;;  %v1173_v6 = vor.u32 %v1172_v44, %v1171_v40 }
 0x181   : > { %vm4660_vm8 = vcmp.le.f32.partialorder %v6395_v35, 0.7853982  ;;  %v711_v4 = vmul.f32 %v710_v63, %v708_v53  ;;  %v795_v29 = vshll.u32 %v4654_v15, 30  ;;  %v1196_v22 = vshll.u32 %v1156_v18, 8 }
 0x182   : > { %v1176_v49 = vor.u32 %v1175_v28, %v1174_v9  ;;  %v1116_v8 = vsub.s32 32, %v4638_v32  ;;  %v1121_v14 = vadd.s32 127, %v1120_v11  ;;  %v1177_v5 = vshll.u32 %v6394_v37, %v1162_v41 }
 0x183   : > { %v6398_v52 = vmov 1326507024   ;;  %v4670_v3 = vsub.s32 %v792_v12, %v795_v29  ;;  %vm1180_vm9 = vcmp.lt.s32.totalorder %v1161_v2, 1  ;;  %vm1182_vm10 = vcmp.lt.s32.totalorder %v1161_v2, 3 }
 0x184   : > { %v1178_v35 = vshrl.u32 %v6398_v52, %v1163_v31  ;;  %vm1183_vm11 = vcmp.lt.s32.totalorder %v1161_v2, 4  ;;  %v1188_v53 = vsel %vm1180_vm9, %v1167_v42, %v1170_v45  ;;  %vm630_vm12 = vcmp.lt.s32.totalorder %v4407_v61, 0 }
 0x185   : > { %v1185_v57 = vsel %vm1183_vm11, %v1173_v6, 2102212464  ;;  %v1189_v63 = vsel %vm1183_vm11, %v1176_v49, 920167782  ;;  %v798_v18 = vsub.s32 0, %v4670_v3  ;;  %v1164_v11 = vshrl.u32 %v6380_v60, %v1163_v31 }
 0x186   : > { %v1179_v36 = vor.u32 %v1178_v35, %v1177_v5  ;;  %vm1181_vm13 = vcmp.lt.s32.totalorder %v1161_v2, 2  ;;  %v1190_v41 = vsel %vm1182_vm10, %v1173_v6, %v1189_v63  ;;  %v1122_v43 = vshll.u32 %v1121_v14, 23 }
 0x187   : > { %v1191_v12 = vsel %vm1181_vm13, %v1188_v53, %v1190_v41  ;;  %v1192_v47 = vsel %vm1180_vm9, %v1170_v45, %v1173_v6  ;;  %v3593_v38 = vmin.u32 %v798_v18, %v4670_v3  ;;  %v1184_v40 = vsel %vm1180_vm9, %v1164_v11, %v1167_v42 }
 0x188   : > { %v1193_v23 = vsel %vm1183_vm11, %v1179_v36, 1326507024  ;;  %v1186_v44 = vsel %vm1182_vm10, %v1170_v45, %v1185_v57  ;;  %v1118_v28 = vshrl.u32 %v1100_v59, %v1116_v8  ;;  %vm838_vm15 = vcmp.lt.s32.totalorder %v4221_v27, 0 }
 0x189   : > { %v1194_v9 = vsel %vm1182_vm10, %v1176_v49, %v1193_v23  ;;  %v4684_v29 = vmul.u32.u64.low %v1196_v22, %v1191_v12  ;;  %v4685_v5 = vmul.u32.u64.high %v1196_v22, %v1191_v12, %v4684_v29  ;;  %v612_v6 = vsel %vm4660_vm8, %v4223_v30, %v609_v19 }
 0x18a   : > { %v1195_v31 = vsel %vm1181_vm13, %v1192_v47, %v1194_v9  ;;  %v800_v14 = vclz %v3593_v38  ;;  %v1022_v45 = vcvt.s32.f32 %v4644_v51  ;;  %v712_v49 = vxor.u32 2147483648, %v711_v4 }
 0x18b   : > { %v4692_v35 = vmul.u32.u64.low %v1196_v22, %v1195_v31  ;;  %v4693_v42 = vmul.u32.u64.high %v1196_v22, %v1195_v31, %v4692_v35  ;;  %v1117_v59 = vshll.u32 %v4596_v55, %v4638_v32  ;;  %v1187_v8 = vsel %vm1181_vm13, %v1184_v40, %v1186_v44 }
 0x18c   : > { %v6399_v36 = vxor.u32 2147483648, %v4504_v48  ;;  %v920_v19 = vxor.u32 2147483648, %v4636_v1  ;;  %v1123_v53 = vor.u32 4788187, %v1122_v43  ;;  %v3594_v63 = vadd.s32 4294967294, %v800_v14 }
 0x18d   : > { %3888 = vcosq.f32 %v612_v6  ;;  %v1023_v51 = vmul.f32 %v1022_v45, %v1020_v39  ;;  %v1119_v18 = vor.u32 %v1118_v28, %v1117_v59  ;;  %v1206_v11 = vadd.s32 1, %v4685_v5 }
 0x18e   : > { %v505_v57 = vsel %vm422_vm14, %v6399_v36, %v4504_v48  ;;  %v6400_v55 = vand.u32 2147483647, %v4221_v27  ;;  %vm942_vm1 = vcmp.lt.s32.totalorder %v4249_v58, 0  ;;  %vm3595_vm14 = vcmp.lt.s32.totalorder %v3594_v63, 0 }
 0x18f   : > { %v1203_v48 = vmul.u32 %v1196_v22, %v1187_v8  ;;  %vm1205_vm2 = vc.u32 %v4693_v42, %v4684_v29  ;;  %v610_v2 = vsub.s32 4, %v4398_v33  ;;  %v713_v50 = vsel %vm630_vm12, %v712_v49, %v711_v4 }
 0x190   : > { %vm4710_vm0 = vcmp.le.f32.partialorder %v6400_v55, 0.7853982  ;;  %v788_v39 = vadd.s32 %v4604_v56, %v4616_v7  ;;  %v803_v41 = vsel %vm3595_vm14, 0, %v3594_v63  ;;  %v1207_v43 = vsel %vm1205_vm2, %v1206_v11, %v4685_v5 }
 0x191   : > { %v1124_v12 = vand.u32 2147483647, %v1123_v53  ;;  %v804_v47 = vsub.s32 32, %v803_v41  ;;  %v808_v23 = vsub.s32 4294967266, %v803_v41  ;;  %v1208_v38 = vadd.s32 %v1207_v43, %v1203_v48 }
 0x192   : > { %v508_v22 = vsel %vm4497_vm5, %v4219_v26, %v505_v57  ;;  %3890 = vsinq.f32 %v612_v6  ;;  %v6403_v40 = vand.u32 2147483647, %v4407_v61  ;;  %v1126_v4 = vcvt.s32.f32 %v1119_v18 }
 0x193   : > { %v805_v7 = vshll.u32 %v4670_v3, %v803_v41  ;;  %v806_v56 = vshrl.u32 %v788_v39, %v804_v47  ;;  %v809_v9 = vadd.s32 127, %v808_v23  ;;  %v1209_v28 = vadd.s32 536870912, %v1208_v38 }
 0x194   : > { %vm4728_vm4 = vcmp.le.f32.partialorder %v6403_v40, 0.7853982  ;;  %v921_v31 = vsel %vm838_vm15, %v920_v19, %v4636_v1  ;;  %v1024_v5 = vxor.u32 2147483648, %v1023_v51  ;;  %v611_v14 = vsel %vm526_vm3, %v610_v2, %v4398_v33 }
 0x195   : > { %v716_v6 = vsel %vm4728_vm4, %v4407_v61, %v713_v50  ;;  %v1127_v35 = vmul.f32 %v1126_v4, %v1124_v12  ;;  %v807_v45 = vor.u32 %v806_v56, %v805_v7  ;;  %v810_v49 = vshll.u32 %v809_v9, 23 }
 0x196   : > { %v4742_v3 = vshrl.u32 %v1209_v28, 30  ;;  %3892 = vsinq.f32 %v508_v22  ;;  %v6406_v59 = vsel %vm4497_vm5, 0, %v4484_v10  ;;  %v6407_v8 = vand.u32 2147483647, %v4249_v58 }
 0x197   : > { %v4748_v1 = vadd.s32 3, %v6406_v59  ;;  %v714_v33 = vsub.s32 4, %v4518_v17  ;;  %3894 = vcosq.f32 %v716_v6  ;;  %v811_v57 = vor.u32 4788187, %v810_v49  ;;  %v3889_v46 = vpop.eup %3888 }
 0x198   : > { %vm4752_vm6 = vcmp.le.f32.partialorder %v6407_v8, 0.7853982  ;;  %v1211_v19 = vshll.u32 %v4742_v3, 30  ;;  %v613_v53 = vsel %vm4660_vm8, 0, %v611_v14  ;;  %v922_v10 = vsub.s32 4, %v4376_v62 }
 0x199   : > { %v924_v63 = vsel %vm4710_vm0, %v4221_v27, %v921_v31  ;;  %v1025_v18 = vsel %vm942_vm1, %v1024_v5, %v1023_v51  ;;  %3896 = vsinq.f32 %v716_v6  ;;  %v1128_v11 = vxor.u32 2147483648, %v1127_v35 }
 0x19a   : > { %v812_v55 = vand.u32 2147483647, %v811_v57  ;;  %v814_v48 = vcvt.s32.f32 %v807_v45  ;;  %v4766_v2 = vsub.s32 %v1208_v38, %v1211_v19  ;;  %3898 = vcosq.f32 %v508_v22 }
 0x19b   : > { %v715_v16 = vsel %vm630_vm12, %v714_v33, %v4518_v17  ;;  %v617_v50 = vadd.s32 3, %v613_v53  ;;  %v818_v39 = vsub.s32 4, %v4654_v15  ;;  %3900 = vcosq.f32 %v924_v63 }
 0x19c   : > { %v1028_v41 = vsel %vm4752_vm6, %v4249_v58, %v1025_v18  ;;  %v815_v51 = vmul.f32 %v814_v48, %v812_v55  ;;  %v1214_v43 = vsub.s32 0, %v4766_v2  ;;  %v3891_v12 = vpop.eup %3890  ;;  %3902 = vsinq.f32 %v924_v63 }
 0x19d   : > { %v6410_v47 = vand.u32 2147483647, %v4435_v34  ;;  %vm1046_vm3 = vcmp.lt.s32.totalorder %v4435_v34, 0  ;;  %vm734_vm7 = vcmp.lt.s32.totalorder %v4488_v25, 0  ;;  %v717_v17 = vsel %vm4728_vm4, 0, %v715_v16 }
 0x19e   : > { %v1129_v38 = vsel %vm1046_vm3, %v1128_v11, %v1127_v35  ;;  %v816_v22 = vxor.u32 2147483648, %v815_v51  ;;  %v3609_v40 = vmin.u32 %v1214_v43, %v4766_v2  ;;  %3904 = vcosq.f32 %v1028_v41 }
 0x19f   : > { %vm4778_vm5 = vcmp.le.f32.partialorder %v6410_v47, 0.7853982  ;;  %v1130_v4 = vsub.s32 4, %v4588_v20  ;;  %v618_v7 = vand.u32 3, %v617_v50  ;;  %v819_v56 = vsel %vm734_vm7, %v818_v39, %v4654_v15 }
 0x1a0   : > { %3906 = vsinq.f32 %v1028_v41  ;;  %v6413_v9 = vand.u32 2147483647, %v4488_v25  ;;  %v817_v44 = vsel %vm734_vm7, %v816_v22, %v815_v51  ;;  %v1216_v31 = vclz %v3609_v40  ;;  %v3893_v5 = vpop.eup %3892 }
 0x1a1   : > { %v1132_v6 = vsel %vm4778_vm5, %v4435_v34, %v1129_v38  ;;  %v621_v35 = vxor.u32 2147483648, %v3891_v12  ;;  %v624_v15 = vxor.u32 2147483648, %v3889_v46  ;;  %v3895_v45 = vpop.eup %3894  ;;  %v721_v49 = vadd.s32 3, %v717_v17 }
 0x1a2   : > { %vm4793_vm8 = vcmp.le.f32.partialorder %v6413_v9, 0.7853982  ;;  %v3610_v59 = vadd.s32 4294967294, %v1216_v31  ;;  %v4808_v57 = vsel %vm838_vm15, %v922_v10, %v4376_v62  ;;  %v4813_v19 = vsel %vm1046_vm3, %v1130_v4, %v4588_v20 }
 0x1a3   : > { %v820_v14 = vsel %vm4793_vm8, %v4488_v25, %v817_v44  ;;  %v821_v8 = vsel %vm4793_vm8, 0, %v819_v56  ;;  %v3897_v33 = vpop.eup %3896  ;;  %vm619_vm9 = vcmp.lt.s32.totalorder %v618_v7, 2  ;;  %vm620_vm11 = vcmp.eq.s32.totalorder %v618_v7, 0 }
 0x1a4   : > { %3908 = vcosq.f32 %v820_v14  ;;  %vm3611_vm10 = vcmp.lt.s32.totalorder %v3610_v59, 0  ;;  %vm623_vm12 = vcmp.eq.s32.totalorder %v618_v7, 2  ;;  %v3899_v53 = vpop.eup %3898  ;;  %v622_v18 = vsel %vm620_vm11, %v3889_v46, %v621_v35 }
 0x1a5   : > { %3910 = vsinq.f32 %v820_v14  ;;  %v1219_v63 = vsel %vm3611_vm10, 0, %v3610_v59  ;;  %v625_v11 = vsel %vm623_vm12, %v624_v15, %v3891_v12  ;;  %v825_v55 = vadd.s32 3, %v821_v8  ;;  %v4815_v48 = vpop.eup %3900 }
 0x1a6   : > { %3912 = vcosq.f32 %v1132_v6  ;;  %v1204_v62 = vadd.s32 %v4684_v29, %v4693_v42  ;;  %v1220_v10 = vsub.s32 32, %v1219_v63  ;;  %v1224_v16 = vsub.s32 4294967266, %v1219_v63  ;;  %v4819_v50 = vpop.eup %3902 }
 0x1a7   : > { %v722_v20 = vand.u32 3, %v721_v49  ;;  %v514_v39 = vand.u32 3, %v4748_v1  ;;  %v517_v41 = vxor.u32 2147483648, %v3893_v5  ;;  %v725_v51 = vxor.u32 2147483648, %v3897_v33 }
 0x1a8   : > { %v728_v43 = vxor.u32 2147483648, %v3895_v45  ;;  %v1221_v47 = vshll.u32 %v4766_v2, %v1219_v63  ;;  %v1222_v46 = vshrl.u32 %v1204_v62, %v1220_v10  ;;  %v1225_v12 = vadd.s32 127, %v1224_v16  ;;  %v4823_v38 = vpop.eup %3904 }
 0x1a9   : > { %v520_v17 = vxor.u32 2147483648, %v3899_v53  ;;  %3914 = vsinq.f32 %v1132_v6  ;;  %vm616_vm13 = vweird.f32 %v4223_v30  ;;  %v626_v29 = vsel %vm619_vm9, %v622_v18, %v625_v11 }
 0x1aa   : > { %v826_v42 = vand.u32 3, %v825_v55  ;;  %v4827_v22 = vpop.eup %3906  ;;  %v1223_v40 = vor.u32 %v1222_v46, %v1221_v47  ;;  %v1226_v1 = vshll.u32 %v1225_v12, 23  ;;  %vm724_vm15 = vcmp.eq.s32.totalorder %v722_v20, 0 }
 0x1ab   : > { %vm727_vm14 = vcmp.eq.s32.totalorder %v722_v20, 2  ;;  %vm516_vm2 = vcmp.eq.s32.totalorder %v514_v39, 0  ;;  %vm519_vm4 = vcmp.eq.s32.totalorder %v514_v39, 2  ;;  %v726_v2 = vsel %vm724_vm15, %v3895_v45, %v725_v51 }
 0x1ac   : > { %v729_v4 = vsel %vm727_vm14, %v728_v43, %v3897_v33  ;;  %vm4831_vm3 = vcmp.le.f32.partialorder %v1148_v54, 0.7853982  ;;  %v1227_v7 = vor.u32 4788187, %v1226_v1  ;;  %vm515_vm7 = vcmp.lt.s32.totalorder %v514_v39, 2 }
 0x1ad   : > { %v518_v28 = vsel %vm516_vm2, %v3899_v53, %v517_v41  ;;  %v521_v44 = vsel %vm519_vm4, %v520_v17, %v3893_v5  ;;  %vm831_vm8 = vcmp.eq.s32.totalorder %v826_v42, 2  ;;  %vm723_vm9 = vcmp.lt.s32.totalorder %v722_v20, 2 }
 0x1ae   : > { %v3909_v56 = vpop.eup %3908  ;;  %v1026_v14 = vsub.s32 4, %v4438_v21  ;;  %v1228_v15 = vand.u32 2147483647, %v1227_v7  ;;  %v1230_v45 = vcvt.s32.f32 %v1223_v40  ;;  %v730_v59 = vsel %vm723_vm9, %v726_v2, %v729_v4 }
 0x1af   : > { %v3911_v31 = vpop.eup %3910  ;;  %v832_v6 = vxor.u32 2147483648, %v3909_v56  ;;  %vm827_vm10 = vcmp.lt.s32.totalorder %v826_v42, 2  ;;  %vm828_vm11 = vcmp.eq.s32.totalorder %v826_v42, 0  ;;  %vm720_vm12 = vweird.f32 %v4407_v61 }
 0x1b0   : > { %v3913_v35 = vpop.eup %3912  ;;  %v829_v49 = vxor.u32 2147483648, %v3911_v31  ;;  %v1231_v8 = vmul.f32 %v1230_v45, %v1228_v15  ;;  %v522_v5 = vsel %vm515_vm7, %v518_v28, %v521_v44  ;;  %v1234_v53 = vsub.s32 4, %v4742_v3 }
 0x1b1   : > { %v833_v54 = vsel %vm831_vm8, %v832_v6, %v3911_v31  ;;  %vm824_vm15 = vweird.f32 %v4488_v25  ;;  %v731_v18 = vsel %vm720_vm12, nan, %v730_v59  ;;  %v1027_v11 = vsel %vm942_vm1, %v1026_v14, %v4438_v21 }
 0x1b2   : > { %v830_v33 = vsel %vm828_vm11, %v3909_v56, %v829_v49  ;;  %v1232_v55 = vxor.u32 2147483648, %v1231_v8  ;;  %v627_v62 = vsel %vm616_vm13, nan, %v626_v29  ;;  %vm512_vm14 = vweird.f32 %v4219_v26 }
 0x1b3   : > { %v834_v63 = vsel %vm827_vm10, %v830_v33, %v833_v54  ;;  %v3915_v61 = vpop.eup %3914  ;;  %v1133_v16 = vsel %vm4778_vm5, 0, %v4813_v19  ;;  %vm1150_vm2 = vcmp.lt.s32.totalorder %v4564_v13, 0  ;;  %v523_v20 = vsel %vm512_vm14, nan, %v522_v5  ;;  %v1252_v5 = vld [vmem:[%s6353_s3] sm:$0xff] }
 0x1b4   : > { %v835_v10 = vsel %vm824_vm15, nan, %v834_v63  ;;  %v1233_v39 = vsel %vm1150_vm2, %v1232_v55, %v1231_v8  ;;  %v3709_v41 = vpack.c.bf16 %v731_v18, %v523_v20  ;;  %v1029_v21 = vsel %vm4752_vm6, 0, %v1027_v11 }
 0x1b5   : > { %v3707_v25 = vpack.c.bf16 %v835_v10, %v627_v62  ;;  %v1235_v30 = vsel %vm1150_vm2, %v1234_v53, %v4742_v3  ;;  %v925_v26 = vsel %vm4710_vm0, 0, %v4808_v57  ;;  %v1236_v23 = vsel %vm4831_vm3, %v4564_v13, %v1233_v39  ;;  %v1263_v53 = vpop.permute.xlu0 %1262 }
 0x1b6   : > { %v1137_v19 = vadd.s32 3, %v1133_v16  ;;  %3916 = vcosq.f32 %v1236_v23  ;;  %v1033_v51 = vadd.s32 3, %v1029_v21  ;;  %v1237_v36 = vsel %vm4831_vm3, 0, %v1235_v30 }
 0x1b7   : > { %3708 = vmatprep.subr.bf16.mxu1 %v3707_v25  ;;  %3918 = vsinq.f32 %v1236_v23  ;;  %v929_v43 = vadd.s32 3, %v925_v26  ;;  %v1241_v47 = vadd.s32 3, %v1237_v36  ;;  %v1141_v12 = vxor.u32 2147483648, %v3915_v61 }
 0x1b8   : > { %3710 = vmatpush1.bf16.msra.mxu1 %v3709_v41  ;;  %v1138_v3 = vand.u32 3, %v1137_v19  ;;  %v1034_v46 = vand.u32 3, %v1033_v51  ;;  %v1144_v32 = vxor.u32 2147483648, %v3913_v35  ;;  %v1037_v57 = vxor.u32 2147483648, %v4827_v22 }
 0x1b9   : > { %v1040_v17 = vxor.u32 2147483648, %v4823_v38  ;;  %v930_v29 = vand.u32 3, %v929_v43  ;;  %v933_v42 = vxor.u32 2147483648, %v4819_v50  ;;  %v936_v40 = vxor.u32 2147483648, %v4815_v48 }
 0x1ba   : > { %v1242_v1 = vand.u32 3, %v1241_v47  ;;  %vm1140_vm0 = vcmp.eq.s32.totalorder %v1138_v3, 0  ;;  %vm1143_vm1 = vcmp.eq.s32.totalorder %v1138_v3, 2  ;;  %vm1036_vm6 = vcmp.eq.s32.totalorder %v1034_v46, 0 }
 0x1bb   : > { %vm1039_vm5 = vcmp.eq.s32.totalorder %v1034_v46, 2  ;;  %v1142_v2 = vsel %vm1140_vm0, %v3913_v35, %v1141_v12  ;;  %v1145_v4 = vsel %vm1143_vm1, %v1144_v32, %v3915_v61  ;;  %v1038_v9 = vsel %vm1036_vm6, %v4823_v38, %v1037_v57  ;;  %v1268_v61 = vpop.permute.xlu1 %1267 }
 0x1bc   : > { %v1041_v7 = vsel %vm1039_vm5, %v1040_v17, %v4827_v22  ;;  %vm932_vm13 = vcmp.eq.s32.totalorder %v930_v29, 0  ;;  %vm935_vm4 = vcmp.eq.s32.totalorder %v930_v29, 2  ;;  %vm1139_vm3 = vcmp.lt.s32.totalorder %v1138_v3, 2 }
 0x1bd   : > { %v934_v31 = vsel %vm932_vm13, %v4815_v48, %v933_v42  ;;  %v937_v6 = vsel %vm935_vm4, %v936_v40, %v4819_v50  ;;  %vm1035_vm7 = vcmp.lt.s32.totalorder %v1034_v46, 2  ;;  %vm1247_vm8 = vcmp.eq.s32.totalorder %v1242_v1, 2 }
 0x1be   : > { %v1146_v15 = vsel %vm1139_vm3, %v1142_v2, %v1145_v4  ;;  %v1042_v35 = vsel %vm1035_vm7, %v1038_v9, %v1041_v7  ;;  %vm1244_vm9 = vcmp.eq.s32.totalorder %v1242_v1, 0  ;;  %vm931_vm10 = vcmp.lt.s32.totalorder %v930_v29, 2 }
 0x1bf   : > { %vm1243_vm11 = vcmp.lt.s32.totalorder %v1242_v1, 2  ;;  %v938_v22 = vsel %vm931_vm10, %v934_v31, %v937_v6  ;;  %vm1136_vm12 = vweird.f32 %v4435_v34  ;;  %vm1032_vm15 = vweird.f32 %v4249_v58  ;;  %v1253_v34 = vld [vmem:[%s6353_s3 + $0x8] sm:$0xff] }
 0x1c0   : > { %v3917_v56 = vpop.eup %3916  ;;  %vm1240_vm14 = vweird.f32 %v4564_v13  ;;  %v1147_v50 = vsel %vm1136_vm12, nan, %v1146_v15  ;;  %v1043_v49 = vsel %vm1032_vm15, nan, %v1042_v35  ;;  %vm928_vm2 = vweird.f32 %v4221_v27  ;;  %v1254_v27 = vld [vmem:[%s6353_s3 + $0x10] sm:$0xff]  ;;  %v1255_v13 = vld [vmem:[%s6353_s3 + $0x18] sm:$0xff] }
 0x1c1   : > { %v3919_v28 = vpop.eup %3918  ;;  %v1248_v44 = vxor.u32 2147483648, %v3917_v56  ;;  %v939_v8 = vsel %vm928_vm2, nan, %v938_v22  ;;  %vm1280_vm0 = vcmask 261120   ;;  %v6418_v58 = vmov 0.0  }
 0x1c2   : > { %v1245_v14 = vxor.u32 2147483648, %v3919_v28  ;;  %v3713_v33 = vpack.c.bf16 %v1147_v50, %v939_v8 }
 0x1c3   : > { %v1249_v45 = vsel %vm1247_vm8, %v1248_v44, %v3919_v28 }
 0x1c4   : > { %v1246_v38 = vsel %vm1244_vm9, %v3917_v56, %v1245_v14 }
 0x1c5   : > { %v1250_v48 = vsel %vm1243_vm11, %v1246_v38, %v1249_v45  ;;  %v6419_v45 = vmov 2131351028  }
 0x1c6   : > { %v1251_v59 = vsel %vm1240_vm14, nan, %v1250_v48 }
 0x1c7   : > { %v3711_v54 = vpack.c.bf16 %v1251_v59, %v1043_v49 }
 0x1c9   : > { %3712 = vmatprep.subr.bf16.mxu1 %v3711_v54 }
 0x1ca   : > { %3714 = vmatpush1.bf16.msra.mxu1 %v3713_v33 }
 0x1cd   : > { %3612 = vmatmul.mubr.msk.f32.vlgmr.msra.gmra.mrb[4].mxu1 %vm1280_vm0, %v1252_v5 }
 0x1ce   : > { %1363 = vmatprep.mubr.f32.mxu1 %v6418_v58 }
 0x1d1   : > { %3613 = vmatmul.mubr.msk.f32.gmra.mrb[6].mxu1 %vm1280_vm0, %v1253_v34 }
 0x1d2   : > { %1369 = vmatprep.mubr.f32.mxu1 %v6418_v58 }
 0x1d5   : > { %3614 = vmatmul.mubr.msk.f32.gmra.mrb[8].mxu1 %vm1280_vm0, %v1254_v27 }
 0x1d6   : > { %1375 = vmatprep.mubr.f32.mxu1 %v6418_v58 }
 0x1d9   : > { %3615 = vmatmul.mubr.msk.f32.gmra.mrb[10].mxu1 %vm1280_vm0, %v1255_v13 }
 0x1da   : > { %3255 = vmatprep.mubr.f32.mxu1 %v6418_v58 }
 0x2a0   : > { %v1359_v63 = vpop.f32.mrb[4].mxu1 }
 0x2a1   : > { %v4893_v18 = vadd.f32 %v1359_v63, %v1263_v53  ;;  %v1361_v11 = vpop.f32.mrb[5].mxu1 }
 0x2a2   : > { %v4895_v55 = vadd.f32 %v1361_v11, %v1263_v53 }
 0x2a3   : > { %v1382_v62 = vand.u32 2147483647, %v4893_v18  ;;  %v1385_v10 = vand.u32 2139095040, %v4893_v18 }
 0x2a4   : > { %v1486_v16 = vand.u32 2147483647, %v4895_v55  ;;  %v1489_v25 = vand.u32 2139095040, %v4895_v55  ;;  %v1365_v20 = vpop.f32.mrb[6].mxu1 }
 0x2a5   : > { %v1386_v39 = vshrl.u32 %v1385_v10, 23  ;;  %v4901_v41 = vadd.f32 %v1365_v20, %v1268_v61  ;;  %v1367_v21 = vpop.f32.mrb[7].mxu1  ;;  %v1389_v30 = vand.u32 8388607, %v1382_v62 }
 0x2a6   : > { %v1490_v26 = vshrl.u32 %v1489_v25, 23  ;;  %v1493_v23 = vand.u32 8388607, %v1486_v16  ;;  %v4914_v4 = vadd.f32 %v1367_v21, %v1268_v61 }
 0x2a7   : > { %v3616_v19 = vadd.s32 4294967169, %v1386_v39  ;;  %v1593_v36 = vand.u32 2139095040, %v4901_v41  ;;  %v1390_v3 = vor.u32 8388608, %v1389_v30  ;;  %v6377_v44 = vand.u32 2147483647, %v4901_v41 }
 0x2a8   : > { %v3620_v51 = vadd.s32 4294967169, %v1490_v26  ;;  %v4908_v43 = vpop.f32.mrb[8].mxu1  ;;  %v1494_v46 = vor.u32 8388608, %v1493_v23 }
 0x2a9   : > { %v1392_v47 = vadd.s32 1, %v3616_v19  ;;  %v1594_v32 = vshrl.u32 %v1593_v36, 23  ;;  %v4910_v57 = vpop.f32.mrb[9].mxu1  ;;  %v4918_v9 = vshll.u32 %v1390_v3, 8 }
 0x2aa   : > { %v1496_v12 = vadd.s32 1, %v3620_v51  ;;  %v4922_v28 = vshll.u32 %v1494_v46, 8 }
 0x2ab   : > { %vm1393_vm1 = vcmp.gt.s32.totalorder %v1392_v47, 0  ;;  %v3624_v29 = vadd.s32 4294967169, %v1594_v32 }
 0x2ac   : > { %v1394_v17 = vsel %vm1393_vm1, %v1392_v47, 0  ;;  %vm1497_vm6 = vcmp.gt.s32.totalorder %v1496_v12, 0  ;;  %v4912_v42 = vpop.f32.mrb[10].mxu1 }
 0x2ad   : > { %v1395_v40 = vshrl.u32 %v1394_v17, 5  ;;  %v1396_v1 = vand.u32 31, %v1394_v17  ;;  %v1498_v2 = vsel %vm1497_vm6, %v1496_v12, 0  ;;  %v4916_v56 = vpop.f32.mrb[11].mxu1  ;;  %v4926_v15 = vadd.s32 1, %v3624_v29 }
 0x2ae   : > { %v4920_v7 = vshrl.u32 %v1498_v2, 5  ;;  %v1500_v14 = vand.u32 31, %v1498_v2 }
 0x2af   : > { %v1397_v31 = vsub.s32 32, %v1396_v1  ;;  %v1399_v6 = vshll.u32 %v6380_v60, %v1396_v1  ;;  %v1402_v35 = vshll.u32 %v6378_v0, %v1396_v1  ;;  %v1405_v38 = vshll.u32 %v6419_v45, %v1396_v1 }
 0x2b0   : > { %v1408_v22 = vshll.u32 %v6393_v24, %v1396_v1  ;;  %v1411_v48 = vshll.u32 %v6394_v37, %v1396_v1  ;;  %vm1414_vm5 = vcmp.lt.s32.totalorder %v1395_v40, 1  ;;  %vm1415_vm13 = vcmp.lt.s32.totalorder %v1395_v40, 2 }
 0x2b1   : > { %v1400_v50 = vshrl.u32 %v6378_v0, %v1397_v31  ;;  %v1403_v49 = vshrl.u32 %v6419_v45, %v1397_v31  ;;  %v1406_v59 = vshrl.u32 %v6393_v24, %v1397_v31  ;;  %v1398_v54 = vshrl.u32 %v6380_v60, %v1397_v31 }
 0x2b2   : > { %v1409_v8 = vshrl.u32 %v6394_v37, %v1397_v31  ;;  %v1412_v33 = vshrl.u32 %v6398_v52, %v1397_v31  ;;  %v1501_v13 = vsub.s32 32, %v1500_v14  ;;  %vm1416_vm4 = vcmp.lt.s32.totalorder %v1395_v40, 3 }
 0x2b3   : > { %v1401_v5 = vor.u32 %v1400_v50, %v1399_v6  ;;  %v1404_v34 = vor.u32 %v1403_v49, %v1402_v35  ;;  %v1407_v27 = vor.u32 %v1406_v59, %v1405_v38  ;;  %vm1417_vm3 = vcmp.lt.s32.totalorder %v1395_v40, 4 }
 0x2b4   : > { %v1410_v53 = vor.u32 %v1409_v8, %v1408_v22  ;;  %v1413_v63 = vor.u32 %v1412_v33, %v1411_v48  ;;  %v1503_v30 = vshll.u32 %v6380_v60, %v1500_v14  ;;  %v1504_v19 = vshrl.u32 %v6378_v0, %v1501_v13 }
 0x2b5   : > { %v1418_v11 = vsel %vm1414_vm5, %v1398_v54, %v1401_v5  ;;  %v1419_v10 = vsel %vm1417_vm3, %v1407_v27, 2102212464  ;;  %v1422_v61 = vsel %vm1414_vm5, %v1401_v5, %v1404_v34  ;;  %v1426_v25 = vsel %vm1414_vm5, %v1404_v34, %v1407_v27 }
 0x2b6   : > { %v1420_v20 = vsel %vm1416_vm4, %v1404_v34, %v1419_v10  ;;  %v1423_v39 = vsel %vm1417_vm3, %v1410_v53, 920167782  ;;  %v1427_v21 = vsel %vm1417_vm3, %v1413_v63, 1326507024  ;;  %v1506_v51 = vshll.u32 %v6378_v0, %v1500_v14 }
 0x2b7   : > { %v1424_v26 = vsel %vm1416_vm4, %v1407_v27, %v1423_v39  ;;  %v1428_v23 = vsel %vm1416_vm4, %v1410_v53, %v1427_v21  ;;  %v1421_v36 = vsel %vm1415_vm13, %v1418_v11, %v1420_v20  ;;  %v1507_v46 = vshrl.u32 %v6419_v45, %v1501_v13 }
 0x2b8   : > { %v1425_v47 = vsel %vm1415_vm13, %v1422_v61, %v1424_v26  ;;  %v1429_v3 = vsel %vm1415_vm13, %v1426_v25, %v1428_v23  ;;  %v1505_v1 = vor.u32 %v1504_v19, %v1503_v30  ;;  %v1509_v31 = vshll.u32 %v6419_v45, %v1500_v14 }
 0x2b9   : > { %v4949_v12 = vmul.u32.u64.low %v4918_v9, %v1429_v3  ;;  %v4950_v32 = vmul.u32.u64.high %v4918_v9, %v1429_v3, %v4949_v12  ;;  %v4953_v17 = vmul.u32.u64.low %v4918_v9, %v1425_v47  ;;  %v4954_v29 = vmul.u32.u64.high %v4918_v9, %v1425_v47, %v4953_v17 }
 0x2ba   : > { %v1508_v2 = vor.u32 %v1507_v46, %v1506_v51  ;;  %v1510_v6 = vshrl.u32 %v6393_v24, %v1501_v13  ;;  %v1502_v40 = vshrl.u32 %v6380_v60, %v1501_v13  ;;  %v1512_v35 = vshll.u32 %v6393_v24, %v1500_v14 }
 0x2bb   : > { %v1513_v38 = vshrl.u32 %v6394_v37, %v1501_v13  ;;  %v1516_v22 = vshrl.u32 %v6398_v52, %v1501_v13  ;;  %v1437_v48 = vmul.u32 %v4918_v9, %v1421_v36  ;;  %v1515_v49 = vshll.u32 %v6394_v37, %v1500_v14 }
 0x2bc   : > { %v1511_v50 = vor.u32 %v1510_v6, %v1509_v31  ;;  %vm1518_vm7 = vcmp.lt.s32.totalorder %v4920_v7, 1  ;;  %vm1439_vm8 = vc.u32 %v4950_v32, %v4953_v17  ;;  %v1440_v59 = vadd.s32 1, %v4954_v29 }
 0x2bd   : > { %v1514_v54 = vor.u32 %v1513_v38, %v1512_v35  ;;  %vm1519_vm9 = vcmp.lt.s32.totalorder %v4920_v7, 2  ;;  %v1517_v8 = vor.u32 %v1516_v22, %v1515_v49  ;;  %vm1520_vm10 = vcmp.lt.s32.totalorder %v4920_v7, 3 }
 0x2be   : > { %vm1521_vm11 = vcmp.lt.s32.totalorder %v4920_v7, 4  ;;  %v1526_v33 = vsel %vm1518_vm7, %v1505_v1, %v1508_v2  ;;  %v1441_v9 = vsel %vm1439_vm8, %v1440_v59, %v4954_v29  ;;  %v1530_v34 = vsel %vm1518_vm7, %v1508_v2, %v1511_v50 }
 0x2bf   : > { %v1523_v5 = vsel %vm1521_vm11, %v1511_v50, 2102212464  ;;  %v1527_v14 = vsel %vm1521_vm11, %v1514_v54, 920167782  ;;  %v1442_v27 = vadd.s32 %v1441_v9, %v1437_v48  ;;  %v1522_v13 = vsel %vm1518_vm7, %v1502_v40, %v1505_v1 }
 0x2c0   : > { %v1528_v53 = vsel %vm1520_vm10, %v1511_v50, %v1527_v14  ;;  %v1531_v63 = vsel %vm1521_vm11, %v1517_v8, 1326507024  ;;  %v1524_v11 = vsel %vm1520_vm10, %v1508_v2, %v1523_v5  ;;  %vm1601_vm12 = vcmp.gt.s32.totalorder %v4926_v15, 0 }
 0x2c1   : > { %v1529_v10 = vsel %vm1519_vm9, %v1526_v33, %v1528_v53  ;;  %v1532_v61 = vsel %vm1520_vm10, %v1514_v54, %v1531_v63  ;;  %v1443_v25 = vadd.s32 536870912, %v1442_v27  ;;  %v1597_v23 = vand.u32 8388607, %v6377_v44 }
 0x2c2   : > { %v1533_v20 = vsel %vm1519_vm9, %v1530_v34, %v1532_v61  ;;  %v4979_v39 = vmul.u32.u64.low %v4922_v28, %v1529_v10  ;;  %v4980_v21 = vmul.u32.u64.high %v4922_v28, %v1529_v10, %v4979_v39  ;;  %v1602_v19 = vsel %vm1601_vm12, %v4926_v15, 0 }
 0x2c3   : > { %v4984_v30 = vmul.u32.u64.low %v4922_v28, %v1533_v20  ;;  %v4985_v26 = vmul.u32.u64.high %v4922_v28, %v1533_v20, %v4984_v30  ;;  %v4990_v51 = vshrl.u32 %v1443_v25, 30  ;;  %v1525_v36 = vsel %vm1519_vm9, %v1522_v13, %v1524_v11 }
 0x2c4   : > { %v1604_v47 = vand.u32 31, %v1602_v19  ;;  %v1697_v3 = vand.u32 2139095040, %v4914_v4  ;;  %v1544_v12 = vadd.s32 1, %v4980_v21  ;;  %v1541_v1 = vmul.u32 %v4922_v28, %v1525_v36 }
 0x2c5   : > { %v1445_v46 = vshll.u32 %v4990_v51, 30  ;;  %vm1543_vm15 = vc.u32 %v4985_v26, %v4979_v39  ;;  %v1598_v2 = vor.u32 8388608, %v1597_v23  ;;  %v1603_v48 = vshrl.u32 %v1602_v19, 5 }
 0x2c6   : > { %v1605_v29 = vsub.s32 32, %v1604_v47  ;;  %v1545_v31 = vsel %vm1543_vm15, %v1544_v12, %v4980_v21  ;;  %v1698_v7 = vshrl.u32 %v1697_v3, 23  ;;  %v1607_v40 = vshll.u32 %v6380_v60, %v1604_v47 }
 0x2c7   : > { %v5000_v15 = vsub.s32 %v1442_v27, %v1445_v46  ;;  %v1546_v6 = vadd.s32 %v1545_v31, %v1541_v1  ;;  %v1610_v28 = vshll.u32 %v6378_v0, %v1604_v47  ;;  %v1613_v54 = vshll.u32 %v6419_v45, %v1604_v47 }
 0x2c8   : > { %v1608_v35 = vshrl.u32 %v6378_v0, %v1605_v29  ;;  %v1611_v38 = vshrl.u32 %v6419_v45, %v1605_v29  ;;  %v1614_v50 = vshrl.u32 %v6393_v24, %v1605_v29  ;;  %v1638_v8 = vshll.u32 %v1598_v2, 8 }
 0x2c9   : > { %v1448_v22 = vsub.s32 0, %v5000_v15  ;;  %v1547_v49 = vadd.s32 536870912, %v1546_v6  ;;  %v1616_v5 = vshll.u32 %v6393_v24, %v1604_v47  ;;  %v1617_v14 = vshrl.u32 %v6394_v37, %v1605_v29 }
 0x2ca   : > { %v1609_v59 = vor.u32 %v1608_v35, %v1607_v40  ;;  %v1612_v9 = vor.u32 %v1611_v38, %v1610_v28  ;;  %v1615_v27 = vor.u32 %v1614_v50, %v1613_v54  ;;  %v1619_v13 = vshll.u32 %v6394_v37, %v1604_v47 }
 0x2cb   : > { %v3617_v33 = vmin.u32 %v1448_v22, %v5000_v15  ;;  %v5013_v34 = vshrl.u32 %v1547_v49, 30  ;;  %v1620_v53 = vshrl.u32 %v6398_v52, %v1605_v29  ;;  %v1618_v11 = vor.u32 %v1617_v14, %v1616_v5 }
 0x2cc   : > { %vm1622_vm14 = vcmp.lt.s32.totalorder %v1603_v48, 1  ;;  %v3628_v10 = vadd.s32 4294967169, %v1698_v7  ;;  %vm1623_vm2 = vcmp.lt.s32.totalorder %v1603_v48, 2  ;;  %vm1625_vm1 = vcmp.lt.s32.totalorder %v1603_v48, 4 }
 0x2cd   : > { %v1450_v63 = vclz %v3617_v33  ;;  %v1549_v61 = vshll.u32 %v5013_v34, 30  ;;  %v1621_v25 = vor.u32 %v1620_v53, %v1619_v13  ;;  %vm1624_vm6 = vcmp.lt.s32.totalorder %v1603_v48, 3 }
 0x2ce   : > { %v1630_v21 = vsel %vm1622_vm14, %v1609_v59, %v1612_v9  ;;  %v1631_v30 = vsel %vm1625_vm1, %v1618_v11, 920167782  ;;  %v1627_v19 = vsel %vm1625_vm1, %v1615_v27, 2102212464  ;;  %v1634_v47 = vsel %vm1622_vm14, %v1612_v9, %v1615_v27 }
 0x2cf   : > { %v3618_v20 = vadd.s32 4294967294, %v1450_v63  ;;  %v5019_v23 = vsub.s32 %v1546_v6, %v1549_v61  ;;  %v1632_v36 = vsel %vm1624_vm6, %v1615_v27, %v1631_v30  ;;  %v1606_v3 = vshrl.u32 %v6380_v60, %v1605_v29  ;;  %v1273_v30 = vpop.permute.xlu0 %1272 }
 0x2d0   : > { %v1633_v46 = vsel %vm1623_vm2, %v1630_v21, %v1632_v36  ;;  %v1635_v12 = vsel %vm1625_vm1, %v1621_v25, 1326507024  ;;  %v1704_v7 = vadd.s32 1, %v3628_v10  ;;  %v1628_v35 = vsel %vm1624_vm6, %v1612_v9, %v1627_v19 }
 0x2d1   : > { %vm3619_vm5 = vcmp.lt.s32.totalorder %v3618_v20, 0  ;;  %v1552_v2 = vsub.s32 0, %v5019_v23  ;;  %v1636_v31 = vsel %vm1624_vm6, %v1618_v11, %v1635_v12  ;;  %v1626_v6 = vsel %vm1622_vm14, %v1606_v3, %v1609_v59 }
 0x2d2   : > { %v1453_v1 = vsel %vm3619_vm5, 0, %v3618_v20  ;;  %v1637_v38 = vsel %vm1623_vm2, %v1634_v47, %v1636_v31  ;;  %vm1705_vm13 = vcmp.gt.s32.totalorder %v1704_v7, 0  ;;  %v6376_v33 = vand.u32 2147483647, %v4914_v4 }
 0x2d3   : > { %v1458_v40 = vsub.s32 4294967266, %v1453_v1  ;;  %v3621_v22 = vmin.u32 %v1552_v2, %v5019_v23  ;;  %v5031_v28 = vmul.u32.u64.low %v1638_v8, %v1637_v38  ;;  %v5032_v29 = vmul.u32.u64.high %v1638_v8, %v1637_v38, %v5031_v28 }
 0x2d4   : > { %v5034_v50 = vmul.u32.u64.low %v1638_v8, %v1633_v46  ;;  %v5035_v49 = vmul.u32.u64.high %v1638_v8, %v1633_v46, %v5034_v50  ;;  %v1706_v5 = vsel %vm1705_vm13, %v1704_v7, 0  ;;  %v1454_v14 = vsub.s32 32, %v1453_v1 }
 0x2d5   : > { %v1554_v54 = vclz %v3621_v22  ;;  %v1459_v59 = vadd.s32 127, %v1458_v40  ;;  %v1629_v9 = vsel %vm1623_vm2, %v1626_v6, %v1628_v35  ;;  %v1708_v27 = vand.u32 31, %v1706_v5 }
 0x2d6   : > { %vm1647_vm4 = vc.u32 %v5032_v29, %v5034_v50  ;;  %v1438_v53 = vadd.s32 %v4953_v17, %v4950_v32  ;;  %v1648_v63 = vadd.s32 1, %v5035_v49  ;;  %v1645_v11 = vmul.u32 %v1638_v8, %v1629_v9 }
 0x2d7   : > { %v3622_v13 = vadd.s32 4294967294, %v1554_v54  ;;  %v1701_v10 = vand.u32 8388607, %v6376_v33  ;;  %v1460_v25 = vshll.u32 %v1459_v59, 23  ;;  %v1709_v20 = vsub.s32 32, %v1708_v27 }
 0x2d8   : > { %v1456_v61 = vshrl.u32 %v1438_v53, %v1454_v14  ;;  %v1649_v48 = vsel %vm1647_vm4, %v1648_v63, %v5035_v49  ;;  %v1455_v19 = vshll.u32 %v5000_v15, %v1453_v1  ;;  %v5050_v32 = vadd.f32 %v4908_v43, %v1273_v30 }
 0x2d9   : > { %vm3623_vm3 = vcmp.lt.s32.totalorder %v3622_v13, 0  ;;  %v1650_v21 = vadd.s32 %v1649_v48, %v1645_v11  ;;  %v1702_v3 = vor.u32 8388608, %v1701_v10  ;;  %v1461_v8 = vor.u32 4788187, %v1460_v25 }
 0x2da   : > { %v1557_v36 = vsel %vm3623_vm3, 0, %v3622_v13  ;;  %v1457_v17 = vor.u32 %v1456_v61, %v1455_v19  ;;  %v1712_v46 = vshrl.u32 %v6378_v0, %v1709_v20  ;;  %v1715_v12 = vshrl.u32 %v6419_v45, %v1709_v20 }
 0x2db   : > { %v1651_v47 = vadd.s32 536870912, %v1650_v21  ;;  %v1562_v2 = vsub.s32 4294967266, %v1557_v36  ;;  %v1718_v7 = vshrl.u32 %v6393_v24, %v1709_v20  ;;  %v1721_v40 = vshrl.u32 %v6394_v37, %v1709_v20 }
 0x2dc   : > { %v1711_v15 = vshll.u32 %v6380_v60, %v1708_v27  ;;  %v1714_v1 = vshll.u32 %v6378_v0, %v1708_v27  ;;  %v1720_v43 = vshll.u32 %v6393_v24, %v1708_v27  ;;  %v1724_v6 = vshrl.u32 %v6398_v52, %v1709_v20 }
 0x2dd   : > { %v5054_v31 = vshrl.u32 %v1651_v47, 30  ;;  %v1707_v38 = vshrl.u32 %v1706_v5, 5  ;;  %v1717_v22 = vshll.u32 %v6419_v45, %v1708_v27  ;;  %v5065_v28 = vadd.f32 %v4910_v57, %v1273_v30 }
 0x2de   : > { %v1713_v49 = vor.u32 %v1712_v46, %v1711_v15  ;;  %v1716_v54 = vor.u32 %v1715_v12, %v1714_v1  ;;  %v1722_v14 = vor.u32 %v1721_v40, %v1720_v43  ;;  %v1723_v59 = vshll.u32 %v6394_v37, %v1708_v27 }
 0x2df   : > { %v1653_v35 = vshll.u32 %v5054_v31, 30  ;;  %v1542_v9 = vadd.s32 %v4979_v39, %v4985_v26  ;;  %v1563_v13 = vadd.s32 127, %v1562_v2  ;;  %v1719_v63 = vor.u32 %v1718_v7, %v1717_v22 }
 0x2e0   : > { %v1462_v11 = vand.u32 2147483647, %v1461_v8  ;;  %v1464_v10 = vcvt.s32.f32 %v1457_v17  ;;  %v1725_v5 = vor.u32 %v1724_v6, %v1723_v59  ;;  %v1742_v61 = vshll.u32 %v1702_v3, 8 }
 0x2e1   : > { %v5070_v53 = vsub.s32 %v1650_v21, %v1653_v35  ;;  %v1558_v25 = vsub.s32 32, %v1557_v36  ;;  %vm1726_vm7 = vcmp.lt.s32.totalorder %v1707_v38, 1  ;;  %vm1729_vm8 = vcmp.lt.s32.totalorder %v1707_v38, 4 }
 0x2e2   : > { %v1710_v48 = vshrl.u32 %v6380_v60, %v1709_v20  ;;  %vm1728_vm9 = vcmp.lt.s32.totalorder %v1707_v38, 3  ;;  %v1734_v27 = vsel %vm1726_vm7, %v1713_v49, %v1716_v54  ;;  %v1735_v30 = vsel %vm1729_vm8, %v1722_v14, 920167782 }
 0x2e3   : > { %v1656_v57 = vsub.s32 0, %v5070_v53  ;;  %v1564_v39 = vshll.u32 %v1563_v13, 23  ;;  %vm1727_vm10 = vcmp.lt.s32.totalorder %v1707_v38, 2  ;;  %v1731_v26 = vsel %vm1729_vm8, %v1719_v63, 2102212464 }
 0x2e4   : > { %v1736_v21 = vsel %vm1728_vm9, %v1719_v63, %v1735_v30  ;;  %v1738_v3 = vsel %vm1726_vm7, %v1716_v54, %v1719_v63  ;;  %v1739_v17 = vsel %vm1729_vm8, %v1725_v5, 1326507024  ;;  %v1559_v8 = vshll.u32 %v5019_v23, %v1557_v36 }
 0x2e5   : > { %v3625_v19 = vmin.u32 %v1656_v57, %v5070_v53  ;;  %v1737_v47 = vsel %vm1727_vm10, %v1734_v27, %v1736_v21  ;;  %v1560_v46 = vshrl.u32 %v1542_v9, %v1558_v25  ;;  %v1730_v20 = vsel %vm1726_vm7, %v1710_v48, %v1713_v49 }
 0x2e6   : > { %v1740_v12 = vsel %vm1728_vm9, %v1722_v14, %v1739_v17  ;;  %v1732_v2 = vsel %vm1728_vm9, %v1716_v54, %v1731_v26  ;;  %v5081_v40 = vmul.u32.u64.low %v1742_v61, %v1737_v47  ;;  %v5082_v15 = vmul.u32.u64.high %v1742_v61, %v1737_v47, %v5081_v40 }
 0x2e7   : > { %v1741_v7 = vsel %vm1727_vm10, %v1738_v3, %v1740_v12  ;;  %v1465_v1 = vmul.f32 %v1464_v10, %v1462_v11  ;;  %v1565_v43 = vor.u32 4788187, %v1564_v39  ;;  %v1658_v22 = vclz %v3625_v19  ;;  %v5105_v19 = vpop.permute.xlu1 %1277 }
 0x2e8   : > { %v5085_v6 = vmul.u32.u64.low %v1742_v61, %v1741_v7  ;;  %v5086_v35 = vmul.u32.u64.high %v1742_v61, %v1741_v7, %v5085_v6  ;;  %v1801_v59 = vand.u32 2139095040, %v5050_v32  ;;  %v1561_v23 = vor.u32 %v1560_v46, %v1559_v8 }
 0x2e9   : > { %v1733_v36 = vsel %vm1727_vm10, %v1730_v20, %v1732_v2  ;;  %v1905_v49 = vand.u32 2139095040, %v5065_v28  ;;  %v1752_v54 = vadd.s32 1, %v5082_v15  ;;  %v1466_v9 = vxor.u32 2147483648, %v1465_v1 }
 0x2ea   : > { %v1802_v14 = vshrl.u32 %v1801_v59, 23  ;;  %v1468_v13 = vsub.s32 4, %v4990_v51  ;;  %v1566_v63 = vand.u32 2147483647, %v1565_v43  ;;  %v6374_v11 = vand.u32 2147483647, %v5050_v32 }
 0x2eb   : > { %v3626_v10 = vadd.s32 4294967294, %v1658_v22  ;;  %v1749_v5 = vmul.u32 %v1742_v61, %v1733_v36  ;;  %vm1751_vm11 = vc.u32 %v5086_v35, %v5081_v40  ;;  %v1568_v57 = vcvt.s32.f32 %v1561_v23 }
 0x2ec   : > { %v3632_v25 = vadd.s32 4294967169, %v1802_v14  ;;  %v1753_v38 = vsel %vm1751_vm11, %v1752_v54, %v5082_v15  ;;  %v1906_v48 = vshrl.u32 %v1905_v49, 23  ;;  %vm1384_vm12 = vcmp.lt.s32.totalorder %v4893_v18, 0 }
 0x2ed   : > { %v1754_v27 = vadd.s32 %v1753_v38, %v1749_v5  ;;  %v1467_v39 = vsel %vm1384_vm12, %v1466_v9, %v1465_v1  ;;  %v5099_v26 = vsel %vm1384_vm12, %v1468_v13, %v4990_v51  ;;  %v5101_v21 = vmul.f32 %v1568_v57, %v1566_v63 }
 0x2ee   : > { %v1808_v30 = vadd.s32 1, %v3632_v25  ;;  %v1805_v61 = vand.u32 8388607, %v6374_v11  ;;  %vm3627_vm15 = vcmp.lt.s32.totalorder %v3626_v10, 0  ;;  %v3636_v3 = vadd.s32 4294967169, %v1906_v48 }
 0x2ef   : > { %v1755_v47 = vadd.s32 536870912, %v1754_v27  ;;  %vm5109_vm2 = vcmp.le.f32.partialorder %v1382_v62, 0.7853982  ;;  %v5115_v51 = vadd.f32 %v4912_v42, %v5105_v19  ;;  %v5122_v20 = vadd.s32 %v5034_v50, %v5032_v29 }
 0x2f0   : > { %vm1809_vm14 = vcmp.gt.s32.totalorder %v1808_v30, 0  ;;  %v5129_v62 = vsel %vm5109_vm2, %v4893_v18, %v1467_v39  ;;  %v1570_v7 = vxor.u32 2147483648, %v5101_v21  ;;  %v5132_v42 = vsel %vm3627_vm15, 0, %v3626_v10 }
 0x2f1   : > { %v1810_v8 = vsel %vm1809_vm14, %v1808_v30, 0  ;;  %v5124_v12 = vshrl.u32 %v1755_v47, 30  ;;  %v1806_v43 = vor.u32 8388608, %v1805_v61  ;;  %v1912_v29 = vadd.s32 1, %v3636_v3 }
 0x2f2   : > { %v1812_v2 = vand.u32 31, %v1810_v8  ;;  %v1811_v50 = vshrl.u32 %v1810_v8, 5  ;;  %v6375_v38 = vand.u32 2147483647, %v5065_v28  ;;  %vm1488_vm1 = vcmp.lt.s32.totalorder %v4895_v55, 0 }
 0x2f3   : > { %v1757_v1 = vshll.u32 %v5124_v12, 30  ;;  %v1666_v48 = vsub.s32 4294967266, %v5132_v42  ;;  %v1846_v47 = vshll.u32 %v1806_v43, 8  ;;  %vm1913_vm5 = vcmp.gt.s32.totalorder %v1912_v29, 0 }
 0x2f4   : > { %v1813_v6 = vsub.s32 32, %v1812_v2  ;;  %v1815_v22 = vshll.u32 %v6380_v60, %v1812_v2  ;;  %v1818_v59 = vshll.u32 %v6378_v0, %v1812_v2  ;;  %v1821_v23 = vshll.u32 %v6419_v45, %v1812_v2 }
 0x2f5   : > { %v5139_v36 = vsub.s32 %v1754_v27, %v1757_v1  ;;  %v1824_v14 = vshll.u32 %v6393_v24, %v1812_v2  ;;  %v1827_v63 = vshll.u32 %v6394_v37, %v1812_v2  ;;  %vm1830_vm6 = vcmp.lt.s32.totalorder %v1811_v50, 1 }
 0x2f6   : > { %v1816_v49 = vshrl.u32 %v6378_v0, %v1813_v6  ;;  %v1819_v54 = vshrl.u32 %v6419_v45, %v1813_v6  ;;  %v1822_v9 = vshrl.u32 %v6393_v24, %v1813_v6  ;;  %v1825_v13 = vshrl.u32 %v6394_v37, %v1813_v6 }
 0x2f7   : > { %v1828_v10 = vshrl.u32 %v6398_v52, %v1813_v6  ;;  %v1760_v5 = vsub.s32 0, %v5139_v36  ;;  %v1814_v3 = vshrl.u32 %v6380_v60, %v1813_v6  ;;  %vm1831_vm13 = vcmp.lt.s32.totalorder %v1811_v50, 2 }
 0x2f8   : > { %v1817_v25 = vor.u32 %v1816_v49, %v1815_v22  ;;  %v1820_v57 = vor.u32 %v1819_v54, %v1818_v59  ;;  %v1823_v27 = vor.u32 %v1822_v9, %v1821_v23  ;;  %v1826_v30 = vor.u32 %v1825_v13, %v1824_v14 }
 0x2f9   : > { %v1829_v39 = vor.u32 %v1828_v10, %v1827_v63  ;;  %v3629_v61 = vmin.u32 %v1760_v5, %v5139_v36  ;;  %vm1833_vm4 = vcmp.lt.s32.totalorder %v1811_v50, 4  ;;  %vm1832_vm3 = vcmp.lt.s32.totalorder %v1811_v50, 3 }
 0x2fa   : > { %v1838_v8 = vsel %vm1830_vm6, %v1817_v25, %v1820_v57  ;;  %v1835_v1 = vsel %vm1833_vm4, %v1823_v27, 2102212464  ;;  %v1839_v22 = vsel %vm1833_vm4, %v1826_v30, 920167782  ;;  %v1834_v59 = vsel %vm1830_vm6, %v1814_v3, %v1817_v25 }
 0x2fb   : > { %v1762_v2 = vclz %v3629_v61  ;;  %v1840_v49 = vsel %vm1832_vm3, %v1823_v27, %v1839_v22  ;;  %v1842_v54 = vsel %vm1830_vm6, %v1820_v57, %v1823_v27  ;;  %v1843_v23 = vsel %vm1833_vm4, %v1829_v39, 1326507024 }
 0x2fc   : > { %v1836_v9 = vsel %vm1832_vm3, %v1820_v57, %v1835_v1  ;;  %v1841_v13 = vsel %vm1831_vm13, %v1838_v8, %v1840_v49  ;;  %v1844_v63 = vsel %vm1832_vm3, %v1826_v30, %v1843_v23  ;;  %v1667_v43 = vadd.s32 127, %v1666_v48 }
 0x2fd   : > { %v3630_v14 = vadd.s32 4294967294, %v1762_v2  ;;  %v1845_v10 = vsel %vm1831_vm13, %v1842_v54, %v1844_v63  ;;  %v5156_v6 = vmul.u32.u64.low %v1846_v47, %v1841_v13  ;;  %v5157_v5 = vmul.u32.u64.high %v1846_v47, %v1841_v13, %v5156_v6 }
 0x2fe   : > { %v5160_v61 = vmul.u32.u64.low %v1846_v47, %v1845_v10  ;;  %v5161_v11 = vmul.u32.u64.high %v1846_v47, %v1845_v10, %v5160_v61  ;;  %v1914_v25 = vsel %vm1913_vm5, %v1912_v29, 0  ;;  %v1837_v57 = vsel %vm1831_vm13, %v1834_v59, %v1836_v9 }
 0x2ff   : > { %vm3631_vm7 = vcmp.lt.s32.totalorder %v3630_v14, 0  ;;  %v1909_v30 = vand.u32 8388607, %v6375_v38  ;;  %v1916_v48 = vand.u32 31, %v1914_v25  ;;  %v5172_v39 = vsel %vm1488_vm1, %v1570_v7, %v5101_v21 }
 0x300   : > { %v5164_v27 = vsel %vm3631_vm7, 0, %v3630_v14  ;;  %v1662_v3 = vsub.s32 32, %v5132_v42  ;;  %v2009_v2 = vand.u32 2139095040, %v5115_v51  ;;  %v1856_v1 = vadd.s32 1, %v5157_v5 }
 0x301   : > { %v1770_v50 = vsub.s32 4294967266, %v5164_v27  ;;  %v1917_v22 = vsub.s32 32, %v1916_v48  ;;  %v1668_v59 = vshll.u32 %v1667_v43, 23  ;;  %v1750_v49 = vadd.s32 %v5081_v40, %v5086_v35 }
 0x302   : > { %v1853_v21 = vmul.u32 %v1846_v47, %v1837_v57  ;;  %vm1855_vm8 = vc.u32 %v5161_v11, %v5156_v6  ;;  %v1910_v54 = vor.u32 8388608, %v1909_v30  ;;  %v1766_v9 = vsub.s32 32, %v5164_v27 }
 0x303   : > { %v1857_v7 = vsel %vm1855_vm8, %v1856_v1, %v5157_v5  ;;  %v1920_v23 = vshrl.u32 %v6378_v0, %v1917_v22  ;;  %v1923_v14 = vshrl.u32 %v6419_v45, %v1917_v22  ;;  %v1915_v63 = vshrl.u32 %v1914_v25, 5 }
 0x304   : > { %v1858_v13 = vadd.s32 %v1857_v7, %v1853_v21  ;;  %v2010_v10 = vshrl.u32 %v2009_v2, 23  ;;  %v1771_v43 = vadd.s32 127, %v1770_v50  ;;  %v1919_v61 = vshll.u32 %v6380_v60, %v1916_v48 }
 0x305   : > { %v1922_v40 = vshll.u32 %v6378_v0, %v1916_v48  ;;  %v1926_v35 = vshrl.u32 %v6393_v24, %v1917_v22  ;;  %v1925_v5 = vshll.u32 %v6419_v45, %v1916_v48  ;;  %v1928_v57 = vshll.u32 %v6393_v24, %v1916_v48 }
 0x306   : > { %v1859_v47 = vadd.s32 536870912, %v1858_v13  ;;  %v1929_v30 = vshrl.u32 %v6394_v37, %v1917_v22  ;;  %vm5197_vm9 = vcmp.le.f32.partialorder %v1486_v16, 0.7853982  ;;  %v1921_v25 = vor.u32 %v1920_v23, %v1919_v61 }
 0x307   : > { %v1924_v2 = vor.u32 %v1923_v14, %v1922_v40  ;;  %v1931_v50 = vshll.u32 %v6394_v37, %v1916_v48  ;;  %v1932_v21 = vshrl.u32 %v6398_v52, %v1917_v22  ;;  %v1664_v7 = vshrl.u32 %v5122_v20, %v1662_v3 }
 0x308   : > { %v5204_v38 = vshrl.u32 %v1859_v47, 30  ;;  %v1927_v46 = vor.u32 %v1926_v35, %v1925_v5  ;;  %v1930_v33 = vor.u32 %v1929_v30, %v1928_v57  ;;  %v1669_v44 = vor.u32 4788187, %v1668_v59 }
 0x309   : > { %v1933_v0 = vor.u32 %v1932_v21, %v1931_v50  ;;  %v1950_v15 = vshll.u32 %v1910_v54, 8  ;;  %v3640_v8 = vadd.s32 4294967169, %v2010_v10  ;;  %v1772_v16 = vshll.u32 %v1771_v43, 23 }
 0x30a   : > { %v1861_v29 = vshll.u32 %v5204_v38, 30  ;;  %vm1934_vm10 = vcmp.lt.s32.totalorder %v1915_v63, 1  ;;  %vm1937_vm11 = vcmp.lt.s32.totalorder %v1915_v63, 4  ;;  %vm1592_vm12 = vcmp.lt.s32.totalorder %v4901_v41, 0 }
 0x30b   : > { %v1767_v48 = vshll.u32 %v5139_v36, %v5164_v27  ;;  %v1768_v23 = vshrl.u32 %v1750_v49, %v1766_v9  ;;  %v1942_v20 = vsel %vm1934_vm10, %v1921_v25, %v1924_v2  ;;  %v1943_v3 = vsel %vm1937_vm11, %v1930_v33, 920167782 }
 0x30c   : > { %v5211_v14 = vsub.s32 %v1858_v13, %v1861_v29  ;;  %v1918_v59 = vshrl.u32 %v6380_v60, %v1917_v22  ;;  %vm1936_vm15 = vcmp.lt.s32.totalorder %v1915_v63, 3  ;;  %v1939_v54 = vsel %vm1937_vm11, %v1927_v46, 2102212464 }
 0x30d   : > { %vm1935_vm14 = vcmp.lt.s32.totalorder %v1915_v63, 2  ;;  %v1944_v10 = vsel %vm1936_vm15, %v1927_v46, %v1943_v3  ;;  %v1946_v43 = vsel %vm1934_vm10, %v1924_v2, %v1927_v46  ;;  %v1947_v61 = vsel %vm1937_vm11, %v1933_v0, 1326507024 }
 0x30e   : > { %v1773_v40 = vor.u32 4788187, %v1772_v16  ;;  %v1864_v35 = vsub.s32 0, %v5211_v14  ;;  %v1938_v36 = vsel %vm1934_vm10, %v1918_v59, %v1921_v25  ;;  %v1945_v27 = vsel %vm1935_vm14, %v1942_v20, %v1944_v10 }
 0x30f   : > { %v1940_v49 = vsel %vm1936_vm15, %v1924_v2, %v1939_v54  ;;  %v1948_v9 = vsel %vm1936_vm15, %v1930_v33, %v1947_v61  ;;  %v5218_v29 = vmul.u32.u64.low %v1950_v15, %v1945_v27  ;;  %v5219_v13 = vmul.u32.u64.high %v1950_v15, %v1945_v27, %v5218_v29 }
 0x310   : > { %v1574_v22 = vsel %vm5197_vm9, %v4895_v55, %v5172_v39  ;;  %v3633_v0 = vmin.u32 %v1864_v35, %v5211_v14  ;;  %v1949_v46 = vsel %vm1935_vm14, %v1946_v43, %v1948_v9  ;;  %v2016_v47 = vadd.s32 1, %v3640_v8 }
 0x311   : > { %v6424_v5 = vshll.u32 %v5070_v53, %v5132_v42  ;;  %v1769_v30 = vor.u32 %v1768_v23, %v1767_v48  ;;  %v5231_v33 = vmul.u32.u64.low %v1950_v15, %v1949_v46  ;;  %v5232_v25 = vmul.u32.u64.high %v1950_v15, %v1949_v46, %v5231_v33 }
 0x312   : > { %v1670_v2 = vand.u32 2147483647, %v1669_v44  ;;  %v1866_v50 = vclz %v3633_v0  ;;  %v1941_v21 = vsel %vm1935_vm14, %v1938_v36, %v1940_v49  ;;  %vm2017_vm6 = vcmp.gt.s32.totalorder %v2016_v47, 0 }
 0x313   : > { %v1665_v57 = vor.u32 %v1664_v7, %v6424_v5  ;;  %v1774_v16 = vand.u32 2147483647, %v1773_v40  ;;  %v1960_v39 = vadd.s32 1, %v5219_v13  ;;  %v6425_v20 = vand.u32 2147483647, %v5115_v51 }
 0x314   : > { %v2018_v8 = vsel %vm2017_vm6, %v2016_v47, 0  ;;  %3920 = vcosq.f32 %v1574_v22  ;;  %v6426_v53 = vsub.s32 4, %v5054_v31  ;;  %v3634_v44 = vadd.s32 4294967294, %v1866_v50 }
 0x315   : > { %v2013_v3 = vand.u32 8388607, %v6425_v20  ;;  %v2020_v7 = vand.u32 31, %v2018_v8  ;;  %v1672_v63 = vcvt.s32.f32 %v1665_v57  ;;  %v1776_v48 = vcvt.s32.f32 %v1769_v30 }
 0x316   : > { %v5243_v42 = vsel %vm1592_vm12, %v6426_v53, %v5054_v31  ;;  %v1957_v23 = vmul.u32 %v1950_v15, %v1941_v21  ;;  %vm1959_vm5 = vc.u32 %v5232_v25, %v5218_v29  ;;  %3922 = vsinq.f32 %v1574_v22 }
 0x317   : > { %vm3635_vm13 = vcmp.lt.s32.totalorder %v3634_v44, 0  ;;  %v1961_v59 = vsel %vm1959_vm5, %v1960_v39, %v5219_v13  ;;  %v2021_v54 = vsub.s32 32, %v2020_v7  ;;  %v1673_v10 = vmul.f32 %v1672_v63, %v1670_v2 }
 0x318   : > { %v5248_v43 = vmul.f32 %v1776_v48, %v1774_v16  ;;  %v1962_v61 = vadd.s32 %v1961_v59, %v1957_v23  ;;  %v2014_v40 = vor.u32 8388608, %v2013_v3  ;;  %v5250_v31 = vsel %vm3635_vm13, 0, %v3634_v44 }
 0x319   : > { %v5252_v35 = vshrl.u32 %v2018_v8, 5  ;;  %v2029_v36 = vshll.u32 %v6419_v45, %v2020_v7  ;;  %v5257_v15 = vadd.f32 %v4916_v56, %v5105_v19  ;;  %v6427_v49 = vmov 2475754826  }
 0x31a   : > { %v1963_v27 = vadd.s32 536870912, %v1962_v61  ;;  %v2024_v9 = vshrl.u32 %v6427_v49, %v2021_v54  ;;  %v2027_v13 = vshrl.u32 %v6419_v45, %v2021_v54  ;;  %v2030_v22 = vshrl.u32 %v6393_v24, %v2021_v54 }
 0x31b   : > { %v2023_v0 = vshll.u32 %v6380_v60, %v2020_v7  ;;  %v2026_v46 = vshll.u32 %v6427_v49, %v2020_v7  ;;  %v2032_v47 = vshll.u32 %v6393_v24, %v2020_v7  ;;  %v2033_v5 = vshrl.u32 %v6394_v37, %v2021_v54 }
 0x31c   : > { %v1674_v57 = vxor.u32 2147483648, %v1673_v10  ;;  %v1778_v30 = vxor.u32 2147483648, %v5248_v43  ;;  %v5267_v56 = vshrl.u32 %v1963_v27, 30  ;;  %v2031_v19 = vor.u32 %v2030_v22, %v2029_v36 }
 0x31d   : > { %v1874_v33 = vsub.s32 4294967266, %v5250_v31  ;;  %v2025_v2 = vor.u32 %v2024_v9, %v2023_v0  ;;  %v2028_v50 = vor.u32 %v2027_v13, %v2026_v46  ;;  %v2034_v21 = vor.u32 %v2033_v5, %v2032_v47 }
 0x31e   : > { %v6428_v16 = vand.u32 2147483647, %v4901_v41  ;;  %v1965_v20 = vshll.u32 %v5267_v56, 30  ;;  %v2035_v3 = vshll.u32 %v6394_v37, %v2020_v7  ;;  %v2036_v8 = vshrl.u32 %v6398_v52, %v2021_v54  ;;  %v5279_v44 = vpop.eup %3920 }
 0x31f   : > { %v2054_v53 = vshll.u32 %v2014_v40, 8  ;;  %vm1696_vm3 = vcmp.lt.s32.totalorder %v4914_v4, 0  ;;  %v1870_v63 = vsub.s32 32, %v5250_v31  ;;  %v2022_v48 = vshrl.u32 %v6380_v60, %v2021_v54 }
 0x320   : > { %vm5272_vm4 = vcmp.le.f32.partialorder %v6428_v16, 0.7853982  ;;  %vm2041_vm7 = vcmp.lt.s32.totalorder %v5252_v35, 4  ;;  %v2113_v23 = vand.u32 2139095040, %v5257_v15  ;;  %v5286_v59 = vsub.s32 %v1962_v61, %v1965_v20  ;;  %v5291_v40 = vpop.eup %3922 }
 0x321   : > { %v2037_v36 = vor.u32 %v2036_v8, %v2035_v3  ;;  %vm2038_vm8 = vcmp.lt.s32.totalorder %v5252_v35, 1  ;;  %v2043_v7 = vsel %vm2041_vm7, %v2031_v19, 2102212464  ;;  %v1875_v27 = vadd.s32 127, %v1874_v33 }
 0x322   : > { %vm2040_vm10 = vcmp.lt.s32.totalorder %v5252_v35, 3  ;;  %v2046_v9 = vsel %vm2038_vm8, %v2025_v2, %v2028_v50  ;;  %v2047_v54 = vsel %vm2041_vm7, %v2034_v21, 920167782  ;;  %v6431_v13 = vand.u32 2147483647, %v4914_v4 }
 0x323   : > { %v1968_v22 = vsub.s32 0, %v5286_v59  ;;  %vm2039_vm15 = vcmp.lt.s32.totalorder %v5252_v35, 2  ;;  %v2048_v0 = vsel %vm2040_vm10, %v2031_v19, %v2047_v54  ;;  %v2050_v46 = vsel %vm2038_vm8, %v2028_v50, %v2031_v19 }
 0x324   : > { %vm5298_vm11 = vcmp.le.f32.partialorder %v6431_v13, 0.7853982  ;;  %v2042_v47 = vsel %vm2038_vm8, %v2022_v48, %v2025_v2  ;;  %v2044_v5 = vsel %vm2040_vm10, %v2028_v50, %v2043_v7  ;;  %v2049_v33 = vsel %vm2039_vm15, %v2046_v9, %v2048_v0 }
 0x325   : > { %v2051_v16 = vsel %vm2041_vm7, %v2037_v36, 1326507024  ;;  %v3637_v20 = vmin.u32 %v1968_v22, %v5286_v59  ;;  %v5309_v8 = vmul.u32.u64.low %v2054_v53, %v2049_v33  ;;  %v5310_v13 = vmul.u32.u64.high %v2054_v53, %v2049_v33, %v5309_v8 }
 0x326   : > { %v2052_v3 = vsel %vm2040_vm10, %v2034_v21, %v2051_v16  ;;  %v6434_v60 = vsel %vm5109_vm2, 0, %v5099_v26  ;;  %v1675_v19 = vsel %vm1592_vm12, %v1674_v57, %v1673_v10  ;;  %v2114_v50 = vshrl.u32 %v2113_v23, 23 }
 0x327   : > { %v5316_v54 = vadd.s32 3, %v6434_v60  ;;  %v2053_v2 = vsel %vm2039_vm15, %v2050_v46, %v2052_v3  ;;  %v1854_v48 = vadd.s32 %v5156_v6, %v5161_v11  ;;  %v1970_v21 = vclz %v3637_v20 }
 0x328   : > { %v5324_v36 = vmul.u32.u64.low %v2054_v53, %v2053_v2  ;;  %v5325_v7 = vmul.u32.u64.high %v2054_v53, %v2053_v2, %v5324_v36  ;;  %3924 = vcosq.f32 %v5129_v62  ;;  %v1679_v60 = vsel %vm5272_vm4, 0, %v5243_v42 }
 0x329   : > { %v2045_v26 = vsel %vm2039_vm15, %v2042_v47, %v2044_v5  ;;  %v3644_v17 = vadd.s32 4294967169, %v2114_v50  ;;  %v1779_v10 = vsel %vm1696_vm3, %v1778_v30, %v5248_v43  ;;  %v1872_v57 = vshrl.u32 %v1854_v48, %v1870_v63 }
 0x32a   : > { %v1876_v11 = vshll.u32 %v1875_v27, 23  ;;  %v2064_v6 = vadd.s32 1, %v5310_v13  ;;  %v1678_v23 = vsel %vm5272_vm4, %v4901_v41, %v1675_v19  ;;  %v6382_v9 = vand.u32 2147483647, %v5257_v15 }
 0x32b   : > { %v2120_v22 = vadd.s32 1, %v3644_v17  ;;  %v1572_v42 = vsub.s32 4, %v5013_v34  ;;  %v1871_v35 = vshll.u32 %v5211_v14, %v5250_v31  ;;  %v3638_v0 = vadd.s32 4294967294, %v1970_v21 }
 0x32c   : > { %v2061_v46 = vmul.u32 %v2054_v53, %v2045_v26  ;;  %vm2063_vm2 = vc.u32 %v5325_v7, %v5309_v8  ;;  %3926 = vsinq.f32 %v5129_v62  ;;  %v1782_v43 = vsel %vm5298_vm11, %v4914_v4, %v1779_v10 }
 0x32d   : > { %v2065_v30 = vsel %vm2063_vm2, %v2064_v6, %v5310_v13  ;;  %vm2121_vm12 = vcmp.gt.s32.totalorder %v2120_v22, 0  ;;  %3928 = vcosq.f32 %v1678_v23  ;;  %v5350_v39 = vor.u32 %v1872_v57, %v1871_v35 }
 0x32e   : > { %v5352_v63 = vor.u32 4788187, %v1876_v11  ;;  %v2066_v27 = vadd.s32 %v2065_v30, %v2061_v46  ;;  %3930 = vsinq.f32 %v1678_v23  ;;  %v5354_v14 = vadd.s32 3, %v1679_v60 }
 0x32f   : > { %v2117_v31 = vand.u32 8388607, %v6382_v9  ;;  %v2122_v62 = vsel %vm2121_vm12, %v2120_v22, 0  ;;  %3932 = vcosq.f32 %v1782_v43  ;;  %vm3639_vm14 = vcmp.lt.s32.totalorder %v3638_v0, 0 }
 0x330   : > { %v2067_v53 = vadd.s32 536870912, %v2066_v27  ;;  %v1573_v47 = vsel %vm1488_vm1, %v1572_v42, %v5013_v34  ;;  %3934 = vsinq.f32 %v1782_v43  ;;  %v5363_v5 = vadd.s32 %v5218_v29, %v5232_v25 }
 0x331   : > { %v2124_v33 = vand.u32 31, %v2122_v62  ;;  %v5373_v50 = vsel %vm3639_vm14, 0, %v3638_v0  ;;  %v2118_v34 = vor.u32 8388608, %v2117_v31  ;;  %v1575_v29 = vsel %vm5197_vm9, 0, %v1573_v47 }
 0x332   : > { %v5368_v13 = vshrl.u32 %v2067_v53, 30  ;;  %v5371_v2 = vpop.eup %3924  ;;  %v5378_v25 = vadd.s32 %v5309_v8, %v5325_v7  ;;  %v6435_v36 = vmov 683565275   ;;  %v1780_v26 = vsub.s32 4, %v5124_v12 }
 0x333   : > { %v2125_v48 = vsub.s32 32, %v2124_v33  ;;  %v2127_v60 = vshll.u32 %v6435_v36, %v2124_v33  ;;  %v2130_v10 = vshll.u32 %v6427_v49, %v2124_v33  ;;  %v1978_v1 = vsub.s32 4294967266, %v5373_v50 }
 0x334   : > { %v2069_v21 = vshll.u32 %v5368_v13, 30  ;;  %v2123_v8 = vshrl.u32 %v2122_v62, 5  ;;  %v2133_v7 = vshll.u32 %v6419_v45, %v2124_v33  ;;  %v1974_v22 = vsub.s32 32, %v5373_v50 }
 0x335   : > { %v2128_v17 = vshrl.u32 %v6427_v49, %v2125_v48  ;;  %v2131_v57 = vshrl.u32 %v6419_v45, %v2125_v48  ;;  %v2134_v11 = vshrl.u32 %v6393_v24, %v2125_v48  ;;  %v5394_v0 = vshll.u32 %v2118_v34, 8 }
 0x336   : > { %v5388_v6 = vsub.s32 %v2066_v27, %v2069_v21  ;;  %v5391_v23 = vpop.eup %3926  ;;  %v2136_v31 = vshll.u32 %v6393_v24, %v2124_v33  ;;  %v2137_v27 = vshrl.u32 %v6394_v37, %v2125_v48  ;;  %v2139_v53 = vshll.u32 %v6394_v37, %v2124_v33 }
 0x337   : > { %v2129_v42 = vor.u32 %v2128_v17, %v2127_v60  ;;  %v2132_v35 = vor.u32 %v2131_v57, %v2130_v10  ;;  %v5396_v46 = vpop.eup %3928  ;;  %v2135_v30 = vor.u32 %v2134_v11, %v2133_v7  ;;  %v2140_v47 = vshrl.u32 %v6398_v52, %v2125_v48 }
 0x338   : > { %v2072_v43 = vsub.s32 0, %v5388_v6  ;;  %v5401_v62 = vpop.eup %3930  ;;  %v1579_v21 = vadd.s32 3, %v1575_v29  ;;  %v1781_v34 = vsel %vm1696_vm3, %v1780_v26, %v5124_v12  ;;  %v1979_v17 = vadd.s32 127, %v1978_v1 }
 0x339   : > { %v5408_v60 = vpop.eup %3932  ;;  %v2138_v57 = vor.u32 %v2137_v27, %v2136_v31  ;;  %vm2142_vm1 = vcmp.lt.s32.totalorder %v2123_v8, 1  ;;  %v2126_v7 = vshrl.u32 %v6435_v36, %v2125_v48  ;;  %v2141_v9 = vor.u32 %v2140_v47, %v2139_v53 }
 0x33a   : > { %v3641_v10 = vmin.u32 %v2072_v43, %v5388_v6  ;;  %v3935_v11 = vpop.eup %3934  ;;  %vm2145_vm9 = vcmp.lt.s32.totalorder %v2123_v8, 4  ;;  %v2150_v33 = vsel %vm2142_vm1, %v2129_v42, %v2132_v35  ;;  %vm2144_vm6 = vcmp.lt.s32.totalorder %v2123_v8, 3 }
 0x33b   : > { %v2147_v29 = vsel %vm2145_vm9, %v2135_v30, 2102212464  ;;  %v2151_v20 = vsel %vm2145_vm9, %v2138_v57, 920167782  ;;  %vm2143_vm5 = vcmp.lt.s32.totalorder %v2123_v8, 2  ;;  %v2154_v12 = vsel %vm2142_vm1, %v2132_v35, %v2135_v30 }
 0x33c   : > { %v2074_v3 = vclz %v3641_v10  ;;  %v2152_v19 = vsel %vm2144_vm6, %v2135_v30, %v2151_v20  ;;  %v1580_v26 = vand.u32 3, %v1579_v21  ;;  %v2146_v1 = vsel %vm2142_vm1, %v2126_v7, %v2129_v42 }
 0x33d   : > { %v2153_v43 = vsel %vm2143_vm5, %v2150_v33, %v2152_v19  ;;  %v2155_v31 = vsel %vm2145_vm9, %v2141_v9, 1326507024  ;;  %v2148_v27 = vsel %vm2144_vm6, %v2132_v35, %v2147_v29  ;;  %v1975_v47 = vshll.u32 %v5286_v59, %v5373_v50 }
 0x33e   : > { %v3642_v16 = vadd.s32 4294967294, %v2074_v3  ;;  %v2156_v52 = vsel %vm2144_vm6, %v2138_v57, %v2155_v31  ;;  %v5414_v48 = vmul.u32.u64.low %v5394_v0, %v2153_v43  ;;  %v5415_v53 = vmul.u32.u64.high %v5394_v0, %v2153_v43, %v5414_v48 }
 0x33f   : > { %v2157_v20 = vsel %vm2143_vm5, %v2154_v12, %v2156_v52  ;;  %v1783_v3 = vsel %vm5298_vm11, 0, %v1781_v34  ;;  %v1976_v42 = vshrl.u32 %v5363_v5, %v1974_v22  ;;  %vm1578_vm4 = vweird.f32 %v4895_v55 }
 0x340   : > { %vm3643_vm13 = vcmp.lt.s32.totalorder %v3642_v16, 0  ;;  %v5425_v9 = vmul.u32.u64.low %v5394_v0, %v2157_v20  ;;  %v5426_v35 = vmul.u32.u64.high %v5394_v0, %v2157_v20, %v5425_v9  ;;  %vm1786_vm3 = vweird.f32 %v4914_v4 }
 0x341   : > { %v2077_v19 = vsel %vm3643_vm13, 0, %v3642_v16  ;;  %v1980_v30 = vshll.u32 %v1979_v17, 23  ;;  %v2149_v59 = vsel %vm2143_vm5, %v2146_v1, %v2148_v27  ;;  %v1791_v50 = vxor.u32 2147483648, %v3935_v11 }
 0x342   : > { %v2082_v21 = vsub.s32 4294967266, %v2077_v19  ;;  %v2168_v52 = vadd.s32 1, %v5415_v53  ;;  %vm1582_vm7 = vcmp.eq.s32.totalorder %v1580_v26, 0  ;;  %vm1585_vm8 = vcmp.eq.s32.totalorder %v1580_v26, 2 }
 0x343   : > { %v1787_v61 = vadd.s32 3, %v1783_v3  ;;  %v6436_v16 = vxor.u32 2147483648, %v5291_v40  ;;  %v6437_v34 = vxor.u32 2147483648, %v5279_v44  ;;  %v1794_v17 = vxor.u32 2147483648, %v5408_v60 }
 0x344   : > { %v2083_v5 = vadd.s32 127, %v2082_v21  ;;  %v1977_v57 = vor.u32 %v1976_v42, %v1975_v47  ;;  %v2165_v8 = vmul.u32 %v5394_v0, %v2149_v59  ;;  %vm2167_vm10 = vc.u32 %v5426_v35, %v5414_v48 }
 0x345   : > { %v1584_v22 = vsel %vm1582_vm7, %v5279_v44, %v6436_v16  ;;  %v1587_v10 = vsel %vm1585_vm8, %v6437_v34, %v5291_v40  ;;  %v1788_v7 = vand.u32 3, %v1787_v61  ;;  %v1981_v33 = vor.u32 4788187, %v1980_v30 }
 0x346   : > { %v2078_v29 = vsub.s32 32, %v2077_v19  ;;  %v2169_v12 = vsel %vm2167_vm10, %v2168_v52, %v5415_v53  ;;  %vm1581_vm11 = vcmp.lt.s32.totalorder %v1580_v26, 2  ;;  %v2084_v44 = vshll.u32 %v2083_v5, 23 }
 0x347   : > { %v2170_v1 = vadd.s32 %v2169_v12, %v2165_v8  ;;  %v1588_v43 = vsel %vm1581_vm11, %v1584_v22, %v1587_v10  ;;  %vm1790_vm15 = vcmp.eq.s32.totalorder %v1788_v7, 0  ;;  %vm1793_vm2 = vcmp.eq.s32.totalorder %v1788_v7, 2 }
 0x348   : > { %vm1789_vm12 = vcmp.lt.s32.totalorder %v1788_v7, 2  ;;  %v1792_v40 = vsel %vm1790_vm15, %v5408_v60, %v1791_v50  ;;  %v1795_v31 = vsel %vm1793_vm2, %v1794_v17, %v3935_v11  ;;  %v1476_v47 = vand.u32 3, %v5316_v54 }
 0x349   : > { %v2171_v27 = vadd.s32 536870912, %v2170_v1  ;;  %v1796_v0 = vsel %vm1789_vm12, %v1792_v40, %v1795_v31  ;;  %v1479_v20 = vxor.u32 2147483648, %v5391_v23  ;;  %v2080_v3 = vshrl.u32 %v5378_v25, %v2078_v29 }
 0x34a   : > { %v1589_v26 = vsel %vm1578_vm4, nan, %v1588_v43  ;;  %v1797_v53 = vsel %vm1786_vm3, nan, %v1796_v0  ;;  %v1482_v42 = vxor.u32 2147483648, %v5371_v2  ;;  %v2079_v9 = vshll.u32 %v5388_v6, %v2077_v19 }
 0x34b   : > { %v5453_v60 = vshrl.u32 %v2171_v27, 30  ;;  %v3715_v11 = vpack.c.bf16 %v1797_v53, %v1589_v26  ;;  %vm1478_vm14 = vcmp.eq.s32.totalorder %v1476_v47, 0  ;;  %v2085_v30 = vor.u32 4788187, %v2084_v44 }
 0x34c   : > { %v1480_v54 = vsel %vm1478_vm14, %v5371_v2, %v1479_v20  ;;  %vm1481_vm1 = vcmp.eq.s32.totalorder %v1476_v47, 2  ;;  %v1684_v25 = vand.u32 3, %v5354_v14  ;;  %v1687_v21 = vxor.u32 2147483648, %v5401_v62 }
 0x34d   : > { %v2173_v55 = vshll.u32 %v5453_v60, 30  ;;  %3716 = vmatprep.subr.bf16.mxu0 %v3715_v11  ;;  %v1483_v4 = vsel %vm1481_vm1, %v1482_v42, %v5391_v23  ;;  %v1690_v59 = vxor.u32 2147483648, %v5396_v46  ;;  %v1982_v6 = vand.u32 2147483647, %v1981_v33 }
 0x34e   : > { %v2081_v19 = vor.u32 %v2080_v3, %v2079_v9  ;;  %vm1477_vm9 = vcmp.lt.s32.totalorder %v1476_v47, 2  ;;  %vm1686_vm6 = vcmp.eq.s32.totalorder %v1684_v25, 0  ;;  %vm1689_vm5 = vcmp.eq.s32.totalorder %v1684_v25, 2 }
 0x34f   : > { %v2174_v50 = vsub.s32 %v2170_v1, %v2173_v55  ;;  %v1484_v52 = vsel %vm1477_vm9, %v1480_v54, %v1483_v4  ;;  %v1688_v2 = vsel %vm1686_vm6, %v5396_v46, %v1687_v21  ;;  %v1984_v61 = vcvt.s32.f32 %v1977_v57 }
 0x350   : > { %v2086_v14 = vand.u32 2147483647, %v2085_v30  ;;  %vm1685_vm13 = vcmp.lt.s32.totalorder %v1684_v25, 2  ;;  %v1691_v5 = vsel %vm1689_vm5, %v1690_v59, %v5401_v62  ;;  %vm1474_vm4 = vweird.f32 %v4893_v18 }
 0x351   : > { %v2176_v16 = vsub.s32 0, %v2174_v50  ;;  %vm1682_vm3 = vweird.f32 %v4901_v41  ;;  %v1692_v23 = vsel %vm1685_vm13, %v1688_v2, %v1691_v5  ;;  %v6438_v22 = vand.u32 2147483647, %v5352_v63 }
 0x352   : > { %v6439_v34 = vcvt.s32.f32 %v5350_v39  ;;  %v2088_v17 = vcvt.s32.f32 %v2081_v19  ;;  %v1485_v8 = vsel %vm1474_vm4, nan, %v1484_v52  ;;  %v1693_v46 = vsel %vm1682_vm3, nan, %v1692_v23 }
 0x353   : > { %v1985_v7 = vmul.f32 %v1984_v61, %v1982_v6  ;;  %v3645_v57 = vmin.u32 %v2176_v16, %v2174_v50  ;;  %v3717_v33 = vpack.c.bf16 %v1693_v46, %v1485_v8  ;;  %vm1800_vm7 = vcmp.lt.s32.totalorder %v5050_v32, 0 }
 0x354   : > { %v1881_v10 = vmul.f32 %v6439_v34, %v6438_v22  ;;  %v2089_v29 = vmul.f32 %v2088_v17, %v2086_v14  ;;  %vm1904_vm10 = vcmp.lt.s32.totalorder %v5065_v28, 0  ;;  %vm2008_vm11 = vcmp.lt.s32.totalorder %v5115_v51, 0 }
 0x355   : > { %v2178_v12 = vclz %v3645_v57  ;;  %3718 = vmatpush1.bf16.msra.mxu0 %v3717_v33  ;;  %v1986_v1 = vxor.u32 2147483648, %v1985_v7  ;;  %v2166_v44 = vadd.s32 %v5414_v48, %v5426_v35  ;;  %v6440_v27 = vand.u32 2147483647, %v5050_v32 }
 0x356   : > { %v1882_v62 = vxor.u32 2147483648, %v1881_v10  ;;  %v2090_v43 = vxor.u32 2147483648, %v2089_v29  ;;  %v6443_v47 = vand.u32 2147483647, %v5065_v28  ;;  %v6446_v9 = vand.u32 2147483647, %v5115_v51 }
 0x357   : > { %v3646_v18 = vadd.s32 4294967294, %v2178_v12  ;;  %v1987_v63 = vsel %vm1904_vm10, %v1986_v1, %v1985_v7  ;;  %vm5480_vm15 = vcmp.le.f32.partialorder %v6440_v27, 0.7853982  ;;  %v2092_v55 = vsub.s32 4, %v5368_v13 }
 0x358   : > { %v1883_v41 = vsel %vm1800_vm7, %v1882_v62, %v1881_v10  ;;  %vm5486_vm2 = vcmp.le.f32.partialorder %v6443_v47, 0.7853982  ;;  %v2091_v3 = vsel %vm2008_vm11, %v2090_v43, %v2089_v29  ;;  %vm5500_vm12 = vcmp.le.f32.partialorder %v6446_v9, 0.7853982 }
 0x359   : > { %vm3647_vm8 = vcmp.lt.s32.totalorder %v3646_v18, 0  ;;  %v1886_v48 = vsel %vm5480_vm15, %v5050_v32, %v1883_v41  ;;  %v1990_v42 = vsel %vm5486_vm2, %v5065_v28, %v1987_v63  ;;  %v2094_v30 = vsel %vm5500_vm12, %v5115_v51, %v2091_v3 }
 0x35a   : > { %v2181_v39 = vsel %vm3647_vm8, 0, %v3646_v18  ;;  %3936 = vcosq.f32 %v1886_v48  ;;  %v1988_v21 = vsub.s32 4, %v5267_v56  ;;  %v1884_v59 = vsub.s32 4, %v5204_v38 }
 0x35b   : > { %v2182_v40 = vsub.s32 32, %v2181_v39  ;;  %v2186_v31 = vsub.s32 4294967266, %v2181_v39  ;;  %v2183_v35 = vshll.u32 %v2174_v50, %v2181_v39  ;;  %3938 = vcosq.f32 %v1990_v42 }
 0x35c   : > { %3940 = vcosq.f32 %v2094_v30  ;;  %v2093_v50 = vsel %vm2008_vm11, %v2092_v55, %v5368_v13  ;;  %v2196_v2 = vsub.s32 4, %v5453_v60  ;;  %v1989_v61 = vsel %vm1904_vm10, %v1988_v21, %v5267_v56 }
 0x35d   : > { %v2184_v26 = vshrl.u32 %v2166_v44, %v2182_v40  ;;  %v2187_v53 = vadd.s32 127, %v2186_v31  ;;  %3942 = vsinq.f32 %v2094_v30  ;;  %v1885_v14 = vsel %vm1800_vm7, %v1884_v59, %v5204_v38 }
 0x35e   : > { %3944 = vsinq.f32 %v1990_v42  ;;  %v2095_v16 = vsel %vm5500_vm12, 0, %v2093_v50  ;;  %vm2112_vm14 = vcmp.lt.s32.totalorder %v5257_v15, 0  ;;  %v6449_v23 = vand.u32 2147483647, %v5257_v15 }
 0x35f   : > { %v2185_v54 = vor.u32 %v2184_v26, %v2183_v35  ;;  %v2188_v25 = vshll.u32 %v2187_v53, 23  ;;  %3946 = vsinq.f32 %v1886_v48  ;;  %v1991_v56 = vsel %vm5486_vm2, 0, %v1989_v61  ;;  %v3648_v61 = vld [vmem:[%s6353_s3 + $0x20] sm:$0xff] }
 0x360   : > { %vm5525_vm1 = vcmp.le.f32.partialorder %v6449_v23, 0.7853982  ;;  %v2197_v34 = vsel %vm2112_vm14, %v2196_v2, %v5453_v60  ;;  %v1887_v38 = vsel %vm5480_vm15, 0, %v1885_v14  ;;  %v2099_v46 = vadd.s32 3, %v2095_v16 }
 0x361   : > { %v2189_v4 = vor.u32 4788187, %v2188_v25  ;;  %v2192_v19 = vcvt.s32.f32 %v2185_v54  ;;  %v1995_v57 = vadd.s32 3, %v1991_v56  ;;  %v2199_v33 = vsel %vm5525_vm1, 0, %v2197_v34  ;;  %v2232_v56 = vpop.permute.xlu1 %2231 }
 0x362   : > { %v1891_v12 = vadd.s32 3, %v1887_v38  ;;  %v2203_v1 = vadd.s32 3, %v2199_v33  ;;  %v2100_v18 = vand.u32 3, %v2099_v46  ;;  %vm2098_vm12 = vweird.f32 %v5115_v51  ;;  %v3651_v51 = vld [vmem:[%s6353_s3 + $0x38] sm:$0xff] }
 0x363   : > { %v2190_v6 = vand.u32 2147483647, %v2189_v4  ;;  %v1996_v43 = vand.u32 3, %v1995_v57 }
 0x364   : > { %v3937_v10 = vpop.eup %3936  ;;  %v1892_v40 = vand.u32 3, %v1891_v12  ;;  %v2204_v0 = vand.u32 3, %v2203_v1  ;;  %vm2102_vm9 = vcmp.eq.s32.totalorder %v2100_v18, 0  ;;  %vm2105_vm6 = vcmp.eq.s32.totalorder %v2100_v18, 2 }
 0x365   : > { %v2193_v52 = vmul.f32 %v2192_v19, %v2190_v6  ;;  %v3939_v8 = vpop.eup %3938  ;;  %v1898_v27 = vxor.u32 2147483648, %v3937_v10  ;;  %vm1998_vm5 = vcmp.eq.s32.totalorder %v1996_v43, 0  ;;  %vm2001_vm13 = vcmp.eq.s32.totalorder %v1996_v43, 2 }
 0x366   : > { %v3941_v7 = vpop.eup %3940  ;;  %v2002_v44 = vxor.u32 2147483648, %v3939_v8  ;;  %vm1894_vm4 = vcmp.eq.s32.totalorder %v1892_v40, 0  ;;  %vm1897_vm3 = vcmp.eq.s32.totalorder %v1892_v40, 2  ;;  %vm2101_vm7 = vcmp.lt.s32.totalorder %v2100_v18, 2 }
 0x367   : > { %v2194_v5 = vxor.u32 2147483648, %v2193_v52  ;;  %v3943_v29 = vpop.eup %3942  ;;  %v2106_v39 = vxor.u32 2147483648, %v3941_v7  ;;  %vm1997_vm8 = vcmp.lt.s32.totalorder %v1996_v43, 2  ;;  %vm2209_vm10 = vcmp.eq.s32.totalorder %v2204_v0, 2 }
 0x368   : > { %v3945_v60 = vpop.eup %3944  ;;  %v2103_v41 = vxor.u32 2147483648, %v3943_v29  ;;  %vm2206_vm11 = vcmp.eq.s32.totalorder %v2204_v0, 0  ;;  %vm1893_vm15 = vcmp.lt.s32.totalorder %v1892_v40, 2  ;;  %vm2205_vm2 = vcmp.lt.s32.totalorder %v2204_v0, 2 }
 0x369   : > { %v2195_v22 = vsel %vm2112_vm14, %v2194_v5, %v2193_v52  ;;  %v3947_v62 = vpop.eup %3946  ;;  %v1999_v63 = vxor.u32 2147483648, %v3945_v60  ;;  %v2107_v20 = vsel %vm2105_vm6, %v2106_v39, %v3943_v29  ;;  %v2003_v35 = vsel %vm2001_vm13, %v2002_v44, %v3945_v60 }
 0x36a   : > { %v2198_v17 = vsel %vm5525_vm1, %v5257_v15, %v2195_v22  ;;  %v1895_v31 = vxor.u32 2147483648, %v3947_v62  ;;  %v2104_v47 = vsel %vm2102_vm9, %v3941_v7, %v2103_v41  ;;  %v1899_v9 = vsel %vm1897_vm3, %v1898_v27, %v3947_v62 }
 0x36b   : > { %3948 = vcosq.f32 %v2198_v17  ;;  %v2000_v48 = vsel %vm1998_vm5, %v3939_v8, %v1999_v63  ;;  %v2108_v30 = vsel %vm2101_vm7, %v2104_v47, %v2107_v20  ;;  %vm1994_vm14 = vweird.f32 %v5065_v28  ;;  %v3649_v28 = vld [vmem:[%s6353_s3 + $0x28] sm:$0xff] }
 0x36c   : > { %3950 = vsinq.f32 %v2198_v17  ;;  %v1896_v42 = vsel %vm1894_vm4, %v3937_v10, %v1895_v31  ;;  %v2004_v54 = vsel %vm1997_vm8, %v2000_v48, %v2003_v35  ;;  %vm2202_vm1 = vweird.f32 %v5257_v15  ;;  %v2227_v15 = vpop.permute.xlu0 %2226 }
 0x36d   : > { %v1900_v4 = vsel %vm1893_vm15, %v1896_v42, %v1899_v9  ;;  %v2109_v59 = vsel %vm2098_vm12, nan, %v2108_v30  ;;  %v2005_v6 = vsel %vm1994_vm14, nan, %v2004_v54  ;;  %vm1890_vm9 = vweird.f32 %v5050_v32  ;;  %v3650_v32 = vld [vmem:[%s6353_s3 + $0x30] sm:$0xff] }
 0x36e   : > { %v1901_v52 = vsel %vm1890_vm9, nan, %v1900_v4 }
 0x36f   : > { %v3721_v2 = vpack.c.bf16 %v2109_v59, %v1901_v52 }
 0x375   : > { %v3949_v3 = vpop.eup %3948 }
 0x376   : > { %v3951_v26 = vpop.eup %3950  ;;  %v2210_v53 = vxor.u32 2147483648, %v3949_v3 }
 0x377   : > { %v2207_v11 = vxor.u32 2147483648, %v3951_v26 }
 0x378   : > { %v2211_v25 = vsel %vm2209_vm10, %v2210_v53, %v3951_v26 }
 0x379   : > { %v2208_v55 = vsel %vm2206_vm11, %v3949_v3, %v2207_v11 }
 0x37a   : > { %v2212_v21 = vsel %vm2205_vm2, %v2208_v55, %v2211_v25 }
 0x37b   : > { %v2213_v19 = vsel %vm2202_vm1, nan, %v2212_v21 }
 0x37c   : > { %v3719_v50 = vpack.c.bf16 %v2213_v19, %v2005_v6 }
 0x37e   : > { %3720 = vmatprep.subr.bf16.mxu0 %v3719_v50  ;;  %v6452_v50 = vmov 1326507024  }
 0x37f   : > { %3722 = vmatpush1.bf16.msra.mxu0 %v3721_v2 }
 0x382   : > { %3656 = vmatmul.mubr.msk.f32.vlgmr.msra.gmra.mrb[4].mxu0 %vm1280_vm0, %v3648_v61 }
 0x383   : > { %2326 = vmatprep.mubr.f32.mxu0 %v6418_v58 }
 0x386   : > { %3657 = vmatmul.mubr.msk.f32.gmra.mrb[6].mxu0 %vm1280_vm0, %v3649_v28 }
 0x387   : > { %2332 = vmatprep.mubr.f32.mxu0 %v6418_v58 }
 0x38a   : > { %3658 = vmatmul.mubr.msk.f32.gmra.mrb[8].mxu0 %vm1280_vm0, %v3650_v32 }
 0x38b   : > { %2338 = vmatprep.mubr.f32.mxu0 %v6418_v58 }
 0x38e   : > { %3659 = vmatmul.mubr.msk.f32.gmra.mrb[10].mxu0 %vm1280_vm0, %v3651_v51 }
 0x455   : > { %v2322_v14 = vpop.f32.mrb[4].mxu0 }
 0x456   : > { %v5562_v5 = vadd.f32 %v2322_v14, %v2227_v15  ;;  %v2324_v16 = vpop.f32.mrb[5].mxu0 }
 0x457   : > { %v5564_v23 = vadd.f32 %v2324_v16, %v2227_v15 }
 0x458   : > { %v2345_v13 = vand.u32 2147483647, %v5562_v5  ;;  %v2348_v22 = vand.u32 2139095040, %v5562_v5 }
 0x459   : > { %v2449_v58 = vand.u32 2147483647, %v5564_v23  ;;  %v2452_v34 = vand.u32 2139095040, %v5564_v23  ;;  %v2328_v10 = vpop.f32.mrb[6].mxu0 }
 0x45a   : > { %v2349_v38 = vshrl.u32 %v2348_v22, 23  ;;  %v5570_v17 = vadd.f32 %v2328_v10, %v2232_v56  ;;  %v2330_v8 = vpop.f32.mrb[7].mxu0  ;;  %v2352_v46 = vand.u32 8388607, %v2345_v13 }
 0x45b   : > { %v2453_v7 = vshrl.u32 %v2452_v34, 23  ;;  %v2456_v57 = vand.u32 8388607, %v2449_v58  ;;  %v5583_v47 = vadd.f32 %v2330_v8, %v2232_v56 }
 0x45c   : > { %v3660_v33 = vadd.s32 4294967169, %v2349_v38  ;;  %v2556_v12 = vand.u32 2139095040, %v5570_v17  ;;  %v2353_v1 = vor.u32 8388608, %v2352_v46  ;;  %v6387_v26 = vand.u32 2147483647, %v5570_v17 }
 0x45d   : > { %v3664_v29 = vadd.s32 4294967169, %v2453_v7  ;;  %v5577_v60 = vpop.f32.mrb[8].mxu0  ;;  %v2457_v18 = vor.u32 8388608, %v2456_v57 }
 0x45e   : > { %v2355_v62 = vadd.s32 1, %v3660_v33  ;;  %v2557_v41 = vshrl.u32 %v2556_v12, 23  ;;  %v5579_v39 = vpop.f32.mrb[9].mxu0  ;;  %v5587_v3 = vshll.u32 %v2353_v1, 8 }
 0x45f   : > { %v2459_v43 = vadd.s32 1, %v3664_v29  ;;  %v5591_v35 = vshll.u32 %v2457_v18, 8 }
 0x460   : > { %vm2356_vm6 = vcmp.gt.s32.totalorder %v2355_v62, 0  ;;  %v3668_v44 = vadd.s32 4294967169, %v2557_v41 }
 0x461   : > { %v2357_v63 = vsel %vm2356_vm6, %v2355_v62, 0  ;;  %vm2460_vm5 = vcmp.gt.s32.totalorder %v2459_v43, 0  ;;  %v5581_v40 = vpop.f32.mrb[10].mxu0 }
 0x462   : > { %v2358_v31 = vshrl.u32 %v2357_v63, 5  ;;  %v2359_v27 = vand.u32 31, %v2357_v63  ;;  %v2461_v0 = vsel %vm2460_vm5, %v2459_v43, 0  ;;  %v5585_v20 = vpop.f32.mrb[11].mxu0  ;;  %v5595_v11 = vadd.s32 1, %v3668_v44 }
 0x463   : > { %v5589_v48 = vshrl.u32 %v2461_v0, 5  ;;  %v2463_v9 = vand.u32 31, %v2461_v0 }
 0x464   : > { %v2360_v53 = vsub.s32 32, %v2359_v27  ;;  %v2362_v42 = vshll.u32 %v6435_v36, %v2359_v27  ;;  %v2365_v30 = vshll.u32 %v6427_v49, %v2359_v27  ;;  %v2368_v54 = vshll.u32 %v6419_v45, %v2359_v27 }
 0x465   : > { %v2371_v25 = vshll.u32 %v6393_v24, %v2359_v27  ;;  %v2374_v55 = vshll.u32 %v6394_v37, %v2359_v27  ;;  %vm2377_vm13 = vcmp.lt.s32.totalorder %v2358_v31, 1  ;;  %vm2378_vm4 = vcmp.lt.s32.totalorder %v2358_v31, 2 }
 0x466   : > { %v2363_v4 = vshrl.u32 %v6427_v49, %v2360_v53  ;;  %v2366_v21 = vshrl.u32 %v6419_v45, %v2360_v53  ;;  %v2369_v59 = vshrl.u32 %v6393_v24, %v2360_v53  ;;  %v2361_v6 = vshrl.u32 %v6435_v36, %v2360_v53 }
 0x467   : > { %v2372_v19 = vshrl.u32 %v6394_v37, %v2360_v53  ;;  %v2375_v52 = vshrl.u32 %v6452_v50, %v2360_v53  ;;  %v2464_v32 = vsub.s32 32, %v2463_v9  ;;  %vm2379_vm3 = vcmp.lt.s32.totalorder %v2358_v31, 3 }
 0x468   : > { %v2364_v2 = vor.u32 %v2363_v4, %v2362_v42  ;;  %v2367_v61 = vor.u32 %v2366_v21, %v2365_v30  ;;  %v2370_v28 = vor.u32 %v2369_v59, %v2368_v54  ;;  %vm2380_vm7 = vcmp.lt.s32.totalorder %v2358_v31, 4 }
 0x469   : > { %v2373_v51 = vor.u32 %v2372_v19, %v2371_v25  ;;  %v2376_v15 = vor.u32 %v2375_v52, %v2374_v55  ;;  %v2466_v8 = vshll.u32 %v6435_v36, %v2463_v9  ;;  %v2467_v57 = vshrl.u32 %v6427_v49, %v2464_v32 }
 0x46a   : > { %v2381_v14 = vsel %vm2377_vm13, %v2361_v6, %v2364_v2  ;;  %v2382_v16 = vsel %vm2380_vm7, %v2370_v28, 2102212464  ;;  %v2385_v22 = vsel %vm2377_vm13, %v2364_v2, %v2367_v61  ;;  %v2389_v56 = vsel %vm2377_vm13, %v2367_v61, %v2370_v28 }
 0x46b   : > { %v2383_v34 = vsel %vm2379_vm3, %v2367_v61, %v2382_v16  ;;  %v2386_v10 = vsel %vm2380_vm7, %v2373_v51, 920167782  ;;  %v2390_v38 = vsel %vm2380_vm7, %v2376_v15, 1326507024  ;;  %v2469_v33 = vshll.u32 %v6427_v49, %v2463_v9 }
 0x46c   : > { %v2387_v46 = vsel %vm2379_vm3, %v2370_v28, %v2386_v10  ;;  %v2391_v7 = vsel %vm2379_vm3, %v2373_v51, %v2390_v38  ;;  %v2384_v29 = vsel %vm2378_vm4, %v2381_v14, %v2383_v34  ;;  %v2470_v1 = vshrl.u32 %v6419_v45, %v2464_v32 }
 0x46d   : > { %v2388_v12 = vsel %vm2378_vm4, %v2385_v22, %v2387_v46  ;;  %v2392_v62 = vsel %vm2378_vm4, %v2389_v56, %v2391_v7  ;;  %v2468_v44 = vor.u32 %v2467_v57, %v2466_v8  ;;  %v2472_v0 = vshll.u32 %v6419_v45, %v2463_v9 }
 0x46e   : > { %v5618_v18 = vmul.u32.u64.low %v5587_v3, %v2392_v62  ;;  %v5619_v43 = vmul.u32.u64.high %v5587_v3, %v2392_v62, %v5618_v18  ;;  %v5622_v41 = vmul.u32.u64.low %v5587_v3, %v2388_v12  ;;  %v5623_v63 = vmul.u32.u64.high %v5587_v3, %v2388_v12, %v5622_v41 }
 0x46f   : > { %v2471_v27 = vor.u32 %v2470_v1, %v2469_v33  ;;  %v2473_v53 = vshrl.u32 %v6393_v24, %v2464_v32  ;;  %v2465_v31 = vshrl.u32 %v6435_v36, %v2464_v32  ;;  %v2475_v42 = vshll.u32 %v6393_v24, %v2463_v9 }
 0x470   : > { %v2476_v30 = vshrl.u32 %v6394_v37, %v2464_v32  ;;  %v2479_v54 = vshrl.u32 %v6452_v50, %v2464_v32  ;;  %v2400_v25 = vmul.u32 %v5587_v3, %v2384_v29  ;;  %v2478_v4 = vshll.u32 %v6394_v37, %v2463_v9 }
 0x471   : > { %v2474_v55 = vor.u32 %v2473_v53, %v2472_v0  ;;  %vm2481_vm8 = vcmp.lt.s32.totalorder %v5589_v48, 1  ;;  %vm2402_vm10 = vc.u32 %v5619_v43, %v5622_v41  ;;  %v2403_v21 = vadd.s32 1, %v5623_v63 }
 0x472   : > { %v2477_v59 = vor.u32 %v2476_v30, %v2475_v42  ;;  %vm2482_vm11 = vcmp.lt.s32.totalorder %v5589_v48, 2  ;;  %v2480_v6 = vor.u32 %v2479_v54, %v2478_v4  ;;  %vm2483_vm15 = vcmp.lt.s32.totalorder %v5589_v48, 3 }
 0x473   : > { %vm2484_vm2 = vcmp.lt.s32.totalorder %v5589_v48, 4  ;;  %v2489_v19 = vsel %vm2481_vm8, %v2468_v44, %v2471_v27  ;;  %v2404_v3 = vsel %vm2402_vm10, %v2403_v21, %v5623_v63  ;;  %v2493_v2 = vsel %vm2481_vm8, %v2471_v27, %v2474_v55 }
 0x474   : > { %v2486_v52 = vsel %vm2484_vm2, %v2474_v55, 2102212464  ;;  %v2490_v9 = vsel %vm2484_vm2, %v2477_v59, 920167782  ;;  %v2405_v61 = vadd.s32 %v2404_v3, %v2400_v25  ;;  %v2485_v28 = vsel %vm2481_vm8, %v2465_v31, %v2468_v44 }
 0x475   : > { %v2491_v32 = vsel %vm2483_vm15, %v2474_v55, %v2490_v9  ;;  %v2494_v51 = vsel %vm2484_vm2, %v2480_v6, 1326507024  ;;  %v2487_v15 = vsel %vm2483_vm15, %v2471_v27, %v2486_v52  ;;  %vm2564_vm12 = vcmp.gt.s32.totalorder %v5595_v11, 0 }
 0x476   : > { %v2492_v14 = vsel %vm2482_vm11, %v2489_v19, %v2491_v32  ;;  %v2495_v16 = vsel %vm2483_vm15, %v2477_v59, %v2494_v51  ;;  %v2406_v22 = vadd.s32 536870912, %v2405_v61  ;;  %v2560_v46 = vand.u32 8388607, %v6387_v26 }
 0x477   : > { %v2496_v56 = vsel %vm2482_vm11, %v2493_v2, %v2495_v16  ;;  %v5648_v34 = vmul.u32.u64.low %v5591_v35, %v2492_v14  ;;  %v5649_v10 = vmul.u32.u64.high %v5591_v35, %v2492_v14, %v5648_v34  ;;  %v2565_v7 = vsel %vm2564_vm12, %v5595_v11, 0 }
 0x478   : > { %v5653_v38 = vmul.u32.u64.low %v5591_v35, %v2496_v56  ;;  %v5654_v8 = vmul.u32.u64.high %v5591_v35, %v2496_v56, %v5653_v38  ;;  %v5659_v57 = vshrl.u32 %v2406_v22, 30  ;;  %v2488_v33 = vsel %vm2482_vm11, %v2485_v28, %v2487_v15 }
 0x479   : > { %v2567_v29 = vand.u32 31, %v2565_v7  ;;  %v2660_v12 = vand.u32 2139095040, %v5583_v47  ;;  %v2507_v1 = vadd.s32 1, %v5649_v10  ;;  %v2504_v63 = vmul.u32 %v5591_v35, %v2488_v33 }
 0x47a   : > { %v2408_v62 = vshll.u32 %v5659_v57, 30  ;;  %vm2506_vm14 = vc.u32 %v5654_v8, %v5648_v34  ;;  %v2561_v44 = vor.u32 8388608, %v2560_v46  ;;  %v2566_v54 = vshrl.u32 %v2565_v7, 5 }
 0x47b   : > { %v2568_v18 = vsub.s32 32, %v2567_v29  ;;  %v2508_v27 = vsel %vm2506_vm14, %v2507_v1, %v5649_v10  ;;  %v2661_v48 = vshrl.u32 %v2660_v12, 23  ;;  %v2570_v53 = vshll.u32 %v6435_v36, %v2567_v29 }
 0x47c   : > { %v5669_v11 = vsub.s32 %v2405_v61, %v2408_v62  ;;  %v2509_v0 = vadd.s32 %v2508_v27, %v2504_v63  ;;  %v2573_v35 = vshll.u32 %v6427_v49, %v2567_v29  ;;  %v2576_v21 = vshll.u32 %v6419_v45, %v2567_v29 }
 0x47d   : > { %v2571_v31 = vshrl.u32 %v6427_v49, %v2568_v18  ;;  %v2574_v42 = vshrl.u32 %v6419_v45, %v2568_v18  ;;  %v2577_v25 = vshrl.u32 %v6393_v24, %v2568_v18  ;;  %v2601_v59 = vshll.u32 %v2561_v44, 8 }
 0x47e   : > { %v2411_v30 = vsub.s32 0, %v5669_v11  ;;  %v2510_v55 = vadd.s32 536870912, %v2509_v0  ;;  %v2579_v3 = vshll.u32 %v6393_v24, %v2567_v29  ;;  %v2580_v52 = vshrl.u32 %v6394_v37, %v2568_v18 }
 0x47f   : > { %v2572_v4 = vor.u32 %v2571_v31, %v2570_v53  ;;  %v2575_v19 = vor.u32 %v2574_v42, %v2573_v35  ;;  %v2578_v2 = vor.u32 %v2577_v25, %v2576_v21  ;;  %v2582_v61 = vshll.u32 %v6394_v37, %v2567_v29 }
 0x480   : > { %v3661_v6 = vmin.u32 %v2411_v30, %v5669_v11  ;;  %v5682_v9 = vshrl.u32 %v2510_v55, 30  ;;  %v2583_v28 = vshrl.u32 %v6452_v50, %v2568_v18  ;;  %v2581_v51 = vor.u32 %v2580_v52, %v2579_v3 }
 0x481   : > { %vm2585_vm1 = vcmp.lt.s32.totalorder %v2566_v54, 1  ;;  %v3672_v15 = vadd.s32 4294967169, %v2661_v48  ;;  %vm2586_vm9 = vcmp.lt.s32.totalorder %v2566_v54, 2  ;;  %vm2588_vm6 = vcmp.lt.s32.totalorder %v2566_v54, 4 }
 0x482   : > { %v2413_v32 = vclz %v3661_v6  ;;  %v2512_v14 = vshll.u32 %v5682_v9, 30  ;;  %v2584_v16 = vor.u32 %v2583_v28, %v2582_v61  ;;  %vm2587_vm5 = vcmp.lt.s32.totalorder %v2566_v54, 3 }
 0x483   : > { %v2593_v56 = vsel %vm2585_vm1, %v2572_v4, %v2575_v19  ;;  %v2594_v10 = vsel %vm2588_vm6, %v2581_v51, 920167782  ;;  %v2590_v46 = vsel %vm2588_vm6, %v2578_v2, 2102212464  ;;  %v2597_v33 = vsel %vm2585_vm1, %v2575_v19, %v2578_v2 }
 0x484   : > { %v3662_v22 = vadd.s32 4294967294, %v2413_v32  ;;  %v5688_v38 = vsub.s32 %v2509_v0, %v2512_v14  ;;  %v2595_v7 = vsel %vm2587_vm5, %v2578_v2, %v2594_v10  ;;  %v2569_v29 = vshrl.u32 %v6435_v36, %v2568_v18 }
 0x485   : > { %v2596_v12 = vsel %vm2586_vm9, %v2593_v56, %v2595_v7  ;;  %v2598_v62 = vsel %vm2588_vm6, %v2584_v16, 1326507024  ;;  %v2667_v27 = vadd.s32 1, %v3672_v15  ;;  %v2591_v53 = vsel %vm2587_vm5, %v2575_v19, %v2590_v46  ;;  %v2237_v56 = vpop.permute.xlu0 %2236 }
 0x486   : > { %vm3663_vm13 = vcmp.lt.s32.totalorder %v3662_v22, 0  ;;  %v2515_v63 = vsub.s32 0, %v5688_v38  ;;  %v2599_v44 = vsel %vm2587_vm5, %v2581_v51, %v2598_v62  ;;  %v2589_v0 = vsel %vm2585_vm1, %v2569_v29, %v2572_v4 }
 0x487   : > { %v2416_v1 = vsel %vm3663_vm13, 0, %v3662_v22  ;;  %v2600_v31 = vsel %vm2586_vm9, %v2597_v33, %v2599_v44  ;;  %vm2668_vm4 = vcmp.gt.s32.totalorder %v2667_v27, 0  ;;  %v6386_v21 = vand.u32 2147483647, %v5583_v47 }
 0x488   : > { %v2421_v48 = vsub.s32 4294967266, %v2416_v1  ;;  %v3665_v42 = vmin.u32 %v2515_v63, %v5688_v38  ;;  %v5700_v30 = vmul.u32.u64.low %v2601_v59, %v2600_v31  ;;  %v5701_v18 = vmul.u32.u64.high %v2601_v59, %v2600_v31, %v5700_v30 }
 0x489   : > { %v5703_v35 = vmul.u32.u64.low %v2601_v59, %v2596_v12  ;;  %v5704_v25 = vmul.u32.u64.high %v2601_v59, %v2596_v12, %v5703_v35  ;;  %v2669_v6 = vsel %vm2668_vm4, %v2667_v27, 0  ;;  %v2417_v3 = vsub.s32 32, %v2416_v1 }
 0x48a   : > { %v2517_v55 = vclz %v3665_v42  ;;  %v2422_v4 = vadd.s32 127, %v2421_v48  ;;  %v2592_v19 = vsel %vm2586_vm9, %v2589_v0, %v2591_v53  ;;  %v2671_v52 = vand.u32 31, %v2669_v6 }
 0x48b   : > { %vm2610_vm3 = vc.u32 %v5701_v18, %v5703_v35  ;;  %v2401_v61 = vadd.s32 %v5622_v41, %v5619_v43  ;;  %v2611_v28 = vadd.s32 1, %v5704_v25  ;;  %v2608_v32 = vmul.u32 %v2601_v59, %v2592_v19 }
 0x48c   : > { %v3666_v2 = vadd.s32 4294967294, %v2517_v55  ;;  %v2664_v51 = vand.u32 8388607, %v6386_v21  ;;  %v2423_v14 = vshll.u32 %v2422_v4, 23  ;;  %v2672_v16 = vsub.s32 32, %v2671_v52 }
 0x48d   : > { %v2419_v15 = vshrl.u32 %v2401_v61, %v2417_v3  ;;  %v2612_v54 = vsel %vm2610_vm3, %v2611_v28, %v5704_v25  ;;  %v2418_v10 = vshll.u32 %v5669_v11, %v2416_v1  ;;  %v5719_v43 = vadd.f32 %v5577_v60, %v2237_v56 }
 0x48e   : > { %vm3667_vm7 = vcmp.lt.s32.totalorder %v3666_v2, 0  ;;  %v2613_v22 = vadd.s32 %v2612_v54, %v2608_v32  ;;  %v2665_v33 = vor.u32 8388608, %v2664_v51  ;;  %v2424_v59 = vor.u32 4788187, %v2423_v14 }
 0x48f   : > { %v2520_v46 = vsel %vm3667_vm7, 0, %v3666_v2  ;;  %v2420_v41 = vor.u32 %v2419_v15, %v2418_v10  ;;  %v2675_v29 = vshrl.u32 %v6427_v49, %v2672_v16  ;;  %v2678_v12 = vshrl.u32 %v6419_v45, %v2672_v16 }
 0x490   : > { %v2614_v7 = vadd.s32 536870912, %v2613_v22  ;;  %v2525_v62 = vsub.s32 4294967266, %v2520_v46  ;;  %v2681_v44 = vshrl.u32 %v6393_v24, %v2672_v16  ;;  %v2684_v27 = vshrl.u32 %v6394_v37, %v2672_v16 }
 0x491   : > { %v2674_v11 = vshll.u32 %v6435_v36, %v2671_v52  ;;  %v2677_v1 = vshll.u32 %v6427_v49, %v2671_v52  ;;  %v2683_v60 = vshll.u32 %v6393_v24, %v2671_v52  ;;  %v2687_v48 = vshrl.u32 %v6452_v50, %v2672_v16 }
 0x492   : > { %v5723_v63 = vshrl.u32 %v2614_v7, 30  ;;  %v2670_v53 = vshrl.u32 %v2669_v6, 5  ;;  %v2680_v31 = vshll.u32 %v6419_v45, %v2671_v52  ;;  %v5734_v42 = vadd.f32 %v5579_v39, %v2237_v56 }
 0x493   : > { %v2676_v30 = vor.u32 %v2675_v29, %v2674_v11  ;;  %v2679_v25 = vor.u32 %v2678_v12, %v2677_v1  ;;  %v2685_v55 = vor.u32 %v2684_v27, %v2683_v60  ;;  %v2686_v3 = vshll.u32 %v6394_v37, %v2671_v52 }
 0x494   : > { %v2616_v0 = vshll.u32 %v5723_v63, 30  ;;  %v2505_v4 = vadd.s32 %v5648_v34, %v5654_v8  ;;  %v2526_v19 = vadd.s32 127, %v2525_v62  ;;  %v2682_v61 = vor.u32 %v2681_v44, %v2680_v31 }
 0x495   : > { %v2425_v28 = vand.u32 2147483647, %v2424_v59  ;;  %v2427_v32 = vcvt.s32.f32 %v2420_v41  ;;  %v2688_v6 = vor.u32 %v2687_v48, %v2686_v3  ;;  %v2705_v51 = vshll.u32 %v2665_v33, 8 }
 0x496   : > { %v5739_v2 = vsub.s32 %v2613_v22, %v2616_v0  ;;  %v2521_v15 = vsub.s32 32, %v2520_v46  ;;  %vm2689_vm8 = vcmp.lt.s32.totalorder %v2670_v53, 1  ;;  %vm2692_vm10 = vcmp.lt.s32.totalorder %v2670_v53, 4 }
 0x497   : > { %v2673_v14 = vshrl.u32 %v6435_v36, %v2672_v16  ;;  %vm2691_vm11 = vcmp.lt.s32.totalorder %v2670_v53, 3  ;;  %v2697_v52 = vsel %vm2689_vm8, %v2676_v30, %v2679_v25  ;;  %v2698_v54 = vsel %vm2692_vm10, %v2685_v55, 920167782 }
 0x498   : > { %v2619_v39 = vsub.s32 0, %v5739_v2  ;;  %v2527_v34 = vshll.u32 %v2526_v19, 23  ;;  %vm2690_vm15 = vcmp.lt.s32.totalorder %v2670_v53, 2  ;;  %v2694_v8 = vsel %vm2692_vm10, %v2682_v61, 2102212464 }
 0x499   : > { %v2699_v22 = vsel %vm2691_vm11, %v2682_v61, %v2698_v54  ;;  %v2701_v7 = vsel %vm2689_vm8, %v2679_v25, %v2682_v61  ;;  %v2702_v33 = vsel %vm2692_vm10, %v2688_v6, 1326507024  ;;  %v2522_v41 = vshll.u32 %v5688_v38, %v2520_v46 }
 0x49a   : > { %v3669_v56 = vmin.u32 %v2619_v39, %v5739_v2  ;;  %v2700_v10 = vsel %vm2690_vm15, %v2697_v52, %v2699_v22  ;;  %v2523_v59 = vshrl.u32 %v2505_v4, %v2521_v15  ;;  %v2693_v16 = vsel %vm2689_vm8, %v2673_v14, %v2676_v30  ;;  %v5774_v22 = vpop.permute.xlu1 %2241 }
 0x49b   : > { %v2703_v29 = vsel %vm2691_vm11, %v2685_v55, %v2702_v33  ;;  %v2695_v12 = vsel %vm2691_vm11, %v2679_v25, %v2694_v8  ;;  %v5750_v44 = vmul.u32.u64.low %v2705_v51, %v2700_v10  ;;  %v5751_v27 = vmul.u32.u64.high %v2705_v51, %v2700_v10, %v5750_v44 }
 0x49c   : > { %v2704_v62 = vsel %vm2690_vm15, %v2701_v7, %v2703_v29  ;;  %v2428_v11 = vmul.f32 %v2427_v32, %v2425_v28  ;;  %v2528_v1 = vor.u32 4788187, %v2527_v34  ;;  %v2621_v0 = vclz %v3669_v56 }
 0x49d   : > { %v5754_v60 = vmul.u32.u64.low %v2705_v51, %v2704_v62  ;;  %v5755_v48 = vmul.u32.u64.high %v2705_v51, %v2704_v62, %v5754_v60  ;;  %v2764_v31 = vand.u32 2139095040, %v5719_v43  ;;  %v2524_v38 = vor.u32 %v2523_v59, %v2522_v41 }
 0x49e   : > { %v2696_v46 = vsel %vm2690_vm15, %v2693_v16, %v2695_v12  ;;  %v2868_v30 = vand.u32 2139095040, %v5734_v42  ;;  %v2715_v25 = vadd.s32 1, %v5751_v27  ;;  %v2429_v3 = vxor.u32 2147483648, %v2428_v11 }
 0x49f   : > { %v2765_v55 = vshrl.u32 %v2764_v31, 23  ;;  %v2431_v4 = vsub.s32 4, %v5659_v57  ;;  %v2529_v19 = vand.u32 2147483647, %v2528_v1  ;;  %v6385_v61 = vand.u32 2147483647, %v5719_v43 }
 0x4a0   : > { %v3670_v28 = vadd.s32 4294967294, %v2621_v0  ;;  %v2712_v32 = vmul.u32 %v2705_v51, %v2696_v46  ;;  %vm2714_vm2 = vc.u32 %v5755_v48, %v5750_v44  ;;  %v2531_v15 = vcvt.s32.f32 %v2524_v38 }
 0x4a1   : > { %v3676_v6 = vadd.s32 4294967169, %v2765_v55  ;;  %v2716_v53 = vsel %vm2714_vm2, %v2715_v25, %v5751_v27  ;;  %v2869_v39 = vshrl.u32 %v2868_v30, 23  ;;  %vm2347_vm12 = vcmp.lt.s32.totalorder %v5562_v5, 0 }
 0x4a2   : > { %v2717_v14 = vadd.s32 %v2716_v53, %v2712_v32  ;;  %v2430_v54 = vsel %vm2347_vm12, %v2429_v3, %v2428_v11  ;;  %v5768_v34 = vsel %vm2347_vm12, %v2431_v4, %v5659_v57  ;;  %v5770_v8 = vmul.f32 %v2531_v15, %v2529_v19 }
 0x4a3   : > { %v2771_v52 = vadd.s32 1, %v3676_v6  ;;  %v2768_v51 = vand.u32 8388607, %v6385_v61  ;;  %vm3671_vm14 = vcmp.lt.s32.totalorder %v3670_v28, 0  ;;  %v3680_v10 = vadd.s32 4294967169, %v2869_v39 }
 0x4a4   : > { %v2718_v56 = vadd.s32 536870912, %v2717_v14  ;;  %vm5778_vm9 = vcmp.le.f32.partialorder %v2345_v13, 0.7853982  ;;  %v5784_v57 = vadd.f32 %v5581_v40, %v5774_v22  ;;  %v5791_v59 = vadd.s32 %v5703_v35, %v5701_v18 }
 0x4a5   : > { %vm2772_vm1 = vcmp.gt.s32.totalorder %v2771_v52, 0  ;;  %v5798_v13 = vsel %vm5778_vm9, %v5562_v5, %v2430_v54  ;;  %v2533_v12 = vxor.u32 2147483648, %v5770_v8  ;;  %v5801_v40 = vsel %vm3671_vm14, 0, %v3670_v28 }
 0x4a6   : > { %v2773_v33 = vsel %vm2772_vm1, %v2771_v52, 0  ;;  %v5793_v16 = vshrl.u32 %v2718_v56, 30  ;;  %v2769_v11 = vor.u32 8388608, %v2768_v51  ;;  %v2875_v18 = vadd.s32 1, %v3680_v10 }
 0x4a7   : > { %v2775_v29 = vand.u32 31, %v2773_v33  ;;  %v2774_v35 = vshrl.u32 %v2773_v33, 5  ;;  %v6384_v15 = vand.u32 2147483647, %v5734_v42  ;;  %vm2451_vm6 = vcmp.lt.s32.totalorder %v5564_v23, 0 }
 0x4a8   : > { %v2720_v27 = vshll.u32 %v5793_v16, 30  ;;  %v2629_v53 = vsub.s32 4294967266, %v5801_v40  ;;  %v2809_v51 = vshll.u32 %v2769_v11, 8  ;;  %vm2876_vm13 = vcmp.gt.s32.totalorder %v2875_v18, 0 }
 0x4a9   : > { %v2776_v1 = vsub.s32 32, %v2775_v29  ;;  %v2778_v60 = vshll.u32 %v6435_v36, %v2775_v29  ;;  %v2781_v0 = vshll.u32 %v6427_v49, %v2775_v29  ;;  %v2784_v31 = vshll.u32 %v6419_v45, %v2775_v29 }
 0x4aa   : > { %v5808_v38 = vsub.s32 %v2717_v14, %v2720_v27  ;;  %v2787_v25 = vshll.u32 %v6393_v24, %v2775_v29  ;;  %v2790_v4 = vshll.u32 %v6394_v37, %v2775_v29  ;;  %vm2793_vm5 = vcmp.lt.s32.totalorder %v2774_v35, 1 }
 0x4ab   : > { %v2779_v46 = vshrl.u32 %v6427_v49, %v2776_v1  ;;  %v2782_v30 = vshrl.u32 %v6419_v45, %v2776_v1  ;;  %v2785_v55 = vshrl.u32 %v6393_v24, %v2776_v1  ;;  %v2788_v3 = vshrl.u32 %v6394_v37, %v2776_v1 }
 0x4ac   : > { %v2791_v19 = vshrl.u32 %v6452_v50, %v2776_v1  ;;  %v2723_v28 = vsub.s32 0, %v5808_v38  ;;  %v2777_v56 = vshrl.u32 %v6435_v36, %v2776_v1  ;;  %vm2794_vm4 = vcmp.lt.s32.totalorder %v2774_v35, 2 }
 0x4ad   : > { %v2780_v32 = vor.u32 %v2779_v46, %v2778_v60  ;;  %v2783_v6 = vor.u32 %v2782_v30, %v2781_v0  ;;  %v2786_v39 = vor.u32 %v2785_v55, %v2784_v31  ;;  %v2789_v14 = vor.u32 %v2788_v3, %v2787_v25 }
 0x4ae   : > { %v2792_v52 = vor.u32 %v2791_v19, %v2790_v4  ;;  %v3673_v54 = vmin.u32 %v2723_v28, %v5808_v38  ;;  %vm2796_vm3 = vcmp.lt.s32.totalorder %v2774_v35, 4  ;;  %vm2795_vm7 = vcmp.lt.s32.totalorder %v2774_v35, 3 }
 0x4af   : > { %v2801_v10 = vsel %vm2793_vm5, %v2780_v32, %v2783_v6  ;;  %v2798_v29 = vsel %vm2796_vm3, %v2786_v39, 2102212464  ;;  %v2802_v27 = vsel %vm2796_vm3, %v2789_v14, 920167782  ;;  %v2797_v60 = vsel %vm2793_vm5, %v2777_v56, %v2780_v32 }
 0x4b0   : > { %v2725_v33 = vclz %v3673_v54  ;;  %v2803_v0 = vsel %vm2795_vm7, %v2786_v39, %v2802_v27  ;;  %v2805_v46 = vsel %vm2793_vm5, %v2783_v6, %v2786_v39  ;;  %v2806_v31 = vsel %vm2796_vm3, %v2792_v52, 1326507024 }
 0x4b1   : > { %v2799_v25 = vsel %vm2795_vm7, %v2783_v6, %v2798_v29  ;;  %v2804_v55 = vsel %vm2794_vm4, %v2801_v10, %v2803_v0  ;;  %v2807_v3 = vsel %vm2795_vm7, %v2789_v14, %v2806_v31  ;;  %v2630_v11 = vadd.s32 127, %v2629_v53 }
 0x4b2   : > { %v3674_v30 = vadd.s32 4294967294, %v2725_v33  ;;  %v2808_v4 = vsel %vm2794_vm4, %v2805_v46, %v2807_v3  ;;  %v5825_v1 = vmul.u32.u64.low %v2809_v51, %v2804_v55  ;;  %v5826_v19 = vmul.u32.u64.high %v2809_v51, %v2804_v55, %v5825_v1 }
 0x4b3   : > { %v5829_v28 = vmul.u32.u64.low %v2809_v51, %v2808_v4  ;;  %v5830_v54 = vmul.u32.u64.high %v2809_v51, %v2808_v4, %v5829_v28  ;;  %v2877_v32 = vsel %vm2876_vm13, %v2875_v18, 0  ;;  %v2800_v6 = vsel %vm2794_vm4, %v2797_v60, %v2799_v25 }
 0x4b4   : > { %vm3675_vm8 = vcmp.lt.s32.totalorder %v3674_v30, 0  ;;  %v2872_v14 = vand.u32 8388607, %v6384_v15  ;;  %v2879_v53 = vand.u32 31, %v2877_v32  ;;  %v5841_v52 = vsel %vm2451_vm6, %v2533_v12, %v5770_v8 }
 0x4b5   : > { %v5833_v39 = vsel %vm3675_vm8, 0, %v3674_v30  ;;  %v2625_v56 = vsub.s32 32, %v5801_v40  ;;  %v2972_v33 = vand.u32 2139095040, %v5784_v57  ;;  %v2819_v29 = vadd.s32 1, %v5826_v19 }
 0x4b6   : > { %v2733_v35 = vsub.s32 4294967266, %v5833_v39  ;;  %v2880_v27 = vsub.s32 32, %v2879_v53  ;;  %v2631_v60 = vshll.u32 %v2630_v11, 23  ;;  %v2713_v0 = vadd.s32 %v5750_v44, %v5755_v48 }
 0x4b7   : > { %v2816_v8 = vmul.u32 %v2809_v51, %v2800_v6  ;;  %vm2818_vm10 = vc.u32 %v5830_v54, %v5825_v1  ;;  %v2873_v46 = vor.u32 8388608, %v2872_v14  ;;  %v2729_v25 = vsub.s32 32, %v5833_v39 }
 0x4b8   : > { %v2820_v12 = vsel %vm2818_vm10, %v2819_v29, %v5826_v19  ;;  %v2883_v31 = vshrl.u32 %v6427_v49, %v2880_v27  ;;  %v2886_v30 = vshrl.u32 %v6419_v45, %v2880_v27  ;;  %v2878_v3 = vshrl.u32 %v2877_v32, 5 }
 0x4b9   : > { %v2821_v55 = vadd.s32 %v2820_v12, %v2816_v8  ;;  %v2973_v4 = vshrl.u32 %v2972_v33, 23  ;;  %v2734_v11 = vadd.s32 127, %v2733_v35  ;;  %v2882_v28 = vshll.u32 %v6435_v36, %v2879_v53 }
 0x4ba   : > { %v2885_v44 = vshll.u32 %v6427_v49, %v2879_v53  ;;  %v2889_v48 = vshrl.u32 %v6393_v24, %v2880_v27  ;;  %v2888_v19 = vshll.u32 %v6419_v45, %v2879_v53  ;;  %v2891_v6 = vshll.u32 %v6393_v24, %v2879_v53 }
 0x4bb   : > { %v2822_v51 = vadd.s32 536870912, %v2821_v55  ;;  %v2892_v14 = vshrl.u32 %v6394_v37, %v2880_v27  ;;  %vm5866_vm11 = vcmp.le.f32.partialorder %v2449_v58, 0.7853982  ;;  %v2884_v32 = vor.u32 %v2883_v31, %v2882_v28 }
 0x4bc   : > { %v2887_v33 = vor.u32 %v2886_v30, %v2885_v44  ;;  %v2894_v35 = vshll.u32 %v6394_v37, %v2879_v53  ;;  %v2895_v8 = vshrl.u32 %v6452_v50, %v2880_v27  ;;  %v2627_v12 = vshrl.u32 %v5791_v59, %v2625_v56 }
 0x4bd   : > { %v5873_v15 = vshrl.u32 %v2822_v51, 30  ;;  %v2890_v61 = vor.u32 %v2889_v48, %v2888_v19  ;;  %v2893_v41 = vor.u32 %v2892_v14, %v2891_v6  ;;  %v2632_v21 = vor.u32 4788187, %v2631_v60 }
 0x4be   : > { %v2896_v26 = vor.u32 %v2895_v8, %v2894_v35  ;;  %v2913_v62 = vshll.u32 %v2873_v46, 8  ;;  %v3684_v10 = vadd.s32 4294967169, %v2973_v4  ;;  %v2735_v58 = vshll.u32 %v2734_v11, 23 }
 0x4bf   : > { %v2824_v18 = vshll.u32 %v5873_v15, 30  ;;  %vm2897_vm15 = vcmp.lt.s32.totalorder %v2878_v3, 1  ;;  %vm2900_vm2 = vcmp.lt.s32.totalorder %v2878_v3, 4  ;;  %vm2555_vm12 = vcmp.lt.s32.totalorder %v5570_v17, 0 }
 0x4c0   : > { %v2730_v53 = vshll.u32 %v5808_v38, %v5833_v39  ;;  %v2731_v31 = vshrl.u32 %v2713_v0, %v2729_v25  ;;  %v2905_v59 = vsel %vm2897_vm15, %v2884_v32, %v2887_v33  ;;  %v2906_v56 = vsel %vm2900_vm2, %v2893_v41, 920167782 }
 0x4c1   : > { %v5880_v30 = vsub.s32 %v2821_v55, %v2824_v18  ;;  %v2881_v60 = vshrl.u32 %v6435_v36, %v2880_v27  ;;  %vm2899_vm14 = vcmp.lt.s32.totalorder %v2878_v3, 3  ;;  %v2902_v46 = vsel %vm2900_vm2, %v2890_v61, 2102212464 }
 0x4c2   : > { %vm2898_vm1 = vcmp.lt.s32.totalorder %v2878_v3, 2  ;;  %v2907_v4 = vsel %vm2899_vm14, %v2890_v61, %v2906_v56  ;;  %v2909_v11 = vsel %vm2897_vm15, %v2887_v33, %v2890_v61  ;;  %v2910_v28 = vsel %vm2900_vm2, %v2896_v26, 1326507024 }
 0x4c3   : > { %v2736_v44 = vor.u32 4788187, %v2735_v58  ;;  %v2827_v48 = vsub.s32 0, %v5880_v30  ;;  %v2901_v38 = vsel %vm2897_vm15, %v2881_v60, %v2884_v32  ;;  %v2908_v39 = vsel %vm2898_vm1, %v2905_v59, %v2907_v4 }
 0x4c4   : > { %v2903_v0 = vsel %vm2899_vm14, %v2887_v33, %v2902_v46  ;;  %v2911_v25 = vsel %vm2899_vm14, %v2893_v41, %v2910_v28  ;;  %v5887_v18 = vmul.u32.u64.low %v2913_v62, %v2908_v39  ;;  %v5888_v55 = vmul.u32.u64.high %v2913_v62, %v2908_v39, %v5887_v18 }
 0x4c5   : > { %v2537_v27 = vsel %vm5866_vm11, %v5564_v23, %v5841_v52  ;;  %v3677_v26 = vmin.u32 %v2827_v48, %v5880_v30  ;;  %v2912_v61 = vsel %vm2898_vm1, %v2909_v11, %v2911_v25  ;;  %v2979_v51 = vadd.s32 1, %v3684_v10 }
 0x4c6   : > { %v6457_v19 = vshll.u32 %v5739_v2, %v5801_v40  ;;  %v2732_v14 = vor.u32 %v2731_v31, %v2730_v53  ;;  %v5900_v41 = vmul.u32.u64.low %v2913_v62, %v2912_v61  ;;  %v5901_v32 = vmul.u32.u64.high %v2913_v62, %v2912_v61, %v5900_v41 }
 0x4c7   : > { %v2633_v33 = vand.u32 2147483647, %v2632_v21  ;;  %v2829_v35 = vclz %v3677_v26  ;;  %v2904_v8 = vsel %vm2898_vm1, %v2901_v38, %v2903_v0  ;;  %vm2980_vm5 = vcmp.gt.s32.totalorder %v2979_v51, 0 }
 0x4c8   : > { %v2628_v6 = vor.u32 %v2627_v12, %v6457_v19  ;;  %v2737_v58 = vand.u32 2147483647, %v2736_v44  ;;  %v2923_v52 = vadd.s32 1, %v5888_v55  ;;  %v6458_v59 = vand.u32 2147483647, %v5784_v57 }
 0x4c9   : > { %v2981_v10 = vsel %vm2980_vm5, %v2979_v51, 0  ;;  %3952 = vcosq.f32 %v2537_v27  ;;  %v6459_v2 = vsub.s32 4, %v5723_v63  ;;  %v3678_v21 = vadd.s32 4294967294, %v2829_v35 }
 0x4ca   : > { %v2976_v56 = vand.u32 8388607, %v6458_v59  ;;  %v2983_v12 = vand.u32 31, %v2981_v10  ;;  %v2635_v3 = vcvt.s32.f32 %v2628_v6  ;;  %v2739_v53 = vcvt.s32.f32 %v2732_v14 }
 0x4cb   : > { %v5912_v40 = vsel %vm2555_vm12, %v6459_v2, %v5723_v63  ;;  %v2920_v31 = vmul.u32 %v2913_v62, %v2904_v8  ;;  %vm2922_vm13 = vc.u32 %v5901_v32, %v5887_v18  ;;  %3954 = vsinq.f32 %v2537_v27 }
 0x4cc   : > { %vm3679_vm4 = vcmp.lt.s32.totalorder %v3678_v21, 0  ;;  %v2924_v60 = vsel %vm2922_vm13, %v2923_v52, %v5888_v55  ;;  %v2984_v46 = vsub.s32 32, %v2983_v12  ;;  %v2636_v4 = vmul.f32 %v2635_v3, %v2633_v33 }
 0x4cd   : > { %v5917_v11 = vmul.f32 %v2739_v53, %v2737_v58  ;;  %v2925_v28 = vadd.s32 %v2924_v60, %v2920_v31  ;;  %v2977_v44 = vor.u32 8388608, %v2976_v56  ;;  %v5919_v63 = vsel %vm3679_vm4, 0, %v3678_v21 }
 0x4ce   : > { %v5921_v48 = vshrl.u32 %v2981_v10, 5  ;;  %v2992_v38 = vshll.u32 %v6419_v45, %v2983_v12  ;;  %v5926_v62 = vadd.f32 %v5585_v20, %v5774_v22  ;;  %v2987_v0 = vshrl.u32 %v6427_v49, %v2984_v46 }
 0x4cf   : > { %v2926_v39 = vadd.s32 536870912, %v2925_v28  ;;  %v2990_v25 = vshrl.u32 %v6419_v45, %v2984_v46  ;;  %v2993_v55 = vshrl.u32 %v6393_v24, %v2984_v46  ;;  %v2986_v27 = vshll.u32 %v6435_v36, %v2983_v12 }
 0x4d0   : > { %v2989_v26 = vshll.u32 %v6427_v49, %v2983_v12  ;;  %v2995_v61 = vshll.u32 %v6393_v24, %v2983_v12  ;;  %v2996_v51 = vshrl.u32 %v6394_v37, %v2984_v46  ;;  %v2637_v19 = vxor.u32 2147483648, %v2636_v4 }
 0x4d1   : > { %v2741_v6 = vxor.u32 2147483648, %v5917_v11  ;;  %v5936_v20 = vshrl.u32 %v2926_v39, 30  ;;  %v2994_v22 = vor.u32 %v2993_v55, %v2992_v38  ;;  %v2837_v14 = vsub.s32 4294967266, %v5919_v63 }
 0x4d2   : > { %v2988_v41 = vor.u32 %v2987_v0, %v2986_v27  ;;  %v2991_v33 = vor.u32 %v2990_v25, %v2989_v26  ;;  %v2997_v35 = vor.u32 %v2996_v51, %v2995_v61  ;;  %v6460_v8 = vand.u32 2147483647, %v5570_v17 }
 0x4d3   : > { %v2928_v52 = vshll.u32 %v5936_v20, 30  ;;  %v2998_v59 = vshll.u32 %v6394_v37, %v2983_v12  ;;  %v2999_v56 = vshrl.u32 %v6452_v50, %v2984_v46  ;;  %v3017_v10 = vshll.u32 %v2977_v44, 8  ;;  %v5948_v2 = vpop.eup %3952 }
 0x4d4   : > { %vm5941_vm3 = vcmp.le.f32.partialorder %v6460_v8, 0.7853982  ;;  %vm2659_vm7 = vcmp.lt.s32.totalorder %v5583_v47, 0  ;;  %v2833_v21 = vsub.s32 32, %v5919_v63  ;;  %v2985_v3 = vshrl.u32 %v6435_v36, %v2984_v46 }
 0x4d5   : > { %vm3004_vm8 = vcmp.lt.s32.totalorder %v5921_v48, 4  ;;  %v3076_v53 = vand.u32 2139095040, %v5926_v62  ;;  %v5955_v31 = vsub.s32 %v2925_v28, %v2928_v52  ;;  %v3000_v60 = vor.u32 %v2999_v56, %v2998_v59  ;;  %v5960_v44 = vpop.eup %3954 }
 0x4d6   : > { %vm3001_vm10 = vcmp.lt.s32.totalorder %v5921_v48, 1  ;;  %v3006_v12 = vsel %vm3004_vm8, %v2994_v22, 2102212464  ;;  %v2838_v38 = vadd.s32 127, %v2837_v14  ;;  %vm3003_vm15 = vcmp.lt.s32.totalorder %v5921_v48, 3 }
 0x4d7   : > { %v3009_v39 = vsel %vm3001_vm10, %v2988_v41, %v2991_v33  ;;  %v3010_v46 = vsel %vm3004_vm8, %v2997_v35, 920167782  ;;  %v6463_v0 = vand.u32 2147483647, %v5583_v47  ;;  %v2931_v25 = vsub.s32 0, %v5955_v31 }
 0x4d8   : > { %vm3002_vm14 = vcmp.lt.s32.totalorder %v5921_v48, 2  ;;  %v3011_v55 = vsel %vm3003_vm15, %v2994_v22, %v3010_v46  ;;  %v3013_v27 = vsel %vm3001_vm10, %v2991_v33, %v2994_v22  ;;  %v3005_v26 = vsel %vm3001_vm10, %v2985_v3, %v2988_v41 }
 0x4d9   : > { %vm5967_vm2 = vcmp.le.f32.partialorder %v6463_v0, 0.7853982  ;;  %v3007_v61 = vsel %vm3003_vm15, %v2991_v33, %v3006_v12  ;;  %v3012_v51 = vsel %vm3002_vm14, %v3009_v39, %v3011_v55  ;;  %v3014_v14 = vsel %vm3004_vm8, %v3000_v60, 1326507024 }
 0x4da   : > { %v3681_v8 = vmin.u32 %v2931_v25, %v5955_v31  ;;  %v3015_v52 = vsel %vm3003_vm15, %v2997_v35, %v3014_v14  ;;  %v5978_v59 = vmul.u32.u64.low %v3017_v10, %v3012_v51  ;;  %v5979_v56 = vmul.u32.u64.high %v3017_v10, %v3012_v51, %v5978_v59 }
 0x4db   : > { %v6466_v0 = vsel %vm5778_vm9, 0, %v5768_v34  ;;  %v2638_v22 = vsel %vm2555_vm12, %v2637_v19, %v2636_v4  ;;  %v3016_v41 = vsel %vm3002_vm14, %v3013_v27, %v3015_v52  ;;  %v3077_v33 = vshrl.u32 %v3076_v53, 23 }
 0x4dc   : > { %v5985_v46 = vadd.s32 3, %v6466_v0  ;;  %v2817_v3 = vadd.s32 %v5825_v1, %v5830_v54  ;;  %v2933_v35 = vclz %v3681_v8  ;;  %3956 = vcosq.f32 %v5798_v13 }
 0x4dd   : > { %v5993_v60 = vmul.u32.u64.low %v3017_v10, %v3016_v41  ;;  %v5994_v12 = vmul.u32.u64.high %v3017_v10, %v3016_v41, %v5993_v60  ;;  %v2642_v34 = vsel %vm5941_vm3, 0, %v5912_v40  ;;  %v3008_v7 = vsel %vm3002_vm14, %v3005_v26, %v3007_v61 }
 0x4de   : > { %v3688_v4 = vadd.s32 4294967169, %v3077_v33  ;;  %v2742_v19 = vsel %vm2659_vm7, %v2741_v6, %v5917_v11  ;;  %v2835_v53 = vshrl.u32 %v2817_v3, %v2833_v21  ;;  %v2839_v1 = vshll.u32 %v2838_v38, 23 }
 0x4df   : > { %v3027_v54 = vadd.s32 1, %v5979_v56  ;;  %v2641_v39 = vsel %vm5941_vm3, %v5570_v17, %v2638_v22  ;;  %v6388_v25 = vand.u32 2147483647, %v5926_v62  ;;  %v2535_v40 = vsub.s32 4, %v5682_v9 }
 0x4e0   : > { %v3083_v55 = vadd.s32 1, %v3688_v4  ;;  %v2834_v48 = vshll.u32 %v5880_v30, %v5919_v63  ;;  %v3682_v27 = vadd.s32 4294967294, %v2933_v35  ;;  %v3024_v26 = vmul.u32 %v3017_v10, %v3008_v7 }
 0x4e1   : > { %vm3026_vm9 = vc.u32 %v5994_v12, %v5978_v59  ;;  %3958 = vsinq.f32 %v5798_v13  ;;  %v2745_v11 = vsel %vm5967_vm2, %v5583_v47, %v2742_v19  ;;  %v6021_v21 = vor.u32 4788187, %v2839_v1 }
 0x4e2   : > { %v3028_v6 = vsel %vm3026_vm9, %v3027_v54, %v5979_v56  ;;  %vm3084_vm12 = vcmp.gt.s32.totalorder %v3083_v55, 0  ;;  %3960 = vcosq.f32 %v2641_v39  ;;  %v6019_v58 = vor.u32 %v2835_v53, %v2834_v48 }
 0x4e3   : > { %v3029_v38 = vadd.s32 %v3028_v6, %v3024_v26  ;;  %3962 = vsinq.f32 %v2641_v39  ;;  %v6023_v30 = vadd.s32 3, %v2642_v34  ;;  %v3080_v63 = vand.u32 8388607, %v6388_v25 }
 0x4e4   : > { %v3085_v13 = vsel %vm3084_vm12, %v3083_v55, 0  ;;  %3964 = vcosq.f32 %v2745_v11  ;;  %vm3683_vm1 = vcmp.lt.s32.totalorder %v3682_v27, 0  ;;  %v2536_v61 = vsel %vm2451_vm6, %v2535_v40, %v5682_v9 }
 0x4e5   : > { %v3030_v10 = vadd.s32 536870912, %v3029_v38  ;;  %3966 = vsinq.f32 %v2745_v11  ;;  %v6032_v51 = vadd.s32 %v5887_v18, %v5901_v32  ;;  %v3087_v14 = vand.u32 31, %v3085_v13 }
 0x4e6   : > { %v6040_v41 = vpop.eup %3956  ;;  %v6042_v33 = vsel %vm3683_vm1, 0, %v3682_v27  ;;  %v3081_v9 = vor.u32 8388608, %v3080_v63  ;;  %v2538_v18 = vsel %vm5866_vm11, 0, %v2536_v61  ;;  %v6047_v32 = vadd.s32 %v5978_v59, %v5994_v12 }
 0x4e7   : > { %v6037_v0 = vshrl.u32 %v3030_v10, 30  ;;  %v3088_v3 = vsub.s32 32, %v3087_v14  ;;  %v3090_v60 = vshll.u32 %v6435_v36, %v3087_v14  ;;  %v2743_v34 = vsub.s32 4, %v5793_v16 }
 0x4e8   : > { %v3093_v4 = vshll.u32 %v6427_v49, %v3087_v14  ;;  %v2941_v29 = vsub.s32 4294967266, %v6042_v33  ;;  %v3086_v59 = vshrl.u32 %v3085_v13, 5  ;;  %v3096_v12 = vshll.u32 %v6419_v45, %v3087_v14 }
 0x4e9   : > { %v3032_v35 = vshll.u32 %v6037_v0, 30  ;;  %v3091_v7 = vshrl.u32 %v6427_v49, %v3088_v3  ;;  %v3094_v19 = vshrl.u32 %v6419_v45, %v3088_v3  ;;  %v3097_v53 = vshrl.u32 %v6393_v24, %v3088_v3 }
 0x4ea   : > { %v2937_v39 = vsub.s32 32, %v6042_v33  ;;  %v6063_v48 = vshll.u32 %v3081_v9, 8  ;;  %v3099_v6 = vshll.u32 %v6393_v24, %v3087_v14  ;;  %v3102_v13 = vshll.u32 %v6394_v37, %v3087_v14 }
 0x4eb   : > { %v6057_v1 = vsub.s32 %v3029_v38, %v3032_v35  ;;  %v6060_v54 = vpop.eup %3958  ;;  %v3092_v55 = vor.u32 %v3091_v7, %v3090_v60  ;;  %v3095_v40 = vor.u32 %v3094_v19, %v3093_v4  ;;  %v3098_v11 = vor.u32 %v3097_v53, %v3096_v12 }
 0x4ec   : > { %v6065_v27 = vpop.eup %3960  ;;  %v3100_v38 = vshrl.u32 %v6394_v37, %v3088_v3  ;;  %v3103_v10 = vshrl.u32 %v6452_v50, %v3088_v3  ;;  %v2542_v61 = vadd.s32 3, %v2538_v18  ;;  %v2744_v9 = vsel %vm2659_vm7, %v2743_v34, %v5793_v16 }
 0x4ed   : > { %v3035_v26 = vsub.s32 0, %v6057_v1  ;;  %v6070_v63 = vpop.eup %3962  ;;  %v2942_v60 = vadd.s32 127, %v2941_v29  ;;  %vm3105_vm6 = vcmp.lt.s32.totalorder %v3086_v59, 1  ;;  %v3089_v53 = vshrl.u32 %v6435_v36, %v3088_v3 }
 0x4ee   : > { %v6077_v35 = vpop.eup %3964  ;;  %v3101_v4 = vor.u32 %v3100_v38, %v3099_v6  ;;  %v3104_v12 = vor.u32 %v3103_v10, %v3102_v13  ;;  %vm3108_vm11 = vcmp.lt.s32.totalorder %v3086_v59, 4  ;;  %v3113_v14 = vsel %vm3105_vm6, %v3092_v55, %v3095_v40 }
 0x4ef   : > { %v3685_v7 = vmin.u32 %v3035_v26, %v6057_v1  ;;  %v3967_v19 = vpop.eup %3966  ;;  %vm3107_vm5 = vcmp.lt.s32.totalorder %v3086_v59, 3  ;;  %v3110_v18 = vsel %vm3108_vm11, %v3098_v11, 2102212464  ;;  %vm3106_vm13 = vcmp.lt.s32.totalorder %v3086_v59, 2 }
 0x4f0   : > { %v3114_v56 = vsel %vm3108_vm11, %v3101_v4, 920167782  ;;  %v3117_v16 = vsel %vm3105_vm6, %v3095_v40, %v3098_v11  ;;  %v2543_v34 = vand.u32 3, %v2542_v61  ;;  %v3109_v29 = vsel %vm3105_vm6, %v3089_v53, %v3092_v55 }
 0x4f1   : > { %v3037_v25 = vclz %v3685_v7  ;;  %v3115_v52 = vsel %vm3107_vm5, %v3098_v11, %v3114_v56  ;;  %v3118_v6 = vsel %vm3108_vm11, %v3104_v12, 1326507024  ;;  %v3111_v38 = vsel %vm3107_vm5, %v3095_v40, %v3110_v18 }
 0x4f2   : > { %v3116_v26 = vsel %vm3106_vm13, %v3113_v14, %v3115_v52  ;;  %v3119_v8 = vsel %vm3107_vm5, %v3101_v4, %v3118_v6  ;;  %v2938_v10 = vshll.u32 %v5955_v31, %v6042_v33  ;;  %v2939_v55 = vshrl.u32 %v6032_v51, %v2937_v39 }
 0x4f3   : > { %v3686_v22 = vadd.s32 4294967294, %v3037_v25  ;;  %v6083_v3 = vmul.u32.u64.low %v6063_v48, %v3116_v26  ;;  %v6084_v13 = vmul.u32.u64.high %v6063_v48, %v3116_v26, %v6083_v3  ;;  %v3120_v56 = vsel %vm3106_vm13, %v3117_v16, %v3119_v8 }
 0x4f4   : > { %v2746_v25 = vsel %vm5967_vm2, 0, %v2744_v9  ;;  %v6094_v40 = vmul.u32.u64.low %v6063_v48, %v3120_v56  ;;  %v6095_v11 = vmul.u32.u64.high %v6063_v48, %v3120_v56, %v6094_v40  ;;  %vm2541_vm3 = vweird.f32 %v5564_v23 }
 0x4f5   : > { %vm3687_vm4 = vcmp.lt.s32.totalorder %v3686_v22, 0  ;;  %vm2749_vm7 = vweird.f32 %v5583_v47  ;;  %v2943_v61 = vshll.u32 %v2942_v60, 23  ;;  %v3112_v31 = vsel %vm3106_vm13, %v3109_v29, %v3111_v38 }
 0x4f6   : > { %v3040_v52 = vsel %vm3687_vm4, 0, %v3686_v22  ;;  %v2754_v33 = vxor.u32 2147483648, %v3967_v19  ;;  %v3131_v8 = vadd.s32 1, %v6084_v13  ;;  %vm2545_vm8 = vcmp.eq.s32.totalorder %v2543_v34, 0 }
 0x4f7   : > { %v3045_v7 = vsub.s32 4294967266, %v3040_v52  ;;  %vm2548_vm10 = vcmp.eq.s32.totalorder %v2543_v34, 2  ;;  %v2750_v28 = vadd.s32 3, %v2746_v25  ;;  %v6467_v22 = vxor.u32 2147483648, %v5960_v44 }
 0x4f8   : > { %v6468_v9 = vxor.u32 2147483648, %v5948_v2  ;;  %v2757_v60 = vxor.u32 2147483648, %v6077_v35  ;;  %v2940_v53 = vor.u32 %v2939_v55, %v2938_v10  ;;  %v3128_v59 = vmul.u32 %v6063_v48, %v3112_v31 }
 0x4f9   : > { %v3046_v51 = vadd.s32 127, %v3045_v7  ;;  %v2547_v39 = vsel %vm2545_vm8, %v5948_v2, %v6467_v22  ;;  %vm3130_vm15 = vc.u32 %v6095_v11, %v6083_v3  ;;  %v2751_v12 = vand.u32 3, %v2750_v28 }
 0x4fa   : > { %v2550_v4 = vsel %vm2548_vm10, %v6468_v9, %v5960_v44  ;;  %v2944_v14 = vor.u32 4788187, %v2943_v61  ;;  %v3041_v18 = vsub.s32 32, %v3040_v52  ;;  %v3132_v16 = vsel %vm3130_vm15, %v3131_v8, %v6084_v13 }
 0x4fb   : > { %vm2544_vm2 = vcmp.lt.s32.totalorder %v2543_v34, 2  ;;  %v3133_v29 = vadd.s32 %v3132_v16, %v3128_v59  ;;  %vm2753_vm14 = vcmp.eq.s32.totalorder %v2751_v12, 0  ;;  %vm2756_vm9 = vcmp.eq.s32.totalorder %v2751_v12, 2 }
 0x4fc   : > { %v2551_v26 = vsel %vm2544_vm2, %v2547_v39, %v2550_v4  ;;  %v3047_v2 = vshll.u32 %v3046_v51, 23  ;;  %vm2752_vm12 = vcmp.lt.s32.totalorder %v2751_v12, 2  ;;  %v2755_v44 = vsel %vm2753_vm14, %v6077_v35, %v2754_v33 }
 0x4fd   : > { %v2758_v6 = vsel %vm2756_vm9, %v2757_v60, %v3967_v19  ;;  %v3134_v38 = vadd.s32 536870912, %v3133_v29  ;;  %v2439_v10 = vand.u32 3, %v5985_v46  ;;  %v2442_v56 = vxor.u32 2147483648, %v6060_v54 }
 0x4fe   : > { %v2759_v48 = vsel %vm2752_vm12, %v2755_v44, %v2758_v6  ;;  %v3043_v25 = vshrl.u32 %v6047_v32, %v3041_v18  ;;  %v2552_v34 = vsel %vm2541_vm3, nan, %v2551_v26  ;;  %v2445_v55 = vxor.u32 2147483648, %v6040_v41 }
 0x4ff   : > { %v2760_v13 = vsel %vm2749_vm7, nan, %v2759_v48  ;;  %v3042_v40 = vshll.u32 %v6057_v1, %v3040_v52  ;;  %v6122_v35 = vshrl.u32 %v3134_v38, 30  ;;  %vm2441_vm1 = vcmp.eq.s32.totalorder %v2439_v10, 0 }
 0x500   : > { %v3723_v19 = vpack.c.bf16 %v2760_v13, %v2552_v34  ;;  %v3048_v61 = vor.u32 4788187, %v3047_v2  ;;  %v2443_v46 = vsel %vm2441_vm1, %v6040_v41, %v2442_v56  ;;  %vm2444_vm6 = vcmp.eq.s32.totalorder %v2439_v10, 2 }
 0x501   : > { %v2647_v32 = vand.u32 3, %v6023_v30  ;;  %v3136_v23 = vshll.u32 %v6122_v35, 30  ;;  %v2446_v47 = vsel %vm2444_vm6, %v2445_v55, %v6060_v54  ;;  %v2650_v7 = vxor.u32 2147483648, %v6070_v63 }
 0x502   : > { %3724 = vmatprep.subr.bf16.mxu1 %v3723_v19  ;;  %v2653_v31 = vxor.u32 2147483648, %v6065_v27  ;;  %v2945_v1 = vand.u32 2147483647, %v2944_v14  ;;  %v3044_v52 = vor.u32 %v3043_v25, %v3042_v40  ;;  %vm2440_vm11 = vcmp.lt.s32.totalorder %v2439_v10, 2 }
 0x503   : > { %vm2649_vm5 = vcmp.eq.s32.totalorder %v2647_v32, 0  ;;  %v3137_v33 = vsub.s32 %v3133_v29, %v3136_v23  ;;  %v2447_v8 = vsel %vm2440_vm11, %v2443_v46, %v2446_v47  ;;  %vm2652_vm13 = vcmp.eq.s32.totalorder %v2647_v32, 2 }
 0x504   : > { %v2651_v41 = vsel %vm2649_vm5, %v6065_v27, %v2650_v7  ;;  %v2947_v28 = vcvt.s32.f32 %v2940_v53  ;;  %v3049_v30 = vand.u32 2147483647, %v3048_v61  ;;  %vm2648_vm4 = vcmp.lt.s32.totalorder %v2647_v32, 2 }
 0x505   : > { %v2654_v51 = vsel %vm2652_vm13, %v2653_v31, %v6070_v63  ;;  %v3139_v22 = vsub.s32 0, %v3137_v33  ;;  %vm2437_vm3 = vweird.f32 %v5562_v5  ;;  %vm2645_vm7 = vweird.f32 %v5570_v17 }
 0x506   : > { %v2655_v54 = vsel %vm2648_vm4, %v2651_v41, %v2654_v51  ;;  %v6469_v39 = vand.u32 2147483647, %v6021_v21  ;;  %v6470_v9 = vcvt.s32.f32 %v6019_v58  ;;  %v3051_v60 = vcvt.s32.f32 %v3044_v52 }
 0x507   : > { %v2448_v59 = vsel %vm2437_vm3, nan, %v2447_v8  ;;  %v2656_v27 = vsel %vm2645_vm7, nan, %v2655_v54  ;;  %v2948_v12 = vmul.f32 %v2947_v28, %v2945_v1  ;;  %v3689_v53 = vmin.u32 %v3139_v22, %v3137_v33 }
 0x508   : > { %v2844_v4 = vmul.f32 %v6470_v9, %v6469_v39  ;;  %v3725_v14 = vpack.c.bf16 %v2656_v27, %v2448_v59  ;;  %v3052_v18 = vmul.f32 %v3051_v60, %v3049_v30  ;;  %vm2763_vm8 = vcmp.lt.s32.totalorder %v5719_v43, 0 }
 0x509   : > { %v3141_v16 = vclz %v3689_v53  ;;  %v2949_v29 = vxor.u32 2147483648, %v2948_v12  ;;  %vm2867_vm15 = vcmp.lt.s32.totalorder %v5734_v42, 0  ;;  %vm2971_vm2 = vcmp.lt.s32.totalorder %v5784_v57, 0 }
 0x50a   : > { %3726 = vmatpush1.bf16.msra.mxu1 %v3725_v14  ;;  %v2845_v63 = vxor.u32 2147483648, %v2844_v4  ;;  %v3053_v26 = vxor.u32 2147483648, %v3052_v18  ;;  %v3129_v2 = vadd.s32 %v6083_v3, %v6095_v11  ;;  %v6471_v38 = vand.u32 2147483647, %v5719_v43 }
 0x50b   : > { %v3690_v5 = vadd.s32 4294967294, %v3141_v16  ;;  %v2950_v21 = vsel %vm2867_vm15, %v2949_v29, %v2948_v12  ;;  %v6474_v10 = vand.u32 2147483647, %v5734_v42  ;;  %v6477_v40 = vand.u32 2147483647, %v5784_v57 }
 0x50c   : > { %v2846_v17 = vsel %vm2763_vm8, %v2845_v63, %v2844_v4  ;;  %vm6149_vm14 = vcmp.le.f32.partialorder %v6471_v38, 0.7853982  ;;  %v3054_v25 = vsel %vm2971_vm2, %v3053_v26, %v3052_v18  ;;  %v3055_v23 = vsub.s32 4, %v6037_v0 }
 0x50d   : > { %vm3691_vm10 = vcmp.lt.s32.totalorder %v3690_v5, 0  ;;  %vm6155_vm9 = vcmp.le.f32.partialorder %v6474_v10, 0.7853982  ;;  %v2849_v3 = vsel %vm6149_vm14, %v5719_v43, %v2846_v17  ;;  %vm6169_vm12 = vcmp.le.f32.partialorder %v6477_v40, 0.7853982 }
 0x50e   : > { %v3144_v58 = vsel %vm3691_vm10, 0, %v3690_v5  ;;  %v2953_v55 = vsel %vm6155_vm9, %v5734_v42, %v2950_v21  ;;  %v3057_v61 = vsel %vm6169_vm12, %v5784_v57, %v3054_v25  ;;  %3968 = vcosq.f32 %v2849_v3 }
 0x50f   : > { %v3145_v44 = vsub.s32 32, %v3144_v58  ;;  %v3149_v6 = vsub.s32 4294967266, %v3144_v58  ;;  %v3146_v11 = vshll.u32 %v3137_v33, %v3144_v58  ;;  %3970 = vcosq.f32 %v2953_v55 }
 0x510   : > { %3972 = vcosq.f32 %v3057_v61  ;;  %v2951_v7 = vsub.s32 4, %v5936_v20  ;;  %v2847_v31 = vsub.s32 4, %v5873_v15  ;;  %v3056_v33 = vsel %vm2971_vm2, %v3055_v23, %v6037_v0 }
 0x511   : > { %v3147_v34 = vshrl.u32 %v3129_v2, %v3145_v44  ;;  %v3150_v13 = vadd.s32 127, %v3149_v6  ;;  %3974 = vsinq.f32 %v3057_v61  ;;  %v3159_v41 = vsub.s32 4, %v6122_v35 }
 0x512   : > { %3976 = vsinq.f32 %v2953_v55  ;;  %v2952_v28 = vsel %vm2867_vm15, %v2951_v7, %v5936_v20  ;;  %v2848_v30 = vsel %vm2763_vm8, %v2847_v31, %v5873_v15  ;;  %v3058_v22 = vsel %vm6169_vm12, 0, %v3056_v33 }
 0x513   : > { %v3148_v46 = vor.u32 %v3147_v34, %v3146_v11  ;;  %v3151_v32 = vshll.u32 %v3150_v13, 23  ;;  %3978 = vsinq.f32 %v2849_v3  ;;  %vm3075_vm1 = vcmp.lt.s32.totalorder %v5926_v62, 0 }
 0x514   : > { %v6480_v54 = vand.u32 2147483647, %v5926_v62  ;;  %v2954_v20 = vsel %vm6155_vm9, 0, %v2952_v28  ;;  %v3160_v9 = vsel %vm3075_vm1, %v3159_v41, %v6122_v35  ;;  %v2850_v15 = vsel %vm6149_vm14, 0, %v2848_v30  ;;  %v3177_v28 = vld [vmem:[%s6355_s5] sm:$0x1]  ;;  %v3182_v30 = vpop.permute.xlu0 %3181 }
 0x515   : > { %v3152_v47 = vor.u32 4788187, %v3151_v32  ;;  %v3155_v52 = vcvt.s32.f32 %v3148_v46  ;;  %v3062_v27 = vadd.s32 3, %v3058_v22  ;;  %v2958_v53 = vadd.s32 3, %v2954_v20 }
 0x516   : > { %vm6194_vm6 = vcmp.le.f32.partialorder %v6480_v54, 0.7853982  ;;  %v2854_v16 = vadd.s32 3, %v2850_v15  ;;  %vm3061_vm12 = vweird.f32 %v5784_v57 }
 0x517   : > { %v3153_v1 = vand.u32 2147483647, %v3152_v47  ;;  %v3162_v14 = vsel %vm6194_vm6, 0, %v3160_v9  ;;  %v3063_v5 = vand.u32 3, %v3062_v27  ;;  %v2959_v26 = vand.u32 3, %v2958_v53 }
 0x518   : > { %v3969_v4 = vpop.eup %3968  ;;  %v3166_v29 = vadd.s32 3, %v3162_v14  ;;  %v2855_v44 = vand.u32 3, %v2854_v16 }
 0x519   : > { %v3156_v8 = vmul.f32 %v3155_v52, %v3153_v1  ;;  %v3971_v59 = vpop.eup %3970  ;;  %v2861_v38 = vxor.u32 2147483648, %v3969_v4  ;;  %vm3065_vm11 = vcmp.eq.s32.totalorder %v3063_v5, 0  ;;  %vm3068_vm5 = vcmp.eq.s32.totalorder %v3063_v5, 2 }
 0x51a   : > { %v3973_v12 = vpop.eup %3972  ;;  %v2965_v2 = vxor.u32 2147483648, %v3971_v59  ;;  %v3167_v48 = vand.u32 3, %v3166_v29  ;;  %vm2961_vm13 = vcmp.eq.s32.totalorder %v2959_v26, 0  ;;  %vm2964_vm4 = vcmp.eq.s32.totalorder %v2959_v26, 2 }
 0x51b   : > { %v3157_v51 = vxor.u32 2147483648, %v3156_v8  ;;  %v3975_v18 = vpop.eup %3974  ;;  %v3069_v58 = vxor.u32 2147483648, %v3973_v12  ;;  %vm2857_vm3 = vcmp.eq.s32.totalorder %v2855_v44, 0  ;;  %vm2860_vm7 = vcmp.eq.s32.totalorder %v2855_v44, 2 }
 0x51c   : > { %v3977_v35 = vpop.eup %3976  ;;  %v3066_v17 = vxor.u32 2147483648, %v3975_v18  ;;  %vm3064_vm8 = vcmp.lt.s32.totalorder %v3063_v5, 2  ;;  %vm2960_vm10 = vcmp.lt.s32.totalorder %v2959_v26, 2  ;;  %vm3172_vm15 = vcmp.eq.s32.totalorder %v3167_v48, 2 }
 0x51d   : > { %v3158_v39 = vsel %vm3075_vm1, %v3157_v51, %v3156_v8  ;;  %v3979_v63 = vpop.eup %3978  ;;  %v2962_v21 = vxor.u32 2147483648, %v3977_v35  ;;  %v3070_v56 = vsel %vm3068_vm5, %v3069_v58, %v3975_v18  ;;  %v2966_v11 = vsel %vm2964_vm4, %v2965_v2, %v3977_v35 }
 0x51e   : > { %v3161_v60 = vsel %vm6194_vm6, %v5926_v62, %v3158_v39  ;;  %v2858_v6 = vxor.u32 2147483648, %v3979_v63  ;;  %v3067_v10 = vsel %vm3065_vm11, %v3973_v12, %v3066_v17  ;;  %v2862_v40 = vsel %vm2860_vm7, %v2861_v38, %v3979_v63 }
 0x51f   : > { %3980 = vcosq.f32 %v3161_v60  ;;  %v2963_v3 = vsel %vm2961_vm13, %v3971_v59, %v2962_v21  ;;  %v3071_v61 = vsel %vm3064_vm8, %v3067_v10, %v3070_v56  ;;  %vm3169_vm2 = vcmp.eq.s32.totalorder %v3167_v48, 0 }
 0x520   : > { %3982 = vsinq.f32 %v3161_v60  ;;  %v2859_v55 = vsel %vm2857_vm3, %v3969_v4, %v2858_v6  ;;  %v2967_v46 = vsel %vm2960_vm10, %v2963_v3, %v2966_v11  ;;  %vm2856_vm14 = vcmp.lt.s32.totalorder %v2855_v44, 2 }
 0x521   : > { %vm3168_vm9 = vcmp.lt.s32.totalorder %v3167_v48, 2  ;;  %v2863_v47 = vsel %vm2856_vm14, %v2859_v55, %v2862_v40  ;;  %vm2957_vm1 = vweird.f32 %v5734_v42  ;;  %vm3165_vm6 = vweird.f32 %v5926_v62 }
 0x522   : > { %v3072_v31 = vsel %vm3061_vm12, nan, %v3071_v61  ;;  %v2968_v1 = vsel %vm2957_vm1, nan, %v2967_v46  ;;  %vm2853_vm11 = vweird.f32 %v5719_v43  ;;  %v3184_v42 = vlaneseq }
 0x523   : > { %v2864_v8 = vsel %vm2853_vm11, nan, %v2863_v47 }
 0x524   : > { %v3729_v41 = vpack.c.bf16 %v3072_v31, %v2864_v8  ;;  %v6217_v57 = vshrl.u32 %v3184_v42, 7 }
 0x526   : > { %v3186_v62 = vsub.s32 0, %v6217_v57 }
 0x528   : > { %v3187_v51 = vrot.slane %v3182_v30, %v3186_v62 }
 0x529   : > { %v3981_v25 = vpop.eup %3980 }
 0x52a   : > { %v3983_v34 = vpop.eup %3982  ;;  %v3173_v13 = vxor.u32 2147483648, %v3981_v25 }
 0x52b   : > { %v3170_v19 = vxor.u32 2147483648, %v3983_v34 }
 0x52c   : > { %v3174_v32 = vsel %vm3172_vm15, %v3173_v13, %v3983_v34 }
 0x52d   : > { %v3171_v23 = vsel %vm3169_vm2, %v3981_v25, %v3170_v19 }
 0x52e   : > { %v3175_v7 = vsel %vm3168_vm9, %v3171_v23, %v3174_v32 }
 0x52f   : > { %v3176_v52 = vsel %vm3165_vm6, nan, %v3175_v7 }
 0x530   : > { %v3727_v33 = vpack.c.bf16 %v3176_v52, %v2968_v1 }
 0x532   : > { %3728 = vmatprep.subr.bf16.mxu1 %v3727_v33 }
 0x533   : > { %3730 = vmatpush1.bf16.msra.mxu1 %v3729_v41 }
 0x536   : > { %3692 = vmatmul.mubr.msk.f32.vlgmr.msra.gmra.mrb[12].mxu1 %vm1280_vm0, %v3177_v28 }
 0x609   : > { %v3257_v43 = vpop.f32.mrb[12].mxu1 }
 0x60a   : > { %v6220_v22 = vadd.f32 %v3257_v43, %v3187_v51  ;;  %v3259_v54 = vpop.f32.mrb[13].mxu1 }
 0x60b   : > { %v6222_v0 = vadd.f32 %v3259_v54, %v3187_v51 }
 0x60c   : > { %v3262_v39 = vand.u32 2147483647, %v6220_v22  ;;  %v3265_v20 = vand.u32 2139095040, %v6220_v22  ;;  %vm3264_vm6 = vcmp.lt.s32.totalorder %v6220_v22, 0 }
 0x60d   : > { %v3369_v9 = vand.u32 2139095040, %v6222_v0  ;;  %v3366_v60 = vand.u32 2147483647, %v6222_v0 }
 0x60e   : > { %v3266_v4 = vshrl.u32 %v3265_v20, 23  ;;  %v3269_v15 = vand.u32 8388607, %v3262_v39  ;;  %vm3263_vm11 = vcmp.le.f32.partialorder %v3262_v39, 0.7853982 }
 0x60f   : > { %v3370_v59 = vshrl.u32 %v3369_v9, 23  ;;  %v3373_v18 = vand.u32 8388607, %v3366_v60 }
 0x610   : > { %v3693_v27 = vadd.s32 4294967169, %v3266_v4  ;;  %v3270_v14 = vor.u32 8388608, %v3269_v15 }
 0x611   : > { %v3697_v12 = vadd.s32 4294967169, %v3370_v59  ;;  %v3374_v17 = vor.u32 8388608, %v3373_v18 }
 0x612   : > { %v3272_v53 = vadd.s32 1, %v3693_v27  ;;  %v6232_v26 = vshll.u32 %v3270_v14, 8 }
 0x613   : > { %v3376_v16 = vadd.s32 1, %v3697_v12 }
 0x614   : > { %vm3273_vm0 = vcmp.gt.s32.totalorder %v3272_v53, 0 }
 0x615   : > { %v3274_v35 = vsel %vm3273_vm0, %v3272_v53, 0  ;;  %vm3377_vm5 = vcmp.gt.s32.totalorder %v3376_v16, 0  ;;  %vm3368_vm0 = vcmp.lt.s32.totalorder %v6222_v0, 0 }
 0x616   : > { %v3275_v63 = vshrl.u32 %v3274_v35, 5  ;;  %v3276_v29 = vand.u32 31, %v3274_v35  ;;  %v3378_v5 = vsel %vm3377_vm5, %v3376_v16, 0  ;;  %v3414_v35 = vshll.u32 %v3374_v17, 8 }
 0x617   : > { %v6235_v2 = vshrl.u32 %v3378_v5, 5  ;;  %v3380_v44 = vand.u32 31, %v3378_v5  ;;  %vm3367_vm5 = vcmp.le.f32.partialorder %v3366_v60, 0.7853982 }
 0x618   : > { %v3277_v58 = vsub.s32 32, %v3276_v29  ;;  %v3279_v21 = vshll.u32 %v6435_v36, %v3276_v29  ;;  %v3282_v6 = vshll.u32 %v6427_v49, %v3276_v29  ;;  %v3285_v38 = vshll.u32 %v6419_v45, %v3276_v29 }
 0x619   : > { %v3288_v48 = vshll.u32 %v6393_v24, %v3276_v29  ;;  %v3291_v10 = vshll.u32 %v6394_v37, %v3276_v29  ;;  %vm3294_vm13 = vcmp.lt.s32.totalorder %v3275_v63, 1  ;;  %vm3295_vm4 = vcmp.lt.s32.totalorder %v3275_v63, 2 }
 0x61a   : > { %v3280_v56 = vshrl.u32 %v6427_v49, %v3277_v58  ;;  %v3283_v25 = vshrl.u32 %v6419_v45, %v3277_v58  ;;  %v3286_v3 = vshrl.u32 %v6393_v24, %v3277_v58  ;;  %v3278_v11 = vshrl.u32 %v6435_v36, %v3277_v58 }
 0x61b   : > { %v3289_v34 = vshrl.u32 %v6394_v37, %v3277_v58  ;;  %v3292_v13 = vshrl.u32 %v6452_v50, %v3277_v58  ;;  %v3381_v61 = vsub.s32 32, %v3380_v44  ;;  %vm3296_vm3 = vcmp.lt.s32.totalorder %v3275_v63, 3 }
 0x61c   : > { %v3281_v55 = vor.u32 %v3280_v56, %v3279_v21  ;;  %v3284_v40 = vor.u32 %v3283_v25, %v3282_v6  ;;  %v3287_v19 = vor.u32 %v3286_v3, %v3285_v38  ;;  %vm3297_vm7 = vcmp.lt.s32.totalorder %v3275_v63, 4 }
 0x61d   : > { %v3290_v46 = vor.u32 %v3289_v34, %v3288_v48  ;;  %v3293_v32 = vor.u32 %v3292_v13, %v3291_v10  ;;  %v3383_v8 = vshll.u32 %v6435_v36, %v3380_v44  ;;  %v3384_v62 = vshrl.u32 %v6427_v49, %v3381_v61 }
 0x61e   : > { %v3298_v23 = vsel %vm3294_vm13, %v3278_v11, %v3281_v55  ;;  %v3299_v47 = vsel %vm3297_vm7, %v3287_v19, 2102212464  ;;  %v3302_v7 = vsel %vm3294_vm13, %v3281_v55, %v3284_v40  ;;  %v3306_v31 = vsel %vm3294_vm13, %v3284_v40, %v3287_v19 }
 0x61f   : > { %v3300_v1 = vsel %vm3296_vm3, %v3284_v40, %v3299_v47  ;;  %v3303_v52 = vsel %vm3297_vm7, %v3290_v46, 920167782  ;;  %v3307_v33 = vsel %vm3297_vm7, %v3293_v32, 1326507024  ;;  %v3386_v30 = vshll.u32 %v6427_v49, %v3380_v44 }
 0x620   : > { %v3304_v41 = vsel %vm3296_vm3, %v3287_v19, %v3303_v52  ;;  %v3308_v28 = vsel %vm3296_vm3, %v3290_v46, %v3307_v33  ;;  %v3301_v51 = vsel %vm3295_vm4, %v3298_v23, %v3300_v1  ;;  %v3387_v20 = vshrl.u32 %v6419_v45, %v3381_v61 }
 0x621   : > { %v3305_v43 = vsel %vm3295_vm4, %v3302_v7, %v3304_v41  ;;  %v3309_v54 = vsel %vm3295_vm4, %v3306_v31, %v3308_v28  ;;  %v3385_v27 = vor.u32 %v3384_v62, %v3383_v8  ;;  %v3389_v49 = vshll.u32 %v6419_v45, %v3380_v44 }
 0x622   : > { %v6258_v9 = vmul.u32.u64.low %v6232_v26, %v3309_v54  ;;  %v6259_v4 = vmul.u32.u64.high %v6232_v26, %v3309_v54, %v6258_v9  ;;  %v6262_v15 = vmul.u32.u64.low %v6232_v26, %v3305_v43  ;;  %v6263_v59 = vmul.u32.u64.high %v6232_v26, %v3305_v43, %v6262_v15 }
 0x623   : > { %v3388_v12 = vor.u32 %v3387_v20, %v3386_v30  ;;  %v3390_v53 = vshrl.u32 %v6393_v24, %v3381_v61  ;;  %v3392_v14 = vshll.u32 %v6393_v24, %v3380_v44  ;;  %v3393_v18 = vshrl.u32 %v6394_v37, %v3381_v61 }
 0x624   : > { %v3396_v16 = vshrl.u32 %v6452_v50, %v3381_v61  ;;  %v3317_v63 = vmul.u32 %v6232_v26, %v3301_v51  ;;  %v3382_v29 = vshrl.u32 %v6435_v36, %v3381_v61  ;;  %v3395_v58 = vshll.u32 %v6394_v37, %v3380_v44 }
 0x625   : > { %v3391_v5 = vor.u32 %v3390_v53, %v3389_v49  ;;  %vm3319_vm8 = vc.u32 %v6259_v4, %v6262_v15  ;;  %v3320_v45 = vadd.s32 1, %v6263_v59  ;;  %v3394_v21 = vor.u32 %v3393_v18, %v3392_v14 }
 0x626   : > { %vm3398_vm10 = vcmp.lt.s32.totalorder %v6235_v2, 1  ;;  %v3397_v24 = vor.u32 %v3396_v16, %v3395_v58  ;;  %vm3400_vm15 = vcmp.lt.s32.totalorder %v6235_v2, 3  ;;  %vm3401_vm2 = vcmp.lt.s32.totalorder %v6235_v2, 4 }
 0x627   : > { %v3406_v50 = vsel %vm3398_vm10, %v3385_v27, %v3388_v12  ;;  %v3321_v26 = vsel %vm3319_vm8, %v3320_v45, %v6263_v59  ;;  %v3403_v17 = vsel %vm3401_vm2, %v3391_v5, 2102212464  ;;  %v3407_v36 = vsel %vm3401_vm2, %v3394_v21, 920167782 }
 0x628   : > { %v3410_v6 = vsel %vm3398_vm10, %v3388_v12, %v3391_v5  ;;  %v3322_v38 = vadd.s32 %v3321_v26, %v3317_v63  ;;  %vm3399_vm14 = vcmp.lt.s32.totalorder %v6235_v2, 2  ;;  %v3408_v37 = vsel %vm3400_vm15, %v3391_v5, %v3407_v36 }
 0x629   : > { %v3411_v44 = vsel %vm3401_vm2, %v3397_v24, 1326507024  ;;  %v3402_v48 = vsel %vm3398_vm10, %v3382_v29, %v3385_v27  ;;  %v3404_v10 = vsel %vm3400_vm15, %v3388_v12, %v3403_v17  ;;  %v3409_v56 = vsel %vm3399_vm14, %v3406_v50, %v3408_v37 }
 0x62a   : > { %v3412_v25 = vsel %vm3400_vm15, %v3394_v21, %v3411_v44  ;;  %v3323_v3 = vadd.s32 536870912, %v3322_v38  ;;  %v6280_v34 = vmul.u32.u64.low %v3414_v35, %v3409_v56  ;;  %v6281_v13 = vmul.u32.u64.high %v3414_v35, %v3409_v56, %v6280_v34 }
 0x62b   : > { %v3413_v11 = vsel %vm3399_vm14, %v3410_v6, %v3412_v25  ;;  %v3405_v61 = vsel %vm3399_vm14, %v3402_v48, %v3404_v10  ;;  %v3318_v43 = vadd.s32 %v6262_v15, %v6259_v4  ;;  %vm3354_vm7 = vweird.f32 %v6220_v22 }
 0x62c   : > { %v6283_v55 = vmul.u32.u64.low %v3414_v35, %v3413_v11  ;;  %v6284_v40 = vmul.u32.u64.high %v3414_v35, %v3413_v11, %v6283_v55  ;;  %v3324_v19 = vshrl.u32 %v3323_v3, 30  ;;  %v3424_v32 = vadd.s32 1, %v6281_v13 }
 0x62d   : > { %v3421_v2 = vmul.u32 %v3414_v35, %v3405_v61  ;;  %vm3458_vm2 = vweird.f32 %v6222_v0  ;;  %vm3490_vm14 = vcmp.lt.s32.totalorder %v3184_v42, 256 }
 0x62e   : > { %v3325_v46 = vshll.u32 %v3324_v19, 30  ;;  %vm3423_vm9 = vc.u32 %v6284_v40, %v6280_v34  ;;  %v3422_v5 = vadd.s32 %v6280_v34, %v6284_v40  ;;  %v3348_v15 = vsub.s32 4, %v3324_v19 }
 0x62f   : > { %v3425_v47 = vsel %vm3423_vm9, %v3424_v32, %v6281_v13 }
 0x630   : > { %v3326_v23 = vsub.s32 %v3322_v38, %v3325_v46  ;;  %v3426_v7 = vadd.s32 %v3425_v47, %v3421_v2  ;;  %v3349_v38 = vsel %vm3264_vm6, %v3348_v15, %v3324_v19 }
 0x631   : > { %v3351_v48 = vsel %vm3263_vm11, 0, %v3349_v38 }
 0x632   : > { %v3328_v31 = vsub.s32 0, %v3326_v23  ;;  %v3427_v1 = vadd.s32 536870912, %v3426_v7  ;;  %v3355_v11 = vadd.s32 3, %v3351_v48 }
 0x634   : > { %v3694_v52 = vmin.u32 %v3328_v31, %v3326_v23  ;;  %v3428_v33 = vshrl.u32 %v3427_v1, 30  ;;  %v3356_v55 = vand.u32 3, %v3355_v11  ;;  %v4064_v31 = vmov 1966171168  }
 0x635   : > { %v3474_v1 = vunpack.c.l.s4 %v4064_v31 }
 0x636   : > { %v3330_v8 = vclz %v3694_v52  ;;  %v3429_v41 = vshll.u32 %v3428_v33, 30  ;;  %v3452_v3 = vsub.s32 4, %v3428_v33  ;;  %vm3361_vm13 = vcmp.eq.s32.totalorder %v3356_v55, 2 }
 0x637   : > { %vm3358_vm4 = vcmp.eq.s32.totalorder %v3356_v55, 0  ;;  %vm3357_vm3 = vcmp.lt.s32.totalorder %v3356_v55, 2 }
 0x638   : > { %v3695_v28 = vadd.s32 4294967294, %v3330_v8  ;;  %v3430_v62 = vsub.s32 %v3426_v7, %v3429_v41  ;;  %v3453_v13 = vsel %vm3368_vm0, %v3452_v3, %v3428_v33 }
 0x639   : > { %v3455_v61 = vsel %vm3367_vm5, 0, %v3453_v13 }
 0x63a   : > { %vm3696_vm12 = vcmp.lt.s32.totalorder %v3695_v28, 0  ;;  %v3432_v51 = vsub.s32 0, %v3430_v62 }
 0x63b   : > { %v3333_v30 = vsel %vm3696_vm12, 0, %v3695_v28  ;;  %v3475_v28 = vunpack.c.0.s8 %v3474_v1 }
 0x63c   : > { %v3334_v54 = vsub.s32 32, %v3333_v30  ;;  %v3338_v20 = vsub.s32 4294967266, %v3333_v30  ;;  %v3698_v9 = vmin.u32 %v3432_v51, %v3430_v62  ;;  %v3335_v59 = vshll.u32 %v3326_v23, %v3333_v30 }
 0x63d   : > { %v3459_v23 = vadd.s32 3, %v3455_v61 }
 0x63e   : > { %v3336_v27 = vshrl.u32 %v3318_v43, %v3334_v54  ;;  %v3339_v12 = vadd.s32 127, %v3338_v20  ;;  %v3434_v49 = vclz %v3698_v9 }
 0x63f   : > { %v3460_v33 = vand.u32 3, %v3459_v23 }
 0x640   : > { %v3337_v53 = vor.u32 %v3336_v27, %v3335_v59  ;;  %v3340_v14 = vshll.u32 %v3339_v12, 23  ;;  %v3699_v18 = vadd.s32 4294967294, %v3434_v49 }
 0x641   : > { %vm3465_vm8 = vcmp.eq.s32.totalorder %v3460_v33, 2  ;;  %vm3462_vm10 = vcmp.eq.s32.totalorder %v3460_v33, 0  ;;  %vm3461_vm15 = vcmp.lt.s32.totalorder %v3460_v33, 2 }
 0x642   : > { %v3341_v16 = vor.u32 4788187, %v3340_v14  ;;  %vm3700_vm1 = vcmp.lt.s32.totalorder %v3699_v18, 0  ;;  %v3344_v63 = vcvt.s32.f32 %v3337_v53 }
 0x643   : > { %v3437_v29 = vsel %vm3700_vm1, 0, %v3699_v18 }
 0x644   : > { %v3342_v35 = vand.u32 2147483647, %v3341_v16  ;;  %v3438_v58 = vsub.s32 32, %v3437_v29  ;;  %v3442_v45 = vsub.s32 4294967266, %v3437_v29  ;;  %v3439_v21 = vshll.u32 %v3430_v62, %v3437_v29 }
 0x646   : > { %v3345_v4 = vmul.f32 %v3344_v63, %v3342_v35  ;;  %v3440_v24 = vshrl.u32 %v3422_v5, %v3438_v58  ;;  %v3443_v50 = vadd.s32 127, %v3442_v45 }
 0x648   : > { %v3346_v26 = vxor.u32 2147483648, %v3345_v4  ;;  %v3441_v17 = vor.u32 %v3440_v24, %v3439_v21  ;;  %v3444_v36 = vshll.u32 %v3443_v50, 23 }
 0x64a   : > { %v3347_v6 = vsel %vm3264_vm6, %v3346_v26, %v3345_v4  ;;  %v3445_v44 = vor.u32 4788187, %v3444_v36  ;;  %v3448_v56 = vcvt.s32.f32 %v3441_v17 }
 0x64b   : > { %v3350_v37 = vsel %vm3263_vm11, %v6220_v22, %v3347_v6  ;;  %v3478_v22 = vsub.s32 %v3475_v28, %v6217_v57 }
 0x64c   : > { %3984 = vcosq.f32 %v3350_v37  ;;  %v3446_v10 = vand.u32 2147483647, %v3445_v44 }
 0x64d   : > { %3986 = vsinq.f32 %v3350_v37 }
 0x64e   : > { %v3449_v25 = vmul.f32 %v3448_v56, %v3446_v10 }
 0x650   : > { %v3450_v34 = vxor.u32 2147483648, %v3449_v25 }
 0x652   : > { %v3451_v39 = vsel %vm3368_vm0, %v3450_v34, %v3449_v25 }
 0x653   : > { %v3454_v40 = vsel %vm3367_vm5, %v6222_v0, %v3451_v39 }
 0x654   : > { %3988 = vcosq.f32 %v3454_v40 }
 0x655   : > { %3990 = vsinq.f32 %v3454_v40 }
 0x656   : > { %v3985_v19 = vpop.eup %3984 }
 0x657   : > { %v3987_v46 = vpop.eup %3986  ;;  %v3362_v32 = vxor.u32 2147483648, %v3985_v19 }
 0x658   : > { %v3359_v2 = vxor.u32 2147483648, %v3987_v46 }
 0x659   : > { %v3363_v47 = vsel %vm3361_vm13, %v3362_v32, %v3987_v46 }
 0x65a   : > { %v3360_v7 = vsel %vm3358_vm4, %v3985_v19, %v3359_v2 }
 0x65b   : > { %v3364_v60 = vsel %vm3357_vm3, %v3360_v7, %v3363_v47 }
 0x65c   : > { %v3365_v52 = vsel %vm3354_vm7, nan, %v3364_v60 }
 0x65e   : > { %v3989_v8 = vpop.eup %3988 }
 0x65f   : > { %v3991_v41 = vpop.eup %3990  ;;  %v3466_v62 = vxor.u32 2147483648, %v3989_v8 }
 0x660   : > { %v3463_v30 = vxor.u32 2147483648, %v3991_v41 }
 0x661   : > { %v3467_v51 = vsel %vm3465_vm8, %v3466_v62, %v3991_v41 }
 0x662   : > { %v3464_v43 = vsel %vm3462_vm10, %v3989_v8, %v3463_v30 }
 0x663   : > { %v3468_v54 = vsel %vm3461_vm15, %v3464_v43, %v3467_v51 }
 0x664   : > { %v3469_v20 = vsel %vm3458_vm2, nan, %v3468_v54 }
 0x665   : > { %v3472_v9 = vcombine.low %v3365_v52, %v3469_v20 }
 0x667   : > { %v3479_v59 = vrot.slane %v3472_v9, %v3478_v22 }
 0x669   : > { %v3486_v27 = vrot.slane %v3479_v59, %v3478_v22 }
 0x66b   : > { %3492 = vst.msk [vmem:[%s274_s9] sm:$0x3] %vm3490_vm14, %v3486_v27 }
 0x66c   : > { %4005 = shalt.err (!%p4002_p3)
}
 0x66d   : > { %s4006_s21 = scalar_lea.hbm %s6308_s14, 32  ;;  %s4010_s24 = scalar_lea.hbm %s6357_s7, 64 }
 0x66e   : > { %p4007_p4 = scmp.ne.s32.totalorder %s6308_s14, %s4006_s21  ;;  %p4011_p9 = scmp.lt.u32.totalorder %s6308_s14, %s6357_s7 }
 0x66f   : > { %p4012_p10 = scmp.lt.u32.totalorder %s4010_s24, %s4006_s21  ;;  %p4014_p12 = scmp.lt.u32.totalorder %s4006_s21, %s6308_s14 }
 0x670   : > { %p4008_p7 = pnand %p4007_p4, %p4147_p5 }
 0x671   : > { %p4013_p11 = por %p4012_p10, %p4011_p9 }
 0x672   : > { %p4009_p8 = pneg %p4008_p7 }
 0x673   : > { %p4015_p13 = por %p4014_p12, %p4013_p11 }
 0x675   : > { %p4016_p0 = pnand %p4015_p13, %p4009_p8 }
 0x677   : > { %4019 = shalt.err (!%p4016_p0)
}
 0x678   : > { %3837 = dma.vmem_to_hbm [thread:$0]  (%p4147_p5), %s6310_s10, 32, %s6308_s14, %s3494_s17  }
 0x679 PF: > { %p3843_p1 = scmp.ge.s32.totalorder %s4054_s29, 2  ;;  %s3520_s9 = sand.u32 1, %s4042_s26  }
 0x67a   : > { %s3521_s15 = scalar_lea.sflag [#allocation4], %s3520_s9 }
 0x67b   : > { %p3840_p2 = pnand %p3843_p1, %p4151_p6 }
 0x67d   : > { %4037 = dma.done.wait (!%p3840_p2), %s3521_s15, 32  }
 0x67e   : > { %4039 = vsyncadd (!%p3840_p2), %s3521_s15, 4294967264  ;;  %p19_p3 = scmp.ge.s32.totalorder %s4134_s8, 4   ;;  %s6483_s26 = smov %s4046_s27 }
 0x67f   : > { %s6484_s27 = smov %s4050_s28  ;;  %s6485_s28 = smov %s4145_s11 }
 0x680   : > { %s6486_s29 = smov %s4134_s8  ;;  %21 = sbr.rel (!%p19_p3) target bundleno = 6 (0x6), region = 85 }
 0x687   :  { %3526 = vsyncpa [#allocation4], 1 }
 0x688   :  { %3528 = vsyncpa [#allocation4 + $0x1], 1 }

</bundles_post_ra>
